<compile_context>
chip_gen: v6e
topology: v6e:2x2x1
jax: 0.10.0
libtpu: 0.0.40
codegen_flags: <defaults>
</compile_context>

<pallas_src>
import functools

import numpy as np
import jax
import jax.numpy as jnp
from jax.experimental import pallas as pl
from jax.experimental.pallas import tpu as pltpu

N_INPUTS = 25                   # forward() indexes x[:, 24]  -> 25 input columns
N_OUTPUTS = 6 + 32 * 6          # forward() indexes y[:, 6+32*6-1] -> 198 outputs
N_OUT_PAD = 256                 # lane-dense (multiple of 128) padded output width
WIDTH = 512
N_HIDDEN_LAYERS = 5
DEFAULT_MAX_TILE_B = 512        # batch tile upper bound (multiple of 256-wide MXU)


def _silu(x):
    # x * sigmoid(x) written with a single transcendental (tanh) per element.
    return x * (0.5 * jnp.tanh(0.5 * x) + 0.5)


def _round_up(n, m):
    return ((n + m - 1) // m) * m


# ---------------------------------------------------------------------------
# Constant signed-permutation matrices (host-side only; folded into weights).
# ---------------------------------------------------------------------------
def _make_flip_matrix():
    """xf = x @ F  with  xf[:, i] = sign[i] * x[:, perm[i]].  F = F^T, F @ F = I."""
    perm = np.arange(N_INPUTS)
    sign = np.ones(N_INPUTS, np.float32)
    perm[0:8] = np.arange(8, 16);  sign[0:8] = -1.0
    perm[8:16] = np.arange(0, 8);  sign[8:16] = -1.0
    sign[16] = -1.0
    sign[18] = -1.0
    perm[23] = 24
    perm[24] = 23
    m = np.zeros((N_INPUTS, N_INPUTS), np.float32)
    m[perm, np.arange(N_INPUTS)] = sign
    return m


def _make_unflip_matrix():
    """yu = yf @ U  with  yu[:, i] = sign[i] * yf[:, perm[i]]  (padded to 256).

    Column 0 is fixed with sign +1, so the flipped branch's Mahalanobis
    correction can be applied to column 0 of the folded output."""
    perm = np.arange(N_OUTPUTS)
    sign = np.ones(N_OUTPUTS, np.float32)
    sign[1] = -1.0
    sign[3] = -1.0
    perm[4] = 5
    perm[5] = 4
    perm[6 + 32 * 0:6 + 32 * 2] = np.arange(6 + 32 * 3, 6 + 32 * 5)
    perm[6 + 32 * 2:6 + 32 * 3] = np.arange(6 + 32 * 5, 6 + 32 * 6)
    sign[6 + 32 * 2:6 + 32 * 3] = -1.0
    perm[6 + 32 * 3:6 + 32 * 5] = np.arange(6 + 32 * 0, 6 + 32 * 2)
    perm[6 + 32 * 5:6 + 32 * 6] = np.arange(6 + 32 * 2, 6 + 32 * 3)
    sign[6 + 32 * 5:6 + 32 * 6] = -1.0
    m = np.zeros((N_OUT_PAD, N_OUT_PAD), np.float32)
    m[perm, np.arange(N_OUTPUTS)] = sign
    return m


# ---------------------------------------------------------------------------
# Fused kernel: (MLP + Mahalanobis) for both symmetry branches, shared hidden
# layers run once at doubled M, average, clip.  Flip / un-flip live entirely
# in the pre-folded parameters.
# ---------------------------------------------------------------------------
def _fused_net_kernel(x_ref, w_in_ref, b_in_ref, w_hid_ref, b_hid_ref,
                      w_out_ref, b_out_ref, mean_ref, icov_ref, o_ref):
    tb = x_ref.shape[0]
    x = x_ref[...]                                              # (TB, 25) f32
    xb = x.astype(jnp.bfloat16)

    # First layer, both branches (input flip folded into w_in_ref[1]).
    h0 = jnp.dot(xb, w_in_ref[0], preferred_element_type=jnp.float32)
    h1 = jnp.dot(xb, w_in_ref[1], preferred_element_type=jnp.float32)

    # Merge branches along the batch/sublane axis -> shared hidden chain runs
    # once with doubled M.
    h = _silu(jnp.concatenate([h0, h1], axis=0) + b_in_ref[...])    # (2TB, 512)

    for i in range(N_HIDDEN_LAYERS):                            # static unroll
        h = _silu(jnp.dot(h.astype(jnp.bfloat16), w_hid_ref[i],
                          preferred_element_type=jnp.float32)
                  + b_hid_ref[pl.ds(i, 1), :])

    # Output layer: branch 0 uses w_out, branch 1 uses w_out @ unflip (folded),
    # so no separate un-flip matmul is needed.
    y = (jnp.dot(h[:tb].astype(jnp.bfloat16), w_out_ref[0],
                 preferred_element_type=jnp.float32) + b_out_ref[0])
    yu = (jnp.dot(h[tb:].astype(jnp.bfloat16), w_out_ref[1],
                  preferred_element_type=jnp.float32) + b_out_ref[1])

    # Squared Mahalanobis distances for both branches (flip folded into set 1:
    # mean_flip = mean @ F, inv_cov_flip = F @ inv_cov @ F).
    def mahal(j):
        d = x - mean_ref[j]                                     # (TB, 25)
        return jnp.sum(jnp.dot(d, icov_ref[j],
                               preferred_element_type=jnp.float32) * d,
                       axis=1, keepdims=True)                   # (TB, 1)

    maha = mahal(0) + mahal(1)

    col = jax.lax.broadcasted_iota(jnp.int32, (1, N_OUT_PAD), 1)
    e0 = (col == 0).astype(jnp.float32)                         # one-hot column 0
    # Average of the two corrected branches; correction affects column 0 only.
    fused = 0.5 * (y + yu) - maha * (0.5 / (2.0 * N_INPUTS)) * e0

    # Clip only columns 4 and 5 to [0, 1].
    clip_cols = jnp.logical_or(col == 4, col == 5)
    o_ref[...] = jnp.where(clip_cols, jnp.clip(fused, 0.0, 1.0), fused)


def _const_spec(arr):
    nd = arr.ndim
    return pl.BlockSpec(arr.shape, lambda i, _nd=nd: (0,) * _nd)


def _net_pallas(x_pad, params, tile_b):
    """x_pad: (B_pad, 25) f32 with B_pad a multiple of tile_b."""
    b_pad = x_pad.shape[0]
    (w_in2, b_in, w_hid, b_hid, w_out2, b_out2, mean2, icov2) = params

    return pl.pallas_call(
        _fused_net_kernel,
        out_shape=jax.ShapeDtypeStruct((b_pad, N_OUT_PAD), jnp.float32),
        grid=(b_pad // tile_b,),
        in_specs=[
            pl.BlockSpec((tile_b, N_INPUTS), lambda i: (i, 0)),   # x tile
            _const_spec(w_in2), _const_spec(b_in),
            _const_spec(w_hid), _const_spec(b_hid),
            _const_spec(w_out2), _const_spec(b_out2),
            _const_spec(mean2), _const_spec(icov2),
        ],
        out_specs=pl.BlockSpec((tile_b, N_OUT_PAD), lambda i: (i, 0)),
        compiler_params=pltpu.CompilerParams(
            dimension_semantics=("parallel",),
            vmem_limit_bytes=64 * 1024 * 1024),
    )(x_pad, w_in2, b_in, w_hid, b_hid, w_out2, b_out2, mean2, icov2)


def _select_tile(b, max_tile):
    """Bucketed batch tile: bounded recompile count; grid >= 2 when b >= max_tile."""
    b8 = _round_up(max(b, 1), 8)
    if b8 >= 2 * max_tile:
        return max_tile
    if b8 >= max_tile:
        return max(max_tile // 2, 8)    # keep >= 2 grid steps (v7x: 2 TensorCores)
    t = 8
    while t < b8:                        # next power of two >= b8 (bounded buckets)
        t *= 2
    return t


@functools.partial(jax.jit, static_argnames=("max_tile_b",))
def net_forward(x, params, max_tile_b=DEFAULT_MAX_TILE_B):
    """Full forward pass equivalent to Net.forward (x: (B, 25) f32)."""
    b = x.shape[0]
    tile = _select_tile(b, max_tile_b)
    b_pad = _round_up(b, tile)
    # TODO(synk): a ragged final tile (instead of padding the tail to a full
    # tile) would avoid running the MLP on up to tile-1 padded rows.
    x_pad = jnp.pad(x, ((0, b_pad - b), (0, 0))) if b_pad != b else x
    out = _net_pallas(x_pad, params, tile)                     # (B_pad, 256)
    return out[:b, :N_OUTPUTS]


# ---------------------------------------------------------------------------
# Parameter construction (deterministic, PyTorch-style Linear init) + folding.
# ---------------------------------------------------------------------------
def _linear_init(key, fan_in, fan_out):
    kw, kb = jax.random.split(key)
    bound = 1.0 / jnp.sqrt(fan_in)
    w = jax.random.uniform(kw, (fan_in, fan_out), jnp.float32, -bound, bound)
    b = jax.random.uniform(kb, (1, fan_out), jnp.float32, -bound, bound)
    return w, b


def _fold_params(raw):
    """Fold the input flip / output un-flip symmetries into duplicated weights."""
    (w_in, b_in, w_hid, b_hid, w_out, b_out, mean, inv_cov) = raw
    flip = jnp.asarray(_make_flip_matrix())        # (25, 25)   F = F^T, F @ F = I
    unflip = jnp.asarray(_make_unflip_matrix())    # (256, 256) fixes column 0

    # Exact in bf16: +-1 signed permutations commute with rounding.
    w_in_flip = (flip @ w_in.astype(jnp.float32)).astype(jnp.bfloat16)
    w_out_unf = (w_out.astype(jnp.float32) @ unflip).astype(jnp.bfloat16)

    w_in2 = jnp.stack([w_in, w_in_flip])                    # (2, 25, 512)  bf16
    w_out2 = jnp.stack([w_out, w_out_unf])                  # (2, 512, 256) bf16
    b_out2 = jnp.stack([b_out, b_out @ unflip])             # (2, 1, 256)   f32
    mean2 = jnp.stack([mean, mean @ flip])                  # (2, 1, 25)    f32
    icov2 = jnp.stack([inv_cov, flip @ inv_cov @ flip])     # (2, 25, 25)   f32
    return (w_in2, b_in, w_hid, b_hid, w_out2, b_out2, mean2, icov2)


def make_params(key):
    keys = jax.random.split(key, N_HIDDEN_LAYERS + 4)
    w_in, b_in = _linear_init(keys[0], N_INPUTS, WIDTH)
    w_hid, b_hid = [], []
    for i in range(N_HIDDEN_LAYERS):
        w, b = _linear_init(keys[1 + i], WIDTH, WIDTH)
        w_hid.append(w)
        b_hid.append(b[0])
    w_hid = jnp.stack(w_hid)                                   # (5, 512, 512)
    b_hid = jnp.stack(b_hid)                                   # (5, 512)
    w_out, b_out = _linear_init(keys[1 + N_HIDDEN_LAYERS], WIDTH, N_OUTPUTS)

    # Pad output dim 198 -> 256 for lane-dense stores (zero-padded columns).
    w_out = jnp.pad(w_out, ((0, 0), (0, N_OUT_PAD - N_OUTPUTS)))
    b_out = jnp.pad(b_out, ((0, 0), (0, N_OUT_PAD - N_OUTPUTS)))

    # mean / covariance of the scaled inputs (synthetic, deterministic, SPD cov).
    k_mean, k_cov = keys[-2], keys[-1]
    mean = jax.random.normal(k_mean, (1, N_INPUTS), jnp.float32) * 0.1
    a = jax.random.normal(k_cov, (N_INPUTS, N_INPUTS), jnp.float32) * 0.1
    cov = a @ a.T + jnp.eye(N_INPUTS, dtype=jnp.float32)
    inv_cov = jnp.linalg.inv(cov).astype(jnp.float32)

    # bf16 weights (native MXU input path, halved weight DMA); f32 biases/stats.
    raw = (w_in.astype(jnp.bfloat16), b_in,
           w_hid.astype(jnp.bfloat16), b_hid,
           w_out.astype(jnp.bfloat16), b_out,
           mean, inv_cov)
    return _fold_params(raw), raw


# ---------------------------------------------------------------------------
# Plain-JAX reference (literal spec translation) for validation only.
# ---------------------------------------------------------------------------
def _net_reference(x, raw):
    (w_in, b_in, w_hid, b_hid, w_out, b_out, mean, inv_cov) = raw
    w_in = w_in.astype(jnp.float32)
    w_hid = w_hid.astype(jnp.float32)
    w_out = w_out.astype(jnp.float32)[:, :N_OUTPUTS]
    b_out = b_out[:, :N_OUTPUTS]

    def mlp(v):
        h = v @ w_in + b_in
        h = h * jax.nn.sigmoid(h)
        for i in range(N_HIDDEN_LAYERS):
            h = h @ w_hid[i] + b_hid[i][None, :]
            h = h * jax.nn.sigmoid(h)
        return h @ w_out + b_out

    def mahal(v):
        d = v - mean
        return jnp.sum((d @ inv_cov) * d, axis=1)

    y = mlp(x)
    y = y.at[:, 0].add(-mahal(x) / (2 * N_INPUTS))

    xf = x
    xf = xf.at[:, :8].set(-x[:, 8:16])
    xf = xf.at[:, 8:16].set(-x[:, :8])
    xf = xf.at[:, 16].set(-x[:, 16])
    xf = xf.at[:, 18].set(-x[:, 18])
    xf = xf.at[:, 23].set(x[:, 24])
    xf = xf.at[:, 24].set(x[:, 23])

    yf = mlp(xf)
    yf = yf.at[:, 0].add(-mahal(xf) / (2 * N_INPUTS))

    yu = yf
    yu = yu.at[:, 1].set(-yf[:, 1])
    yu = yu.at[:, 3].set(-yf[:, 3])
    yu = yu.at[:, 4].set(yf[:, 5])
    yu = yu.at[:, 5].set(yf[:, 4])
    yu = yu.at[:, 6 + 32 * 0:6 + 32 * 2].set(yf[:, 6 + 32 * 3:6 + 32 * 5])
    yu = yu.at[:, 6 + 32 * 2:6 + 32 * 3].set(-yf[:, 6 + 32 * 5:6 + 32 * 6])
    yu = yu.at[:, 6 + 32 * 3:6 + 32 * 5].set(yf[:, 6 + 32 * 0:6 + 32 * 2])
    yu = yu.at[:, 6 + 32 * 5:6 + 32 * 6].set(-yf[:, 6 + 32 * 2:6 + 32 * 3])

    fused = (y + yu) * 0.5
    fused = fused.at[:, 4].set(jnp.clip(fused[:, 4], 0.0, 1.0))
    fused = fused.at[:, 5].set(jnp.clip(fused[:, 5], 0.0, 1.0))
    return fused


if __name__ == "__main__":
    key = jax.random.PRNGKey(0)
    k_params, k_x = jax.random.split(key)
    kernel_params, raw_params = make_params(k_params)

    batch = 4
    x = jax.random.normal(k_x, (batch, N_INPUTS), jnp.float32)

    out = net_forward(x, kernel_params)
    jax.block_until_ready(out)

    assert out.shape == (batch, N_OUTPUTS)
    assert bool(jnp.all(out[:, 4] >= 0.0) & jnp.all(out[:, 4] <= 1.0))
    assert bool(jnp.all(out[:, 5] >= 0.0) & jnp.all(out[:, 5] <= 1.0))

    ref = _net_reference(x, raw_params)
    assert bool(jnp.allclose(out, ref, atol=5e-2, rtol=5e-2))

    print("KERNEL_OK")
</pallas_src>

<mosaic_0001>
module attributes {stable_mosaic.version = 11 : i64} {
  func.func @_fused_net_kernel(%arg0: i32, %arg1: memref<8x25xf32, #tpu.memory_space<vmem>>, %arg2: memref<2x25x512xbf16, #tpu.memory_space<vmem>>, %arg3: memref<1x512xf32, #tpu.memory_space<vmem>>, %arg4: memref<5x512x512xbf16, #tpu.memory_space<vmem>>, %arg5: memref<5x512xf32, #tpu.memory_space<vmem>>, %arg6: memref<2x512x256xbf16, #tpu.memory_space<vmem>>, %arg7: memref<2x1x256xf32, #tpu.memory_space<vmem>>, %arg8: memref<2x1x25xf32, #tpu.memory_space<vmem>>, %arg9: memref<2x25x25xf32, #tpu.memory_space<vmem>>, %arg10: memref<8x256xf32, #tpu.memory_space<vmem>>) attributes {dimension_semantics = [#tpu.dimension_semantics<parallel>], iteration_bounds = array<i64: 1>, scalar_prefetch = 0 : i64, scratch_operands = 0 : i64, tpu.core_type = #tpu.core_type<tc>, window_params = [{transform_indices = @transform_0, window_bounds = array<i64: 8, 25>}, {pipeline_mode = #tpu.pipeline_mode<synchronous>, transform_indices = @transform_1, window_bounds = array<i64: 2, 25, 512>}, {pipeline_mode = #tpu.pipeline_mode<synchronous>, transform_indices = @transform_2, window_bounds = array<i64: 1, 512>}, {pipeline_mode = #tpu.pipeline_mode<synchronous>, transform_indices = @transform_3, window_bounds = array<i64: 5, 512, 512>}, {pipeline_mode = #tpu.pipeline_mode<synchronous>, transform_indices = @transform_4, window_bounds = array<i64: 5, 512>}, {pipeline_mode = #tpu.pipeline_mode<synchronous>, transform_indices = @transform_5, window_bounds = array<i64: 2, 512, 256>}, {pipeline_mode = #tpu.pipeline_mode<synchronous>, transform_indices = @transform_6, window_bounds = array<i64: 2, 1, 256>}, {pipeline_mode = #tpu.pipeline_mode<synchronous>, transform_indices = @transform_7, window_bounds = array<i64: 2, 1, 25>}, {pipeline_mode = #tpu.pipeline_mode<synchronous>, transform_indices = @transform_8, window_bounds = array<i64: 2, 25, 25>}, {transform_indices = @transform_9, window_bounds = array<i64: 8, 256>}]} {
    %c0 = arith.constant 0 : index
    %c0_0 = arith.constant 0 : index
    %0 = vector.load %arg1[%c0, %c0_0] : memref<8x25xf32, #tpu.memory_space<vmem>>, vector<8x25xf32>
    %1 = arith.truncf %0 : vector<8x25xf32> to vector<8x25xbf16>
    %c0_1 = arith.constant 0 : index
    %c0_2 = arith.constant 0 : index
    %c0_3 = arith.constant 0 : index
    %2 = vector.load %arg2[%c0_1, %c0_2, %c0_3] : memref<2x25x512xbf16, #tpu.memory_space<vmem>>, vector<1x25x512xbf16>
    %3 = vector.shape_cast %2 : vector<1x25x512xbf16> to vector<25x512xbf16>
    %cst = arith.constant dense<0.000000e+00> : vector<8x512xf32>
    %4 = tpu.matmul %1, %3, %cst {dimension_numbers = #tpu.dot_dimension_numbers<[1], [0], [0], [1], [0, 0, 1, 1], [], []>} : vector<8x25xbf16>, vector<25x512xbf16>, vector<8x512xf32> -> vector<8x512xf32>
    %c1 = arith.constant 1 : index
    %c0_4 = arith.constant 0 : index
    %c0_5 = arith.constant 0 : index
    %5 = vector.load %arg2[%c1, %c0_4, %c0_5] : memref<2x25x512xbf16, #tpu.memory_space<vmem>>, vector<1x25x512xbf16>
    %6 = vector.shape_cast %5 : vector<1x25x512xbf16> to vector<25x512xbf16>
    %cst_6 = arith.constant dense<0.000000e+00> : vector<8x512xf32>
    %7 = tpu.matmul %1, %6, %cst_6 {dimension_numbers = #tpu.dot_dimension_numbers<[1], [0], [0], [1], [0, 0, 1, 1], [], []>} : vector<8x25xbf16>, vector<25x512xbf16>, vector<8x512xf32> -> vector<8x512xf32>
    %8 = tpu.concatenate %4, %7 in 0 : vector<8x512xf32>, vector<8x512xf32> -> vector<16x512xf32>
    %c0_7 = arith.constant 0 : index
    %c0_8 = arith.constant 0 : index
    %9 = vector.load %arg3[%c0_7, %c0_8] : memref<1x512xf32, #tpu.memory_space<vmem>>, vector<1x512xf32>
    %10 = vector.broadcast %9 : vector<1x512xf32> to vector<16x512xf32>
    %11 = arith.addf %8, %10 : vector<16x512xf32>
    %cst_9 = arith.constant 5.000000e-01 : f32
    %12 = vector.broadcast %cst_9 : f32 to vector<16x512xf32>
    %13 = arith.mulf %12, %11 : vector<16x512xf32>
    %14 = math.tanh %13 : vector<16x512xf32>
    %cst_10 = arith.constant 5.000000e-01 : f32
    %15 = vector.broadcast %cst_10 : f32 to vector<16x512xf32>
    %16 = arith.mulf %15, %14 : vector<16x512xf32>
    %cst_11 = arith.constant 5.000000e-01 : f32
    %17 = vector.broadcast %cst_11 : f32 to vector<16x512xf32>
    %18 = arith.addf %16, %17 : vector<16x512xf32>
    %19 = arith.mulf %11, %18 : vector<16x512xf32>
    %20 = arith.truncf %19 : vector<16x512xf32> to vector<16x512xbf16>
    %c0_12 = arith.constant 0 : index
    %c0_13 = arith.constant 0 : index
    %c0_14 = arith.constant 0 : index
    %21 = vector.load %arg4[%c0_12, %c0_13, %c0_14] : memref<5x512x512xbf16, #tpu.memory_space<vmem>>, vector<1x512x512xbf16>
    %22 = vector.shape_cast %21 : vector<1x512x512xbf16> to vector<512x512xbf16>
    %cst_15 = arith.constant dense<0.000000e+00> : vector<16x512xf32>
    %23 = tpu.matmul %20, %22, %cst_15 {dimension_numbers = #tpu.dot_dimension_numbers<[1], [0], [0], [1], [0, 0, 1, 1], [], []>} : vector<16x512xbf16>, vector<512x512xbf16>, vector<16x512xf32> -> vector<16x512xf32>
    %c0_16 = arith.constant 0 : index
    %c0_17 = arith.constant 0 : index
    %24 = vector.load %arg5[%c0_16, %c0_17] : memref<5x512xf32, #tpu.memory_space<vmem>>, vector<1x512xf32>
    %25 = vector.broadcast %24 : vector<1x512xf32> to vector<16x512xf32>
    %26 = arith.addf %23, %25 : vector<16x512xf32>
    %cst_18 = arith.constant 5.000000e-01 : f32
    %27 = vector.broadcast %cst_18 : f32 to vector<16x512xf32>
    %28 = arith.mulf %27, %26 : vector<16x512xf32>
    %29 = math.tanh %28 : vector<16x512xf32>
    %cst_19 = arith.constant 5.000000e-01 : f32
    %30 = vector.broadcast %cst_19 : f32 to vector<16x512xf32>
    %31 = arith.mulf %30, %29 : vector<16x512xf32>
    %cst_20 = arith.constant 5.000000e-01 : f32
    %32 = vector.broadcast %cst_20 : f32 to vector<16x512xf32>
    %33 = arith.addf %31, %32 : vector<16x512xf32>
    %34 = arith.mulf %26, %33 : vector<16x512xf32>
    %35 = arith.truncf %34 : vector<16x512xf32> to vector<16x512xbf16>
    %c1_21 = arith.constant 1 : index
    %c0_22 = arith.constant 0 : index
    %c0_23 = arith.constant 0 : index
    %36 = vector.load %arg4[%c1_21, %c0_22, %c0_23] : memref<5x512x512xbf16, #tpu.memory_space<vmem>>, vector<1x512x512xbf16>
    %37 = vector.shape_cast %36 : vector<1x512x512xbf16> to vector<512x512xbf16>
    %cst_24 = arith.constant dense<0.000000e+00> : vector<16x512xf32>
    %38 = tpu.matmul %35, %37, %cst_24 {dimension_numbers = #tpu.dot_dimension_numbers<[1], [0], [0], [1], [0, 0, 1, 1], [], []>} : vector<16x512xbf16>, vector<512x512xbf16>, vector<16x512xf32> -> vector<16x512xf32>
    %c1_25 = arith.constant 1 : index
    %c0_26 = arith.constant 0 : index
    %39 = vector.load %arg5[%c1_25, %c0_26] : memref<5x512xf32, #tpu.memory_space<vmem>>, vector<1x512xf32>
    %40 = vector.broadcast %39 : vector<1x512xf32> to vector<16x512xf32>
    %41 = arith.addf %38, %40 : vector<16x512xf32>
    %cst_27 = arith.constant 5.000000e-01 : f32
    %42 = vector.broadcast %cst_27 : f32 to vector<16x512xf32>
    %43 = arith.mulf %42, %41 : vector<16x512xf32>
    %44 = math.tanh %43 : vector<16x512xf32>
    %cst_28 = arith.constant 5.000000e-01 : f32
    %45 = vector.broadcast %cst_28 : f32 to vector<16x512xf32>
    %46 = arith.mulf %45, %44 : vector<16x512xf32>
    %cst_29 = arith.constant 5.000000e-01 : f32
    %47 = vector.broadcast %cst_29 : f32 to vector<16x512xf32>
    %48 = arith.addf %46, %47 : vector<16x512xf32>
    %49 = arith.mulf %41, %48 : vector<16x512xf32>
    %50 = arith.truncf %49 : vector<16x512xf32> to vector<16x512xbf16>
    %c2 = arith.constant 2 : index
    %c0_30 = arith.constant 0 : index
    %c0_31 = arith.constant 0 : index
    %51 = vector.load %arg4[%c2, %c0_30, %c0_31] : memref<5x512x512xbf16, #tpu.memory_space<vmem>>, vector<1x512x512xbf16>
    %52 = vector.shape_cast %51 : vector<1x512x512xbf16> to vector<512x512xbf16>
    %cst_32 = arith.constant dense<0.000000e+00> : vector<16x512xf32>
    %53 = tpu.matmul %50, %52, %cst_32 {dimension_numbers = #tpu.dot_dimension_numbers<[1], [0], [0], [1], [0, 0, 1, 1], [], []>} : vector<16x512xbf16>, vector<512x512xbf16>, vector<16x512xf32> -> vector<16x512xf32>
    %c2_33 = arith.constant 2 : index
    %c0_34 = arith.constant 0 : index
    %54 = vector.load %arg5[%c2_33, %c0_34] : memref<5x512xf32, #tpu.memory_space<vmem>>, vector<1x512xf32>
    %55 = vector.broadcast %54 : vector<1x512xf32> to vector<16x512xf32>
    %56 = arith.addf %53, %55 : vector<16x512xf32>
    %cst_35 = arith.constant 5.000000e-01 : f32
    %57 = vector.broadcast %cst_35 : f32 to vector<16x512xf32>
    %58 = arith.mulf %57, %56 : vector<16x512xf32>
    %59 = math.tanh %58 : vector<16x512xf32>
    %cst_36 = arith.constant 5.000000e-01 : f32
    %60 = vector.broadcast %cst_36 : f32 to vector<16x512xf32>
    %61 = arith.mulf %60, %59 : vector<16x512xf32>
    %cst_37 = arith.constant 5.000000e-01 : f32
    %62 = vector.broadcast %cst_37 : f32 to vector<16x512xf32>
    %63 = arith.addf %61, %62 : vector<16x512xf32>
    %64 = arith.mulf %56, %63 : vector<16x512xf32>
    %65 = arith.truncf %64 : vector<16x512xf32> to vector<16x512xbf16>
    %c3 = arith.constant 3 : index
    %c0_38 = arith.constant 0 : index
    %c0_39 = arith.constant 0 : index
    %66 = vector.load %arg4[%c3, %c0_38, %c0_39] : memref<5x512x512xbf16, #tpu.memory_space<vmem>>, vector<1x512x512xbf16>
    %67 = vector.shape_cast %66 : vector<1x512x512xbf16> to vector<512x512xbf16>
    %cst_40 = arith.constant dense<0.000000e+00> : vector<16x512xf32>
    %68 = tpu.matmul %65, %67, %cst_40 {dimension_numbers = #tpu.dot_dimension_numbers<[1], [0], [0], [1], [0, 0, 1, 1], [], []>} : vector<16x512xbf16>, vector<512x512xbf16>, vector<16x512xf32> -> vector<16x512xf32>
    %c3_41 = arith.constant 3 : index
    %c0_42 = arith.constant 0 : index
    %69 = vector.load %arg5[%c3_41, %c0_42] : memref<5x512xf32, #tpu.memory_space<vmem>>, vector<1x512xf32>
    %70 = vector.broadcast %69 : vector<1x512xf32> to vector<16x512xf32>
    %71 = arith.addf %68, %70 : vector<16x512xf32>
    %cst_43 = arith.constant 5.000000e-01 : f32
    %72 = vector.broadcast %cst_43 : f32 to vector<16x512xf32>
    %73 = arith.mulf %72, %71 : vector<16x512xf32>
    %74 = math.tanh %73 : vector<16x512xf32>
    %cst_44 = arith.constant 5.000000e-01 : f32
    %75 = vector.broadcast %cst_44 : f32 to vector<16x512xf32>
    %76 = arith.mulf %75, %74 : vector<16x512xf32>
    %cst_45 = arith.constant 5.000000e-01 : f32
    %77 = vector.broadcast %cst_45 : f32 to vector<16x512xf32>
    %78 = arith.addf %76, %77 : vector<16x512xf32>
    %79 = arith.mulf %71, %78 : vector<16x512xf32>
    %80 = arith.truncf %79 : vector<16x512xf32> to vector<16x512xbf16>
    %c4 = arith.constant 4 : index
    %c0_46 = arith.constant 0 : index
    %c0_47 = arith.constant 0 : index
    %81 = vector.load %arg4[%c4, %c0_46, %c0_47] : memref<5x512x512xbf16, #tpu.memory_space<vmem>>, vector<1x512x512xbf16>
    %82 = vector.shape_cast %81 : vector<1x512x512xbf16> to vector<512x512xbf16>
    %cst_48 = arith.constant dense<0.000000e+00> : vector<16x512xf32>
    %83 = tpu.matmul %80, %82, %cst_48 {dimension_numbers = #tpu.dot_dimension_numbers<[1], [0], [0], [1], [0, 0, 1, 1], [], []>} : vector<16x512xbf16>, vector<512x512xbf16>, vector<16x512xf32> -> vector<16x512xf32>
    %c4_49 = arith.constant 4 : index
    %c0_50 = arith.constant 0 : index
    %84 = vector.load %arg5[%c4_49, %c0_50] : memref<5x512xf32, #tpu.memory_space<vmem>>, vector<1x512xf32>
    %85 = vector.broadcast %84 : vector<1x512xf32> to vector<16x512xf32>
    %86 = arith.addf %83, %85 : vector<16x512xf32>
    %cst_51 = arith.constant 5.000000e-01 : f32
    %87 = vector.broadcast %cst_51 : f32 to vector<16x512xf32>
    %88 = arith.mulf %87, %86 : vector<16x512xf32>
    %89 = math.tanh %88 : vector<16x512xf32>
    %cst_52 = arith.constant 5.000000e-01 : f32
    %90 = vector.broadcast %cst_52 : f32 to vector<16x512xf32>
    %91 = arith.mulf %90, %89 : vector<16x512xf32>
    %cst_53 = arith.constant 5.000000e-01 : f32
    %92 = vector.broadcast %cst_53 : f32 to vector<16x512xf32>
    %93 = arith.addf %91, %92 : vector<16x512xf32>
    %94 = arith.mulf %86, %93 : vector<16x512xf32>
    %95 = vector.extract_strided_slice %94 {offsets = [0, 0], sizes = [8, 512], strides = [1, 1]} : vector<16x512xf32> to vector<8x512xf32>
    %96 = arith.truncf %95 : vector<8x512xf32> to vector<8x512xbf16>
    %c0_54 = arith.constant 0 : index
    %c0_55 = arith.constant 0 : index
    %c0_56 = arith.constant 0 : index
    %97 = vector.load %arg6[%c0_54, %c0_55, %c0_56] : memref<2x512x256xbf16, #tpu.memory_space<vmem>>, vector<1x512x256xbf16>
    %98 = vector.shape_cast %97 : vector<1x512x256xbf16> to vector<512x256xbf16>
    %cst_57 = arith.constant dense<0.000000e+00> : vector<8x256xf32>
    %99 = tpu.matmul %96, %98, %cst_57 {dimension_numbers = #tpu.dot_dimension_numbers<[1], [0], [0], [1], [0, 0, 1, 1], [], []>} : vector<8x512xbf16>, vector<512x256xbf16>, vector<8x256xf32> -> vector<8x256xf32>
    %c0_58 = arith.constant 0 : index
    %c0_59 = arith.constant 0 : index
    %c0_60 = arith.constant 0 : index
    %100 = vector.load %arg7[%c0_58, %c0_59, %c0_60] : memref<2x1x256xf32, #tpu.memory_space<vmem>>, vector<1x1x256xf32>
    %101 = vector.shape_cast %100 : vector<1x1x256xf32> to vector<1x256xf32>
    %102 = vector.broadcast %101 : vector<1x256xf32> to vector<8x256xf32>
    %103 = arith.addf %99, %102 : vector<8x256xf32>
    %104 = vector.extract_strided_slice %94 {offsets = [8, 0], sizes = [8, 512], strides = [1, 1]} : vector<16x512xf32> to vector<8x512xf32>
    %105 = arith.truncf %104 : vector<8x512xf32> to vector<8x512xbf16>
    %c1_61 = arith.constant 1 : index
    %c0_62 = arith.constant 0 : index
    %c0_63 = arith.constant 0 : index
    %106 = vector.load %arg6[%c1_61, %c0_62, %c0_63] : memref<2x512x256xbf16, #tpu.memory_space<vmem>>, vector<1x512x256xbf16>
    %107 = vector.shape_cast %106 : vector<1x512x256xbf16> to vector<512x256xbf16>
    %cst_64 = arith.constant dense<0.000000e+00> : vector<8x256xf32>
    %108 = tpu.matmul %105, %107, %cst_64 {dimension_numbers = #tpu.dot_dimension_numbers<[1], [0], [0], [1], [0, 0, 1, 1], [], []>} : vector<8x512xbf16>, vector<512x256xbf16>, vector<8x256xf32> -> vector<8x256xf32>
    %c1_65 = arith.constant 1 : index
    %c0_66 = arith.constant 0 : index
    %c0_67 = arith.constant 0 : index
    %109 = vector.load %arg7[%c1_65, %c0_66, %c0_67] : memref<2x1x256xf32, #tpu.memory_space<vmem>>, vector<1x1x256xf32>
    %110 = vector.shape_cast %109 : vector<1x1x256xf32> to vector<1x256xf32>
    %111 = vector.broadcast %110 : vector<1x256xf32> to vector<8x256xf32>
    %112 = arith.addf %108, %111 : vector<8x256xf32>
    %c0_68 = arith.constant 0 : index
    %c0_69 = arith.constant 0 : index
    %c0_70 = arith.constant 0 : index
    %113 = vector.load %arg8[%c0_68, %c0_69, %c0_70] : memref<2x1x25xf32, #tpu.memory_space<vmem>>, vector<1x1x25xf32>
    %114 = vector.shape_cast %113 : vector<1x1x25xf32> to vector<1x25xf32>
    %115 = vector.broadcast %114 : vector<1x25xf32> to vector<8x25xf32>
    %116 = arith.subf %0, %115 : vector<8x25xf32>
    %c0_71 = arith.constant 0 : index
    %c0_72 = arith.constant 0 : index
    %c0_73 = arith.constant 0 : index
    %117 = vector.load %arg9[%c0_71, %c0_72, %c0_73] : memref<2x25x25xf32, #tpu.memory_space<vmem>>, vector<1x25x25xf32>
    %118 = vector.shape_cast %117 : vector<1x25x25xf32> to vector<25x25xf32>
    %cst_74 = arith.constant dense<0.000000e+00> : vector<8x25xf32>
    %119 = tpu.matmul %116, %118, %cst_74 {dimension_numbers = #tpu.dot_dimension_numbers<[1], [0], [0], [1], [0, 0, 1, 1], [], []>} : vector<8x25xf32>, vector<25x25xf32>, vector<8x25xf32> -> vector<8x25xf32>
    %120 = arith.mulf %119, %116 : vector<8x25xf32>
    %cst_75 = arith.constant dense<0.000000e+00> : vector<8xf32>
    %121 = vector.multi_reduction <add>, %120, %cst_75 [1] : vector<8x25xf32> to vector<8xf32>
    %122 = vector.shape_cast %121 : vector<8xf32> to vector<8x1xf32>
    %c1_76 = arith.constant 1 : index
    %c0_77 = arith.constant 0 : index
    %c0_78 = arith.constant 0 : index
    %123 = vector.load %arg8[%c1_76, %c0_77, %c0_78] : memref<2x1x25xf32, #tpu.memory_space<vmem>>, vector<1x1x25xf32>
    %124 = vector.shape_cast %123 : vector<1x1x25xf32> to vector<1x25xf32>
    %125 = vector.broadcast %124 : vector<1x25xf32> to vector<8x25xf32>
    %126 = arith.subf %0, %125 : vector<8x25xf32>
    %c1_79 = arith.constant 1 : index
    %c0_80 = arith.constant 0 : index
    %c0_81 = arith.constant 0 : index
    %127 = vector.load %arg9[%c1_79, %c0_80, %c0_81] : memref<2x25x25xf32, #tpu.memory_space<vmem>>, vector<1x25x25xf32>
    %128 = vector.shape_cast %127 : vector<1x25x25xf32> to vector<25x25xf32>
    %cst_82 = arith.constant dense<0.000000e+00> : vector<8x25xf32>
    %129 = tpu.matmul %126, %128, %cst_82 {dimension_numbers = #tpu.dot_dimension_numbers<[1], [0], [0], [1], [0, 0, 1, 1], [], []>} : vector<8x25xf32>, vector<25x25xf32>, vector<8x25xf32> -> vector<8x25xf32>
    %130 = arith.mulf %129, %126 : vector<8x25xf32>
    %cst_83 = arith.constant dense<0.000000e+00> : vector<8xf32>
    %131 = vector.multi_reduction <add>, %130, %cst_83 [1] : vector<8x25xf32> to vector<8xf32>
    %132 = vector.shape_cast %131 : vector<8xf32> to vector<8x1xf32>
    %133 = arith.addf %122, %132 : vector<8x1xf32>
    %134 = tpu.iota {dimensions = array<i32: 1>} : vector<1x256xi32>
    %c0_i32 = arith.constant 0 : i32
    %135 = vector.broadcast %c0_i32 : i32 to vector<1x256xi32>
    %136 = arith.cmpi eq, %134, %135 : vector<1x256xi32>
    %137 = arith.extui %136 : vector<1x256xi1> to vector<1x256xi32>
    %138 = arith.sitofp %137 : vector<1x256xi32> to vector<1x256xf32>
    %139 = arith.addf %103, %112 : vector<8x256xf32>
    %cst_84 = arith.constant 5.000000e-01 : f32
    %140 = vector.broadcast %cst_84 : f32 to vector<8x256xf32>
    %141 = arith.mulf %140, %139 : vector<8x256xf32>
    %cst_85 = arith.constant 0.00999999977 : f32
    %142 = vector.broadcast %cst_85 : f32 to vector<8x1xf32>
    %143 = arith.mulf %133, %142 : vector<8x1xf32>
    %144 = vector.broadcast %143 : vector<8x1xf32> to vector<8x256xf32>
    %145 = vector.broadcast %138 : vector<1x256xf32> to vector<8x256xf32>
    %146 = arith.mulf %144, %145 : vector<8x256xf32>
    %147 = arith.subf %141, %146 : vector<8x256xf32>
    %c4_i32 = arith.constant 4 : i32
    %148 = vector.broadcast %c4_i32 : i32 to vector<1x256xi32>
    %149 = arith.cmpi eq, %134, %148 : vector<1x256xi32>
    %c5_i32 = arith.constant 5 : i32
    %150 = vector.broadcast %c5_i32 : i32 to vector<1x256xi32>
    %151 = arith.cmpi eq, %134, %150 : vector<1x256xi32>
    %152 = arith.ori %149, %151 : vector<1x256xi1>
    %cst_86 = arith.constant 0.000000e+00 : f32
    %cst_87 = arith.constant 1.000000e+00 : f32
    %153 = vector.broadcast %cst_86 : f32 to vector<8x256xf32>
    %154 = arith.maximumf %153, %147 : vector<8x256xf32>
    %155 = vector.broadcast %cst_87 : f32 to vector<8x256xf32>
    %156 = arith.minimumf %155, %154 : vector<8x256xf32>
    %157 = vector.shape_cast %152 : vector<1x256xi1> to vector<1x256xi1>
    %158 = vector.broadcast %157 : vector<1x256xi1> to vector<8x256xi1>
    %159 = arith.select %158, %156, %147 : vector<8x256xi1>, vector<8x256xf32>
    %c0_88 = arith.constant 0 : index
    %c0_89 = arith.constant 0 : index
    %160 = vector.load %arg10[%c0_88, %c0_89] : memref<8x256xf32, #tpu.memory_space<vmem>>, vector<8x256xf32>
    tpu.vector_store %arg10[%c0_88, %c0_89], %159 {strides = array<i32>} : memref<8x256xf32, #tpu.memory_space<vmem>>, vector<8x256xf32>,
    return
  }
  func.func @transform_0(%arg0: i32) -> (i32, i32) {
    %c0_i32 = arith.constant 0 : i32
    %c0_i32_0 = arith.constant 0 : i32
    return %arg0, %c0_i32 : i32, i32
  }
  func.func @transform_1(%arg0: i32) -> (i32, i32, i32) {
    %c0_i32 = arith.constant 0 : i32
    %c0_i32_0 = arith.constant 0 : i32
    %c0_i32_1 = arith.constant 0 : i32
    %c0_i32_2 = arith.constant 0 : i32
    return %c0_i32, %c0_i32_0, %c0_i32_1 : i32, i32, i32
  }
  func.func @transform_2(%arg0: i32) -> (i32, i32) {
    %c0_i32 = arith.constant 0 : i32
    %c0_i32_0 = arith.constant 0 : i32
    %c0_i32_1 = arith.constant 0 : i32
    return %c0_i32, %c0_i32_0 : i32, i32
  }
  func.func @transform_3(%arg0: i32) -> (i32, i32, i32) {
    %c0_i32 = arith.constant 0 : i32
    %c0_i32_0 = arith.constant 0 : i32
    %c0_i32_1 = arith.constant 0 : i32
    %c0_i32_2 = arith.constant 0 : i32
    return %c0_i32, %c0_i32_0, %c0_i32_1 : i32, i32, i32
  }
  func.func @transform_4(%arg0: i32) -> (i32, i32) {
    %c0_i32 = arith.constant 0 : i32
    %c0_i32_0 = arith.constant 0 : i32
    %c0_i32_1 = arith.constant 0 : i32
    return %c0_i32, %c0_i32_0 : i32, i32
  }
  func.func @transform_5(%arg0: i32) -> (i32, i32, i32) {
    %c0_i32 = arith.constant 0 : i32
    %c0_i32_0 = arith.constant 0 : i32
    %c0_i32_1 = arith.constant 0 : i32
    %c0_i32_2 = arith.constant 0 : i32
    return %c0_i32, %c0_i32_0, %c0_i32_1 : i32, i32, i32
  }
  func.func @transform_6(%arg0: i32) -> (i32, i32, i32) {
    %c0_i32 = arith.constant 0 : i32
    %c0_i32_0 = arith.constant 0 : i32
    %c0_i32_1 = arith.constant 0 : i32
    %c0_i32_2 = arith.constant 0 : i32
    return %c0_i32, %c0_i32_0, %c0_i32_1 : i32, i32, i32
  }
  func.func @transform_7(%arg0: i32) -> (i32, i32, i32) {
    %c0_i32 = arith.constant 0 : i32
    %c0_i32_0 = arith.constant 0 : i32
    %c0_i32_1 = arith.constant 0 : i32
    %c0_i32_2 = arith.constant 0 : i32
    return %c0_i32, %c0_i32_0, %c0_i32_1 : i32, i32, i32
  }
  func.func @transform_8(%arg0: i32) -> (i32, i32, i32) {
    %c0_i32 = arith.constant 0 : i32
    %c0_i32_0 = arith.constant 0 : i32
    %c0_i32_1 = arith.constant 0 : i32
    %c0_i32_2 = arith.constant 0 : i32
    return %c0_i32, %c0_i32_0, %c0_i32_1 : i32, i32, i32
  }
  func.func @transform_9(%arg0: i32) -> (i32, i32) {
    %c0_i32 = arith.constant 0 : i32
    %c0_i32_0 = arith.constant 0 : i32
    return %arg0, %c0_i32 : i32, i32
  }
}

</mosaic_0001>

<bundles_post_ra>
// kernel: net_forward.1
= control target key start
LH: loop header
LB: loop body
LE: loop exit
PB: predicated region body
PF: predicated region fallthrough
CT: control target
= control target key end

     0   :  { %14 = vsyncpa [#allocation3], 0  ;;  %s9298_s0 = inlined_call_operand.vmem [shape: f32[8,25], index: 0, kind: input, shape index: {}]   ;;  %s9299_s1 = inlined_call_operand.vmem [shape: bf16[2,25,512], index: 1, kind: input, shape index: {}]   ;;  %s9300_s2 = inlined_call_operand.hbm [shape: f32[1,512], index: 2, kind: input, shape index: {}]   ;;  %s9301_s3 = inlined_call_operand.hbm [shape: bf16[5,512,512], index: 3, kind: input, shape index: {}]   ;;  %s9302_s4 = inlined_call_operand.hbm [shape: f32[5,512], index: 4, kind: input, shape index: {}]   ;;  %s9303_s5 = inlined_call_operand.hbm [shape: bf16[2,512,256], index: 5, kind: input, shape index: {}]   ;;  %s9304_s6 = inlined_call_operand.hbm [shape: f32[2,1,256], index: 6, kind: input, shape index: {}]   ;;  %s9305_s7 = inlined_call_operand.hbm [shape: f32[2,1,25], index: 7, kind: input, shape index: {}]   ;;  %s9306_s8 = inlined_call_operand.vmem [shape: f32[2,25,25], index: 8, kind: input, shape index: {}]   ;;  %s9307_s9 = inlined_call_operand.vmem [shape: f32[8,256], index: 9, kind: output, shape index: {}]  }
   0x1   :  { %15 = vsyncpa [#allocation5], 0 }
   0x2   :  { %16 = vsyncpa [#allocation8], 0 }
   0x3   :  { %17 = vsyncpa [#allocation11], 0  ;;  %s8961_s30 = smov [#allocation4]  }
   0x4   :  { %s37_s10 = sshll.u32 %s8961_s30, 4  ;;  %s38_s10 = int_to_ptr.vmem [resolvable:$true] %s37_s10 }
   0x5   :  { %s8841_s11 = scalar_lea.vmem %s38_s10, 81920  ;;  %p8846_p1 = scmp.lt.s32.totalorder %s38_s10, %s38_s10 }
   0x6   :  { %p8842_p0 = scmp.ne.s32.totalorder %s38_s10, %s8841_s11  ;;  %p8847_p2 = scmp.lt.s32.totalorder %s8841_s11, %s8841_s11 }
   0x8   :  { %p8848_p3 = por %p8847_p2, %p8846_p1 }
   0xa   :  { %p8849_p4 = pnand %p8848_p3, %p8842_p0 }
   0xc   :  { %8852 = shalt.err (!%p8849_p4)
}
   0xd   :  { %s8962_s12 = smov 256   ;;  %s8963_s13 = smov 16  }
   0xe   :  { %43 = dma.hbm_to_vmem [thread:$0]  %s9301_s3, 81920, %s38_s10, [#allocation5], %s8962_s12, %s8962_s12, %s8963_s13  }
   0xf   :  { %s8964_s16 = smov [#allocation7]  }
  0x10   :  { %s59_s17 = sshll.u32 %s8964_s16, 4  ;;  %s60_s17 = int_to_ptr.vmem [resolvable:$true] %s59_s17 }
  0x11   :  { %s8861_s18 = scalar_lea.vmem %s60_s17, 16384  ;;  %p8866_p6 = scmp.lt.s32.totalorder %s60_s17, %s60_s17 }
  0x12   :  { %p8862_p5 = scmp.ne.s32.totalorder %s60_s17, %s8861_s18  ;;  %p8867_p7 = scmp.lt.s32.totalorder %s8861_s18, %s8861_s18 }
  0x14   :  { %p8868_p8 = por %p8867_p7, %p8866_p6 }
  0x16   :  { %p8869_p9 = pnand %p8868_p8, %p8862_p5 }
  0x18   :  { %8872 = shalt.err (!%p8869_p9)
}
  0x19   :  { %s8965_s19 = smov 128   ;;  %s8966_s20 = smov 8  }
  0x1a   :  { %65 = dma.hbm_to_vmem [thread:$0]  %s9303_s5, 16384, %s60_s17, [#allocation8], %s8965_s19, %s8965_s19, %s8966_s20  }
  0x1b   :  { %s8967_s23 = smov [#allocation2]   ;;  %s8968_s25 = smov [#allocation6]  }
  0x1c   :  { %s28_s24 = sshll.u32 %s8967_s23, 4  ;;  %s50_s3 = sshll.u32 %s8968_s25, 4  ;;  %s29_s24 = int_to_ptr.vmem [resolvable:$true] %s28_s24  ;;  %s51_s3 = int_to_ptr.vmem [resolvable:$true] %s50_s3 }
  0x1d   :  { %s8881_s26 = scalar_lea.vmem %s29_s24, 64  ;;  %p8886_p11 = scmp.lt.s32.totalorder %s29_s24, %s29_s24 }
  0x1e   :  { %p8882_p10 = scmp.ne.s32.totalorder %s29_s24, %s8881_s26  ;;  %p8887_p12 = scmp.lt.s32.totalorder %s8881_s26, %s8881_s26 }
  0x20   :  { %p8888_p13 = por %p8887_p12, %p8886_p11 }
  0x22   :  { %p8889_p0 = pnand %p8888_p13, %p8882_p10 }
  0x24   :  { %8892 = shalt.err (!%p8889_p0)
}
  0x25   :  { %31 = dma.hbm_to_vmem [thread:$0]  %s9300_s2, 64, %s29_s24, [#allocation3]  }
  0x26   :  { %s8901_s29 = scalar_lea.vmem %s51_s3, 512  ;;  %p8906_p2 = scmp.lt.s32.totalorder %s51_s3, %s51_s3 }
  0x27   :  { %p8902_p1 = scmp.ne.s32.totalorder %s51_s3, %s8901_s29  ;;  %p8907_p3 = scmp.lt.s32.totalorder %s8901_s29, %s8901_s29 }
  0x29   :  { %p8908_p4 = por %p8907_p3, %p8906_p2 }
  0x2b   :  { %p8909_p5 = pnand %p8908_p4, %p8902_p1 }
  0x2d   :  { %8912 = shalt.err (!%p8909_p5)
}
  0x2e   :  { %53 = dma.hbm_to_vmem [thread:$0]  %s9302_s4, 512, %s51_s3, [#allocation5]  }
  0x2f   :  { %s8969_s10 = smov [#allocation9]  }
  0x30   :  { %s71_s11 = sshll.u32 %s8969_s10, 4  ;;  %s72_s11 = int_to_ptr.vmem [resolvable:$true] %s71_s11 }
  0x31   :  { %s8921_s12 = scalar_lea.vmem %s72_s11, 64  ;;  %p8926_p7 = scmp.lt.s32.totalorder %s72_s11, %s72_s11 }
  0x32   :  { %p8922_p6 = scmp.ne.s32.totalorder %s72_s11, %s8921_s12  ;;  %p8927_p8 = scmp.lt.s32.totalorder %s8921_s12, %s8921_s12 }
  0x34   :  { %p8928_p9 = por %p8927_p8, %p8926_p7 }
  0x36   :  { %p8929_p10 = pnand %p8928_p9, %p8922_p6 }
  0x38   :  { %8932 = shalt.err (!%p8929_p10)
}
  0x39   :  { %s8970_s2 = smov 32   ;;  %s8971_s14 = smov 2  }
  0x3a   :  { %77 = dma.hbm_to_vmem [thread:$0]  %s9304_s6, 64, %s72_s11, [#allocation8], %s8970_s2, %s8970_s2, %s8971_s14  }
  0x3b   :  { %s8972_s17 = smov [#allocation10]  }
  0x3c   :  { %s83_s18 = sshll.u32 %s8972_s17, 4  ;;  %s84_s18 = int_to_ptr.vmem [resolvable:$true] %s83_s18 }
  0x3d   :  { %s8941_s4 = scalar_lea.vmem %s84_s18, 32  ;;  %p8946_p12 = scmp.lt.s32.totalorder %s84_s18, %s84_s18 }
  0x3e   :  { %p8942_p11 = scmp.ne.s32.totalorder %s84_s18, %s8941_s4  ;;  %p8947_p13 = scmp.lt.s32.totalorder %s8941_s4, %s8941_s4 }
  0x40   :  { %p8948_p0 = por %p8947_p13, %p8946_p12 }
  0x42   :  { %p8949_p1 = pnand %p8948_p0, %p8942_p11 }
  0x44   :  { %8952 = shalt.err (!%p8949_p1)
}
  0x45   :  { %s8973_s19 = smov 1  }
  0x46   :  { %89 = dma.hbm_to_vmem [thread:$0]  %s9305_s7, 32, %s84_s18, [#allocation11], %s8963_s13, %s8963_s13, %s8973_s19  }
  0x47   :  { %8953 = dma.done.wait [#allocation3], 64  }
  0x48   :  { %8954 = vsyncadd [#allocation3], 4294967232 }
  0x49   :  { %8955 = dma.done.wait [#allocation5], 82432  }
  0x4a   :  { %8956 = vsyncadd [#allocation5], 4294884864 }
  0x4b   :  { %8957 = dma.done.wait [#allocation8], 16448  }
  0x4c   :  { %8958 = vsyncadd [#allocation8], 4294950848 }
  0x4d   :  { %8959 = dma.done.wait [#allocation11], 32  }
  0x4e   :  { %8960 = vsyncadd [#allocation11], 4294967264  ;;  %vm161_vm0 = vcmask 1043456   ;;  %v8974_v0 = vmov 0   ;;  %vm162_vm1 = vcmask 1044480   ;;  %v8975_v1 = vmov 65535  }
  0x4f   :  { %209 = vmatprep.mubr.bf16.mxu0 %v8974_v0  ;;  %250 = vmatprep.mubr.bf16.mxu1 %v8974_v0  ;;  %v163_v2 = vsel %vm161_vm0, 4294967295, %v8975_v1  ;;  %v7560_v4 = vld [vmem:[%s9299_s1 + $0x24] ss:$16 sps:$4 sm:$0x1f]   ;;  %v7568_v13 = vld [vmem:[%s9299_s1 + $0xc] ss:$16 sps:$4 sm:$0xff]  }
  0x50   :  { %v164_v3 = vsel %vm162_vm1, %v163_v2, 0  ;;  %v7562_v5 = vld [vmem:[%s9299_s1 + $0x2c] ss:$16 sps:$4 sm:$0x1f]   ;;  %v7566_v10 = vld [vmem:[%s9299_s1 + $0x4] ss:$16 sps:$4 sm:$0xff]  }
  0x51   :  { %v169_v6 = vand.u32 %v7560_v4, %v164_v3  ;;  %v7564_v7 = vld [vmem:[%s9299_s1 + $0x20] ss:$16 sps:$4 sm:$0x1f]   ;;  %v7565_v8 = vld [vmem:[%s9299_s1 + $0x28] ss:$16 sps:$4 sm:$0x1f]   ;;  %v175_v9 = vand.u32 %v7562_v5, %v164_v3 }
  0x52   :  { %v166_v11 = vand.u32 %v7564_v7, %v164_v3  ;;  %v172_v12 = vand.u32 %v7565_v8, %v164_v3  ;;  %v7570_v14 = vld [vmem:[%s9299_s1] ss:$16 sps:$4 sm:$0xff]   ;;  %v7571_v15 = vld [vmem:[%s9299_s1 + $0x8] ss:$16 sps:$4 sm:$0xff]   ;;  %vm157_vm2 = vcmask 203776   ;;  %vm6487_vm3 = vcmask 1040384  }
  0x53   :  { %189 = vmatprep.subr.bf16.mxu0 %v169_v6  ;;  %230 = vmatprep.subr.bf16.mxu1 %v175_v9  ;;  %v111_v16 = vld [vmem:[%s9298_s0] sm:$0xff]  ;;  %v7575_v19 = vld [vmem:[%s9299_s1 + $0x68] ss:$16 sps:$4 sm:$0x1f]   ;;  %v7583_v27 = vld [vmem:[%s9299_s1 + $0x4c] ss:$16 sps:$4 sm:$0xff]  }
  0x54   :  { %190 = vmatpush1.bf16.msra.mxu0 %v166_v11  ;;  %231 = vmatpush1.bf16.msra.mxu1 %v172_v12  ;;  %v7572_v17 = vld [vmem:[%s9299_s1 + $0x60] ss:$16 sps:$4 sm:$0x1f]   ;;  %v7574_v18 = vld [vmem:[%s9299_s1 + $0x64] ss:$16 sps:$4 sm:$0x1f]   ;;  %v112_v21 = vpack.c.bf16 %v111_v16, %v111_v16  ;;  %v311_v25 = vand.u32 %v7575_v19, %v164_v3 }
  0x55   :  { %191 = vmatprep.subr.bf16.mxu0 %v7566_v10  ;;  %232 = vmatprep.subr.bf16.mxu1 %v7568_v13  ;;  %v7577_v20 = vld [vmem:[%s9299_s1 + $0x6c] ss:$16 sps:$4 sm:$0x1f]   ;;  %v308_v22 = vand.u32 %v7574_v18, %v164_v3  ;;  %v305_v24 = vand.u32 %v7572_v17, %v164_v3  ;;  %v7580_v26 = vld [vmem:[%s9299_s1 + $0x44] ss:$16 sps:$4 sm:$0xff]   ;;  %vm8977_vm4 = vmmov 0  }
  0x56   :  { %v314_v23 = vand.u32 %v7577_v20, %v164_v3  ;;  %v7578_v28 = vld [vmem:[%s9299_s1 + $0x40] ss:$16 sps:$4 sm:$0xff]   ;;  %v7581_v29 = vld [vmem:[%s9299_s1 + $0x48] ss:$16 sps:$4 sm:$0xff]   ;;  %v7584_v32 = vld [vmem:[#allocation4 + $0xe0] ss:$16 sps:$4 sm:$0xff]  }
  0x57   :  { %v7586_v30 = vld [vmem:[#allocation4 + $0xe4] ss:$16 sps:$4 sm:$0xff]   ;;  %v7587_v33 = vld [vmem:[#allocation4 + $0x2e0] ss:$16 sps:$4 sm:$0xff]  }
  0x58   :  { %192 = vmatpush1.bf16.msra.mxu0 %v7570_v14  ;;  %233 = vmatpush1.bf16.msra.mxu1 %v7571_v15  ;;  %v7589_v31 = vld [vmem:[#allocation4 + $0x2e4] ss:$16 sps:$4 sm:$0xff]   ;;  %v7590_v36 = vld [vmem:[#allocation4 + $0xc0] ss:$16 sps:$4 sm:$0xff]  }
  0x59   :  { %328 = vmatprep.subr.bf16.mxu0 %v308_v22  ;;  %369 = vmatprep.subr.bf16.mxu1 %v314_v23  ;;  %v7592_v34 = vld [vmem:[#allocation4 + $0xc4] ss:$16 sps:$4 sm:$0xff]   ;;  %v7593_v37 = vld [vmem:[#allocation4 + $0x2c0] ss:$16 sps:$4 sm:$0xff]  }
  0x5a   :  { %v7595_v35 = vld [vmem:[#allocation4 + $0x2c4] ss:$16 sps:$4 sm:$0xff]   ;;  %v7596_v40 = vld [vmem:[#allocation4 + $0xa0] ss:$16 sps:$4 sm:$0xff]  }
  0x5b   :  { %6712 = vmatmul.mubr.msk.bf16.vlgmr.msra.gmra.mxu0 %vm157_vm2, %v112_v21  ;;  %6713 = vmatmul.mubr.msk.bf16.vlgmr.msra.gmra.mxu1 %vm157_vm2, %v112_v21  ;;  %v7598_v38 = vld [vmem:[#allocation4 + $0xa4] ss:$16 sps:$4 sm:$0xff]   ;;  %v7599_v41 = vld [vmem:[#allocation4 + $0x2a0] ss:$16 sps:$4 sm:$0xff]  }
  0x5c   :  { %329 = vmatpush1.bf16.msra.mxu0 %v305_v24  ;;  %370 = vmatpush1.bf16.msra.mxu1 %v311_v25  ;;  %v7601_v39 = vld [vmem:[#allocation4 + $0x2a4] ss:$16 sps:$4 sm:$0xff]   ;;  %v7602_v44 = vld [vmem:[#allocation4 + $0x80] ss:$16 sps:$4 sm:$0xff]  }
  0x5d   :  { %330 = vmatprep.subr.bf16.mxu0 %v7580_v26  ;;  %371 = vmatprep.subr.bf16.mxu1 %v7583_v27  ;;  %v7604_v42 = vld [vmem:[#allocation4 + $0x84] ss:$16 sps:$4 sm:$0xff]   ;;  %v7605_v45 = vld [vmem:[#allocation4 + $0x280] ss:$16 sps:$4 sm:$0xff]  }
  0x5e   :  { %348 = vmatprep.mubr.bf16.mxu0 %v8974_v0  ;;  %389 = vmatprep.mubr.bf16.mxu1 %v8974_v0  ;;  %v7607_v43 = vld [vmem:[#allocation4 + $0x284] ss:$16 sps:$4 sm:$0xff]   ;;  %v7608_v48 = vld [vmem:[#allocation4 + $0x60] ss:$16 sps:$4 sm:$0xff]  }
  0x5f   :  { %v7610_v46 = vld [vmem:[#allocation4 + $0x64] ss:$16 sps:$4 sm:$0xff]   ;;  %v7611_v49 = vld [vmem:[#allocation4 + $0x260] ss:$16 sps:$4 sm:$0xff]  }
  0x60   :  { %331 = vmatpush1.bf16.msra.mxu0 %v7578_v28  ;;  %372 = vmatpush1.bf16.msra.mxu1 %v7581_v29  ;;  %v7613_v47 = vld [vmem:[#allocation4 + $0x264] ss:$16 sps:$4 sm:$0xff]   ;;  %v7614_v52 = vld [vmem:[#allocation4 + $0x40] ss:$16 sps:$4 sm:$0xff]  }
  0x61   :  { %1262 = vmatprep.subr.bf16.mxu0 %v7586_v30  ;;  %1305 = vmatprep.subr.bf16.mxu1 %v7589_v31  ;;  %v7616_v50 = vld [vmem:[#allocation4 + $0x44] ss:$16 sps:$4 sm:$0xff]   ;;  %v7617_v53 = vld [vmem:[#allocation4 + $0x240] ss:$16 sps:$4 sm:$0xff]   ;;  %v7682_v30 = vld [vmem:[#allocation4 + $0xec] ss:$16 sps:$4 sm:$0xff]  }
  0x62   :  { %v7619_v51 = vld [vmem:[#allocation4 + $0x244] ss:$16 sps:$4 sm:$0xff]   ;;  %v7620_v56 = vld [vmem:[#allocation4 + $0x20] ss:$16 sps:$4 sm:$0xff]   ;;  %v7685_v31 = vld [vmem:[#allocation4 + $0x2ec] ss:$16 sps:$4 sm:$0xff]  }
  0x63   :  { %6730 = vmatmul.mubr.msk.bf16.vlgmr.msra.gmra.mxu0 %vm157_vm2, %v112_v21  ;;  %6731 = vmatmul.mubr.msk.bf16.vlgmr.msra.gmra.mxu1 %vm157_vm2, %v112_v21  ;;  %v7622_v54 = vld [vmem:[#allocation4 + $0x24] ss:$16 sps:$4 sm:$0xff]   ;;  %v7623_v57 = vld [vmem:[#allocation4 + $0x220] ss:$16 sps:$4 sm:$0xff]  }
  0x64   :  { %1263 = vmatpush1.bf16.msra.mxu0 %v7584_v32  ;;  %1306 = vmatpush1.bf16.msra.mxu1 %v7587_v33  ;;  %v7625_v55 = vld [vmem:[#allocation4 + $0x224] ss:$16 sps:$4 sm:$0xff]   ;;  %v7626_v60 = vld [vmem:[#allocation4] ss:$16 sps:$4 sm:$0xff]   ;;  %v400_v32 = vlaneseq }
  0x65   :  { %1264 = vmatprep.subr.bf16.mxu0 %v7592_v34  ;;  %1307 = vmatprep.subr.bf16.mxu1 %v7595_v35  ;;  %v7628_v58 = vld [vmem:[#allocation4 + $0x4] ss:$16 sps:$4 sm:$0xff]   ;;  %v7629_v61 = vld [vmem:[#allocation4 + $0x200] ss:$16 sps:$4 sm:$0xff]   ;;  %v398_v34 = vld [vmem:[#allocation2] sm:$0xf] }
  0x66   :  { %v7631_v59 = vld [vmem:[#allocation4 + $0x204] ss:$16 sps:$4 sm:$0xff]   ;;  %v7632_v0 = vld [vmem:[#allocation4 + $0x1e0] ss:$16 sps:$4 sm:$0xff]   ;;  %v401_v33 = vshrl.u32 %v400_v32, 7 }
  0x67   :  { %v7634_v62 = vld [vmem:[#allocation4 + $0x1e4] ss:$16 sps:$4 sm:$0xff]   ;;  %v7635_v1 = vld [vmem:[#allocation4 + $0x3e0] ss:$16 sps:$4 sm:$0xff]  }
  0x68   :  { %1265 = vmatpush1.bf16.msra.mxu0 %v7590_v36  ;;  %1308 = vmatpush1.bf16.msra.mxu1 %v7593_v37  ;;  %v7637_v63 = vld [vmem:[#allocation4 + $0x3e4] ss:$16 sps:$4 sm:$0xff]   ;;  %v7638_v4 = vld [vmem:[#allocation4 + $0x1c0] ss:$16 sps:$4 sm:$0xff]   ;;  %v9105_v35 = vsub.s32 0, %v401_v33  ;;  %v9107_v36 = vsub.s32 2, %v401_v33 }
  0x69   :  { %1266 = vmatprep.subr.bf16.mxu0 %v7598_v38  ;;  %1309 = vmatprep.subr.bf16.mxu1 %v7601_v39  ;;  %v7640_v2 = vld [vmem:[#allocation4 + $0x1c4] ss:$16 sps:$4 sm:$0xff]   ;;  %v7641_v5 = vld [vmem:[#allocation4 + $0x3c0] ss:$16 sps:$4 sm:$0xff]   ;;  %v9109_v37 = vsub.s32 1, %v401_v33  ;;  %v9111_v38 = vsub.s32 3, %v401_v33 }
  0x6a   :  { %v7643_v3 = vld [vmem:[#allocation4 + $0x3c4] ss:$16 sps:$4 sm:$0xff]   ;;  %v7644_v8 = vld [vmem:[#allocation4 + $0x1a0] ss:$16 sps:$4 sm:$0xff]   ;;  %v403_v39 = vrot.slane %v398_v34, %v9105_v35 }
  0x6b   :  { %v7646_v6 = vld [vmem:[#allocation4 + $0x1a4] ss:$16 sps:$4 sm:$0xff]   ;;  %v7647_v9 = vld [vmem:[#allocation4 + $0x3a0] ss:$16 sps:$4 sm:$0xff]  }
  0x6c   :  { %1267 = vmatpush1.bf16.msra.mxu0 %v7596_v40  ;;  %1310 = vmatpush1.bf16.msra.mxu1 %v7599_v41  ;;  %v7649_v7 = vld [vmem:[#allocation4 + $0x3a4] ss:$16 sps:$4 sm:$0xff]   ;;  %v7650_v12 = vld [vmem:[#allocation4 + $0x180] ss:$16 sps:$4 sm:$0xff]   ;;  %v411_v40 = vrot.slane %v398_v34, %v9107_v36  ;;  %v407_v41 = vrot.slane %v398_v34, %v9109_v37 }
  0x6d   :  { %1268 = vmatprep.subr.bf16.mxu0 %v7604_v42  ;;  %1311 = vmatprep.subr.bf16.mxu1 %v7607_v43  ;;  %v7652_v10 = vld [vmem:[#allocation4 + $0x184] ss:$16 sps:$4 sm:$0xff]   ;;  %v7653_v13 = vld [vmem:[#allocation4 + $0x380] ss:$16 sps:$4 sm:$0xff]   ;;  %v415_v42 = vrot.slane %v398_v34, %v9111_v38 }
  0x6e   :  { %v7655_v11 = vld [vmem:[#allocation4 + $0x384] ss:$16 sps:$4 sm:$0xff]   ;;  %v7656_v16 = vld [vmem:[#allocation4 + $0x160] ss:$16 sps:$4 sm:$0xff]  }
  0x6f   :  { %v7658_v14 = vld [vmem:[#allocation4 + $0x164] ss:$16 sps:$4 sm:$0xff]   ;;  %v7659_v17 = vld [vmem:[#allocation4 + $0x360] ss:$16 sps:$4 sm:$0xff]  }
  0x70   :  { %1269 = vmatpush1.bf16.msra.mxu0 %v7602_v44  ;;  %1312 = vmatpush1.bf16.msra.mxu1 %v7605_v45  ;;  %v7661_v15 = vld [vmem:[#allocation4 + $0x364] ss:$16 sps:$4 sm:$0xff]   ;;  %v7662_v20 = vld [vmem:[#allocation4 + $0x140] ss:$16 sps:$4 sm:$0xff]  }
  0x71   :  { %1270 = vmatprep.subr.bf16.mxu0 %v7610_v46  ;;  %1313 = vmatprep.subr.bf16.mxu1 %v7613_v47  ;;  %v7664_v18 = vld [vmem:[#allocation4 + $0x144] ss:$16 sps:$4 sm:$0xff]   ;;  %v7665_v21 = vld [vmem:[#allocation4 + $0x340] ss:$16 sps:$4 sm:$0xff]  }
  0x72   :  { %v7667_v19 = vld [vmem:[#allocation4 + $0x344] ss:$16 sps:$4 sm:$0xff]   ;;  %v7668_v24 = vld [vmem:[#allocation4 + $0x120] ss:$16 sps:$4 sm:$0xff]  }
  0x73   :  { %v7670_v22 = vld [vmem:[#allocation4 + $0x124] ss:$16 sps:$4 sm:$0xff]   ;;  %v7671_v25 = vld [vmem:[#allocation4 + $0x320] ss:$16 sps:$4 sm:$0xff]  }
  0x74   :  { %1271 = vmatpush1.bf16.msra.mxu0 %v7608_v48  ;;  %1314 = vmatpush1.bf16.msra.mxu1 %v7611_v49  ;;  %v7673_v23 = vld [vmem:[#allocation4 + $0x324] ss:$16 sps:$4 sm:$0xff]   ;;  %v7674_v28 = vld [vmem:[#allocation4 + $0x100] ss:$16 sps:$4 sm:$0xff]  }
  0x75   :  { %1272 = vmatprep.subr.bf16.mxu0 %v7616_v50  ;;  %1315 = vmatprep.subr.bf16.mxu1 %v7619_v51  ;;  %v7676_v26 = vld [vmem:[#allocation4 + $0x104] ss:$16 sps:$4 sm:$0xff]   ;;  %v7677_v29 = vld [vmem:[#allocation4 + $0x300] ss:$16 sps:$4 sm:$0xff]  }
  0x76   :  { %v7679_v27 = vld [vmem:[#allocation4 + $0x304] ss:$16 sps:$4 sm:$0xff]  }
  0x78   :  { %1273 = vmatpush1.bf16.msra.mxu0 %v7614_v52  ;;  %1316 = vmatpush1.bf16.msra.mxu1 %v7617_v53 }
  0x79   :  { %1274 = vmatprep.subr.bf16.mxu0 %v7622_v54  ;;  %1317 = vmatprep.subr.bf16.mxu1 %v7625_v55 }
  0x7c   :  { %1275 = vmatpush1.bf16.msra.mxu0 %v7620_v56  ;;  %1318 = vmatpush1.bf16.msra.mxu1 %v7623_v57 }
  0x7d   :  { %1276 = vmatprep.subr.bf16.mxu0 %v7628_v58  ;;  %1319 = vmatprep.subr.bf16.mxu1 %v7631_v59 }
  0x80   :  { %1277 = vmatpush1.bf16.msra.mxu0 %v7626_v60  ;;  %1320 = vmatpush1.bf16.msra.mxu1 %v7629_v61 }
  0x81   :  { %1278 = vmatprep.subr.bf16.mxu0 %v7634_v62  ;;  %1321 = vmatprep.subr.bf16.mxu1 %v7637_v63 }
  0x84   :  { %1279 = vmatpush2.bf16.msra.mxu0 %v7632_v0  ;;  %1322 = vmatpush2.bf16.msra.mxu1 %v7635_v1 }
  0x85   :  { %1280 = vmatprep.subr.bf16.mxu0 %v7640_v2  ;;  %1323 = vmatprep.subr.bf16.mxu1 %v7643_v3 }
  0x88   :  { %1281 = vmatpush2.bf16.msra.mxu0 %v7638_v4  ;;  %1324 = vmatpush2.bf16.msra.mxu1 %v7641_v5 }
  0x89   :  { %1282 = vmatprep.subr.bf16.mxu0 %v7646_v6  ;;  %1325 = vmatprep.subr.bf16.mxu1 %v7649_v7 }
  0x8c   :  { %1283 = vmatpush2.bf16.msra.mxu0 %v7644_v8  ;;  %1326 = vmatpush2.bf16.msra.mxu1 %v7647_v9 }
  0x8d   :  { %1284 = vmatprep.subr.bf16.mxu0 %v7652_v10  ;;  %1327 = vmatprep.subr.bf16.mxu1 %v7655_v11 }
  0x90   :  { %1285 = vmatpush2.bf16.msra.mxu0 %v7650_v12  ;;  %1328 = vmatpush2.bf16.msra.mxu1 %v7653_v13 }
  0x91   :  { %1286 = vmatprep.subr.bf16.mxu0 %v7658_v14  ;;  %1329 = vmatprep.subr.bf16.mxu1 %v7661_v15 }
  0x94   :  { %1287 = vmatpush2.bf16.msra.mxu0 %v7656_v16  ;;  %1330 = vmatpush2.bf16.msra.mxu1 %v7659_v17 }
  0x95   :  { %1288 = vmatprep.subr.bf16.mxu0 %v7664_v18  ;;  %1331 = vmatprep.subr.bf16.mxu1 %v7667_v19 }
  0x98   :  { %1289 = vmatpush2.bf16.msra.mxu0 %v7662_v20  ;;  %1332 = vmatpush2.bf16.msra.mxu1 %v7665_v21 }
  0x99   :  { %1290 = vmatprep.subr.bf16.mxu0 %v7670_v22  ;;  %1333 = vmatprep.subr.bf16.mxu1 %v7673_v23 }
  0x9c   :  { %1291 = vmatpush2.bf16.msra.mxu0 %v7668_v24  ;;  %1334 = vmatpush2.bf16.msra.mxu1 %v7671_v25 }
  0x9d   :  { %1292 = vmatprep.subr.bf16.mxu0 %v7676_v26  ;;  %1335 = vmatprep.subr.bf16.mxu1 %v7679_v27 }
  0xa0   :  { %1293 = vmatpush2.bf16.msra.mxu0 %v7674_v28  ;;  %1336 = vmatpush2.bf16.msra.mxu1 %v7677_v29 }
  0xa1   :  { %1348 = vmatprep.subr.bf16.mxu0 %v7682_v30  ;;  %1391 = vmatprep.subr.bf16.mxu1 %v7685_v31 }
 0x11b   :  { %v211_v43 = vpop.f32.mrf.mxu0  ;;  %v252_v44 = vpop.f32.mrf.mxu1 }
 0x11c   :  { %v9117_v45 = vadd.f32 %v403_v39, %v211_v43  ;;  %v9119_v46 = vadd.f32 %v411_v40, %v252_v44  ;;  %v7680_v44 = vld [vmem:[#allocation4 + $0xe8] ss:$16 sps:$4 sm:$0xff]  }
 0x11d   :  { %v213_v47 = vpop.f32.mrf.mxu0  ;;  %v254_v48 = vpop.f32.mrf.mxu1 }
 0x11e   :  { %v428_v49 = vmul.f32 0.5, %v9117_v45  ;;  %v421_v50 = vadd.f32 %v407_v41, %v213_v47  ;;  %v423_v51 = vadd.f32 %v415_v42, %v254_v48  ;;  %v430_v52 = vmul.f32 0.5, %v9119_v46 }
 0x11f   :  { %v215_v53 = vpop.f32.mrf.mxu0  ;;  %v256_v54 = vpop.f32.mrf.mxu1 }
 0x120   :  { %v429_v55 = vmul.f32 0.5, %v421_v50  ;;  %v431_v56 = vmul.f32 0.5, %v423_v51  ;;  %8736 = vtanh.f32 %v428_v49 }
 0x121   :  { %v216_v57 = vpop.f32.mrf.mxu0  ;;  %v257_v58 = vpop.f32.mrf.mxu1  ;;  %8738 = vtanh.f32 %v430_v52  ;;  %v7683_v52 = vld [vmem:[#allocation4 + $0x2e8] ss:$16 sps:$4 sm:$0xff]  }
 0x122   :  { %8740 = vtanh.f32 %v429_v55  ;;  %v7688_v55 = vld [vmem:[#allocation4 + $0xcc] ss:$16 sps:$4 sm:$0xff]  }
 0x123   :  { %v350_v59 = vpop.f32.mrf.mxu0  ;;  %v391_v60 = vpop.f32.mrf.mxu1  ;;  %8742 = vtanh.f32 %v431_v56  ;;  %v7691_v58 = vld [vmem:[#allocation4 + $0x2cc] ss:$16 sps:$4 sm:$0xff]  }
 0x124   :  { %v424_v61 = vadd.f32 %v403_v39, %v350_v59  ;;  %v426_v62 = vadd.f32 %v411_v40, %v391_v60  ;;  %v7689_v60 = vld [vmem:[#allocation4 + $0x2c8] ss:$16 sps:$4 sm:$0xff]  }
 0x125   :  { %v352_v63 = vpop.f32.mrf.mxu0  ;;  %v393_v0 = vpop.f32.mrf.mxu1 }
 0x126   :  { %v432_v1 = vmul.f32 0.5, %v424_v61  ;;  %v434_v2 = vmul.f32 0.5, %v426_v62  ;;  %v425_v3 = vadd.f32 %v407_v41, %v352_v63  ;;  %v427_v4 = vadd.f32 %v415_v42, %v393_v0  ;;  %v7703_v63 = vld [vmem:[#allocation4 + $0x28c] ss:$16 sps:$4 sm:$0xff]   ;;  %v7698_v0 = vld [vmem:[#allocation4 + $0x88] ss:$16 sps:$4 sm:$0xff]  }
 0x127   :  { %v354_v5 = vpop.f32.mrf.mxu0  ;;  %v395_v6 = vpop.f32.mrf.mxu1 }
 0x128   :  { %8744 = vtanh.f32 %v432_v1  ;;  %v433_v7 = vmul.f32 0.5, %v425_v3  ;;  %v435_v8 = vmul.f32 0.5, %v427_v4  ;;  %v7701_v1 = vld [vmem:[#allocation4 + $0x288] ss:$16 sps:$4 sm:$0xff]   ;;  %v7712_v6 = vld [vmem:[#allocation4 + $0x4c] ss:$16 sps:$4 sm:$0xff]  }
 0x129   :  { %8746 = vtanh.f32 %v434_v2  ;;  %v355_v9 = vpop.f32.mrf.mxu0  ;;  %v396_v10 = vpop.f32.mrf.mxu1  ;;  %v7706_v2 = vld [vmem:[#allocation4 + $0x6c] ss:$16 sps:$4 sm:$0xff]   ;;  %v7707_v5 = vld [vmem:[#allocation4 + $0x268] ss:$16 sps:$4 sm:$0xff]  }
 0x12a   :  { %8748 = vtanh.f32 %v433_v7  ;;  %v7715_v7 = vld [vmem:[#allocation4 + $0x24c] ss:$16 sps:$4 sm:$0xff]   ;;  %v7713_v9 = vld [vmem:[#allocation4 + $0x248] ss:$16 sps:$4 sm:$0xff]  }
 0x12b   :  { %8750 = vtanh.f32 %v435_v8  ;;  %v7710_v8 = vld [vmem:[#allocation4 + $0x48] ss:$16 sps:$4 sm:$0xff]   ;;  %v7718_v10 = vld [vmem:[#allocation4 + $0x2c] ss:$16 sps:$4 sm:$0xff]  }
 0x12d   :  { %v8737_v11 = vpop.eup %8736 }
 0x12e   :  { %v8739_v12 = vpop.eup %8738  ;;  %v444_v15 = vmul.f32 0.5, %v8737_v11  ;;  %v7721_v11 = vld [vmem:[#allocation4 + $0x22c] ss:$16 sps:$4 sm:$0xff]  }
 0x12f   :  { %v8741_v13 = vpop.eup %8740  ;;  %v446_v20 = vmul.f32 0.5, %v8739_v12  ;;  %v7716_v12 = vld [vmem:[#allocation4 + $0x28] ss:$16 sps:$4 sm:$0xff]  }
 0x130   :  { %v8743_v14 = vpop.eup %8742  ;;  %v445_v16 = vmul.f32 0.5, %v8741_v13  ;;  %v452_v23 = vadd.f32 0.5, %v444_v15  ;;  %v7719_v13 = vld [vmem:[#allocation4 + $0x228] ss:$16 sps:$4 sm:$0xff]   ;;  %v7727_v15 = vld [vmem:[#allocation4 + $0x20c] ss:$16 sps:$4 sm:$0xff]  }
 0x131   :  { %v447_v18 = vmul.f32 0.5, %v8743_v14  ;;  %v454_v33 = vadd.f32 0.5, %v446_v20  ;;  %v7724_v14 = vld [vmem:[#allocation4 + $0xc] ss:$16 sps:$4 sm:$0xff]   ;;  %v7728_v20 = vld [vmem:[#allocation4 + $0x1e8] ss:$16 sps:$4 sm:$0xff]  }
 0x132   :  { %v453_v26 = vadd.f32 0.5, %v445_v16  ;;  %v460_v47 = vmul.f32 %v452_v23, %v9117_v45  ;;  %v7694_v45 = vld [vmem:[#allocation4 + $0xac] ss:$16 sps:$4 sm:$0xff]   ;;  %v7722_v16 = vld [vmem:[#allocation4 + $0x8] ss:$16 sps:$4 sm:$0xff]  }
 0x133   :  { %v455_v29 = vadd.f32 0.5, %v447_v18  ;;  %v462_v53 = vmul.f32 %v454_v33, %v9119_v46  ;;  %v7692_v46 = vld [vmem:[#allocation4 + $0xa8] ss:$16 sps:$4 sm:$0xff]   ;;  %v7730_v18 = vld [vmem:[#allocation4 + $0x1ec] ss:$16 sps:$4 sm:$0xff]  }
 0x134   :  { %v461_v41 = vmul.f32 %v453_v26, %v421_v50  ;;  %v7686_v50 = vld [vmem:[#allocation4 + $0xc8] ss:$16 sps:$4 sm:$0xff]   ;;  %v7739_v23 = vld [vmem:[#allocation4 + $0x3cc] ss:$16 sps:$4 sm:$0xff]  }
 0x135   :  { %v8745_v17 = vpop.eup %8744  ;;  %v463_v48 = vmul.f32 %v455_v29, %v423_v51  ;;  %v7697_v51 = vld [vmem:[#allocation4 + $0x2ac] ss:$16 sps:$4 sm:$0xff]   ;;  %v7743_v29 = vld [vmem:[#allocation4 + $0x3a8] ss:$16 sps:$4 sm:$0xff]  }
 0x136   :  { %v8747_v19 = vpop.eup %8746  ;;  %v448_v21 = vmul.f32 0.5, %v8745_v17  ;;  %v7725_v17 = vld [vmem:[#allocation4 + $0x208] ss:$16 sps:$4 sm:$0xff]   ;;  %v7742_v26 = vld [vmem:[#allocation4 + $0x1ac] ss:$16 sps:$4 sm:$0xff]  }
 0x137   :  { %v8749_v22 = vpop.eup %8748  ;;  %v450_v24 = vmul.f32 0.5, %v8747_v19  ;;  %v7733_v19 = vld [vmem:[#allocation4 + $0x3ec] ss:$16 sps:$4 sm:$0xff]   ;;  %v7746_v33 = vld [vmem:[#allocation4 + $0x188] ss:$16 sps:$4 sm:$0xff]  }
 0x138   :  { %v8751_v25 = vpop.eup %8750  ;;  %v456_v27 = vadd.f32 0.5, %v448_v21  ;;  %v449_v28 = vmul.f32 0.5, %v8749_v22  ;;  %v7731_v21 = vld [vmem:[#allocation4 + $0x3e8] ss:$16 sps:$4 sm:$0xff]   ;;  %v7736_v22 = vld [vmem:[#allocation4 + $0x1cc] ss:$16 sps:$4 sm:$0xff]  }
 0x139   :  { %v458_v30 = vadd.f32 0.5, %v450_v24  ;;  %v451_v31 = vmul.f32 0.5, %v8751_v25  ;;  %v7734_v24 = vld [vmem:[#allocation4 + $0x1c8] ss:$16 sps:$4 sm:$0xff]  }
 0x13a   :  { %v457_v34 = vadd.f32 0.5, %v449_v28  ;;  %v464_v39 = vmul.f32 %v456_v27, %v424_v61  ;;  %v7695_v61 = vld [vmem:[#allocation4 + $0x2a8] ss:$16 sps:$4 sm:$0xff]   ;;  %v7745_v27 = vld [vmem:[#allocation4 + $0x3ac] ss:$16 sps:$4 sm:$0xff]  }
 0x13b   :  { %v459_v40 = vadd.f32 0.5, %v451_v31  ;;  %v466_v42 = vmul.f32 %v458_v30, %v426_v62  ;;  %v7700_v62 = vld [vmem:[#allocation4 + $0x8c] ss:$16 sps:$4 sm:$0xff]   ;;  %v7737_v25 = vld [vmem:[#allocation4 + $0x3c8] ss:$16 sps:$4 sm:$0xff]  }
 0x13c   :  { %v465_v43 = vmul.f32 %v457_v34, %v425_v3  ;;  %v9125_v56 = vpack.c.bf16 %v464_v39, %v460_v47  ;;  %v7709_v3 = vld [vmem:[#allocation4 + $0x26c] ss:$16 sps:$4 sm:$0xff]   ;;  %v7740_v28 = vld [vmem:[#allocation4 + $0x1a8] ss:$16 sps:$4 sm:$0xff]  }
 0x13d   :  { %v467_v49 = vmul.f32 %v459_v40, %v427_v4  ;;  %v9127_v59 = vpack.c.bf16 %v466_v42, %v462_v53  ;;  %v7704_v4 = vld [vmem:[#allocation4 + $0x68] ss:$16 sps:$4 sm:$0xff]   ;;  %v7748_v30 = vld [vmem:[#allocation4 + $0x18c] ss:$16 sps:$4 sm:$0xff]  }
 0x13e   :  { %v469_v54 = vpack.c.bf16 %v465_v43, %v461_v41  ;;  %v7751_v31 = vld [vmem:[#allocation4 + $0x38c] ss:$16 sps:$4 sm:$0xff]   ;;  %v7749_v34 = vld [vmem:[#allocation4 + $0x388] ss:$16 sps:$4 sm:$0xff]  }
 0x13f   :  { %v471_v57 = vpack.c.bf16 %v467_v49, %v463_v48  ;;  %v7754_v39 = vld [vmem:[#allocation4 + $0x16c] ss:$16 sps:$4 sm:$0xff]   ;;  %v7752_v41 = vld [vmem:[#allocation4 + $0x168] ss:$16 sps:$4 sm:$0xff]  }
 0x140   :  { %1294 = vmatprep.mubr.bf16.mxu0 %v469_v54  ;;  %v7757_v40 = vld [vmem:[#allocation4 + $0x36c] ss:$16 sps:$4 sm:$0xff]   ;;  %v7755_v42 = vld [vmem:[#allocation4 + $0x368] ss:$16 sps:$4 sm:$0xff]  }
 0x141   :  { %1337 = vmatprep.mubr.bf16.mxu1 %v471_v57  ;;  %1295 = vmatmul.mubr.bf16.vlgmr.msra.gmra.mxu0 %v9125_v56  ;;  %v7760_v43 = vld [vmem:[#allocation4 + $0x14c] ss:$16 sps:$4 sm:$0xff]   ;;  %v7758_v47 = vld [vmem:[#allocation4 + $0x148] ss:$16 sps:$4 sm:$0xff]  }
 0x142   :  { %1338 = vmatmul.mubr.bf16.vlgmr.msra.gmra.mxu1 %v9127_v59  ;;  %1349 = vmatpush1.bf16.msra.mxu0 %v7680_v44  ;;  %v7763_v44 = vld [vmem:[#allocation4 + $0x34c] ss:$16 sps:$4 sm:$0xff]   ;;  %v7761_v48 = vld [vmem:[#allocation4 + $0x348] ss:$16 sps:$4 sm:$0xff]  }
 0x143   :  { %1392 = vmatpush1.bf16.msra.mxu1 %v7683_v52  ;;  %1380 = vmatprep.mubr.bf16.mxu0 %v469_v54  ;;  %v7766_v49 = vld [vmem:[#allocation4 + $0x12c] ss:$16 sps:$4 sm:$0xff]   ;;  %v7764_v53 = vld [vmem:[#allocation4 + $0x128] ss:$16 sps:$4 sm:$0xff]  }
 0x144   :  { %1423 = vmatprep.mubr.bf16.mxu1 %v471_v57  ;;  %1350 = vmatprep.subr.bf16.mxu0 %v7688_v55  ;;  %v7769_v52 = vld [vmem:[#allocation4 + $0x32c] ss:$16 sps:$4 sm:$0xff]   ;;  %v7767_v54 = vld [vmem:[#allocation4 + $0x328] ss:$16 sps:$4 sm:$0xff]  }
 0x145   :  { %1393 = vmatprep.subr.bf16.mxu1 %v7691_v58  ;;  %v7772_v55 = vld [vmem:[#allocation4 + $0x10c] ss:$16 sps:$4 sm:$0xff]   ;;  %v7770_v58 = vld [vmem:[#allocation4 + $0x108] ss:$16 sps:$4 sm:$0xff]  }
 0x146   :  { %1351 = vmatpush1.bf16.msra.mxu0 %v7686_v50  ;;  %v7775_v57 = vld [vmem:[#allocation4 + $0x30c] ss:$16 sps:$4 sm:$0xff]   ;;  %v7773_v50 = vld [vmem:[#allocation4 + $0x308] ss:$16 sps:$4 sm:$0xff]  }
 0x147   :  { %1394 = vmatpush1.bf16.msra.mxu1 %v7689_v60  ;;  %1352 = vmatprep.subr.bf16.mxu0 %v7694_v45  ;;  %v7778_v60 = vld [vmem:[#allocation4 + $0x4e4] ss:$16 sps:$4 sm:$0xff]   ;;  %v7776_v45 = vld [vmem:[#allocation4 + $0x4e0] ss:$16 sps:$4 sm:$0xff]  }
 0x148   :  { %1395 = vmatprep.subr.bf16.mxu1 %v7697_v51  ;;  %v7781_v51 = vld [vmem:[#allocation4 + $0x4c4] ss:$16 sps:$4 sm:$0xff]  }
 0x14a   :  { %1353 = vmatpush1.bf16.msra.mxu0 %v7692_v46  ;;  %v7779_v46 = vld [vmem:[#allocation4 + $0x4c0] ss:$16 sps:$4 sm:$0xff]  }
 0x14b   :  { %1396 = vmatpush1.bf16.msra.mxu1 %v7695_v61  ;;  %1354 = vmatprep.subr.bf16.mxu0 %v7700_v62  ;;  %v7784_v61 = vld [vmem:[#allocation4 + $0x4a4] ss:$16 sps:$4 sm:$0xff]   ;;  %v7782_v62 = vld [vmem:[#allocation4 + $0x4a0] ss:$16 sps:$4 sm:$0xff]  }
 0x14c   :  { %1397 = vmatprep.subr.bf16.mxu1 %v7703_v63  ;;  %v7787_v63 = vld [vmem:[#allocation4 + $0x484] ss:$16 sps:$4 sm:$0xff]  }
 0x14e   :  { %1355 = vmatpush1.bf16.msra.mxu0 %v7698_v0  ;;  %v7785_v0 = vld [vmem:[#allocation4 + $0x480] ss:$16 sps:$4 sm:$0xff]  }
 0x14f   :  { %1398 = vmatpush1.bf16.msra.mxu1 %v7701_v1  ;;  %1356 = vmatprep.subr.bf16.mxu0 %v7706_v2  ;;  %v7790_v1 = vld [vmem:[#allocation4 + $0x464] ss:$16 sps:$4 sm:$0xff]   ;;  %v7788_v2 = vld [vmem:[#allocation4 + $0x460] ss:$16 sps:$4 sm:$0xff]  }
 0x150   :  { %1399 = vmatprep.subr.bf16.mxu1 %v7709_v3  ;;  %v7793_v3 = vld [vmem:[#allocation4 + $0x444] ss:$16 sps:$4 sm:$0xff]  }
 0x152   :  { %1357 = vmatpush1.bf16.msra.mxu0 %v7704_v4  ;;  %v7791_v4 = vld [vmem:[#allocation4 + $0x440] ss:$16 sps:$4 sm:$0xff]  }
 0x153   :  { %1400 = vmatpush1.bf16.msra.mxu1 %v7707_v5  ;;  %1358 = vmatprep.subr.bf16.mxu0 %v7712_v6  ;;  %v7799_v5 = vld [vmem:[#allocation4 + $0x404] ss:$16 sps:$4 sm:$0xff]   ;;  %v7797_v6 = vld [vmem:[#allocation4 + $0x400] ss:$16 sps:$4 sm:$0xff]  }
 0x154   :  { %1401 = vmatprep.subr.bf16.mxu1 %v7715_v7  ;;  %v7802_v7 = vld [vmem:[#allocation4 + $0x5e4] ss:$16 sps:$4 sm:$0xff]  }
 0x156   :  { %1359 = vmatpush1.bf16.msra.mxu0 %v7710_v8  ;;  %v7800_v8 = vld [vmem:[#allocation4 + $0x5e0] ss:$16 sps:$4 sm:$0xff]  }
 0x157   :  { %1402 = vmatpush1.bf16.msra.mxu1 %v7713_v9  ;;  %1360 = vmatprep.subr.bf16.mxu0 %v7718_v10  ;;  %v7805_v9 = vld [vmem:[#allocation4 + $0x5c4] ss:$16 sps:$4 sm:$0xff]   ;;  %v7824_v10 = vld [vmem:[#allocation4 + $0x6e0] ss:$16 sps:$4 sm:$0xff]  }
 0x158   :  { %1403 = vmatprep.subr.bf16.mxu1 %v7721_v11  ;;  %v7826_v11 = vld [vmem:[#allocation4 + $0x6e4] ss:$16 sps:$4 sm:$0xff]  }
 0x15a   :  { %1361 = vmatpush1.bf16.msra.mxu0 %v7716_v12  ;;  %v7803_v12 = vld [vmem:[#allocation4 + $0x5c0] ss:$16 sps:$4 sm:$0xff]  }
 0x15b   :  { %1404 = vmatpush1.bf16.msra.mxu1 %v7719_v13  ;;  %1362 = vmatprep.subr.bf16.mxu0 %v7724_v14  ;;  %v7808_v13 = vld [vmem:[#allocation4 + $0x5a4] ss:$16 sps:$4 sm:$0xff]   ;;  %v7806_v14 = vld [vmem:[#allocation4 + $0x5a0] ss:$16 sps:$4 sm:$0xff]  }
 0x15c   :  { %1405 = vmatprep.subr.bf16.mxu1 %v7727_v15  ;;  %v7830_v15 = vld [vmem:[#allocation4 + $0x6c0] ss:$16 sps:$4 sm:$0xff]  }
 0x15e   :  { %1363 = vmatpush1.bf16.msra.mxu0 %v7722_v16  ;;  %v7832_v16 = vld [vmem:[#allocation4 + $0x6c4] ss:$16 sps:$4 sm:$0xff]  }
 0x15f   :  { %1406 = vmatpush1.bf16.msra.mxu1 %v7725_v17  ;;  %1364 = vmatprep.subr.bf16.mxu0 %v7730_v18  ;;  %v7811_v17 = vld [vmem:[#allocation4 + $0x584] ss:$16 sps:$4 sm:$0xff]   ;;  %v7809_v18 = vld [vmem:[#allocation4 + $0x580] ss:$16 sps:$4 sm:$0xff]  }
 0x160   :  { %1407 = vmatprep.subr.bf16.mxu1 %v7733_v19  ;;  %v7836_v19 = vld [vmem:[#allocation4 + $0x6a0] ss:$16 sps:$4 sm:$0xff]  }
 0x162   :  { %1365 = vmatpush2.bf16.msra.mxu0 %v7728_v20  ;;  %v7838_v20 = vld [vmem:[#allocation4 + $0x6a4] ss:$16 sps:$4 sm:$0xff]  }
 0x163   :  { %1408 = vmatpush2.bf16.msra.mxu1 %v7731_v21  ;;  %1366 = vmatprep.subr.bf16.mxu0 %v7736_v22  ;;  %v7814_v21 = vld [vmem:[#allocation4 + $0x564] ss:$16 sps:$4 sm:$0xff]   ;;  %v7812_v22 = vld [vmem:[#allocation4 + $0x560] ss:$16 sps:$4 sm:$0xff]  }
 0x164   :  { %1409 = vmatprep.subr.bf16.mxu1 %v7739_v23  ;;  %v7842_v23 = vld [vmem:[#allocation4 + $0x680] ss:$16 sps:$4 sm:$0xff]  }
 0x166   :  { %1367 = vmatpush2.bf16.msra.mxu0 %v7734_v24  ;;  %v7844_v24 = vld [vmem:[#allocation4 + $0x684] ss:$16 sps:$4 sm:$0xff]  }
 0x167   :  { %1410 = vmatpush2.bf16.msra.mxu1 %v7737_v25  ;;  %1368 = vmatprep.subr.bf16.mxu0 %v7742_v26  ;;  %v7817_v25 = vld [vmem:[#allocation4 + $0x544] ss:$16 sps:$4 sm:$0xff]   ;;  %v7815_v26 = vld [vmem:[#allocation4 + $0x540] ss:$16 sps:$4 sm:$0xff]  }
 0x168   :  { %1411 = vmatprep.subr.bf16.mxu1 %v7745_v27  ;;  %v7848_v27 = vld [vmem:[#allocation4 + $0x660] ss:$16 sps:$4 sm:$0xff]  }
 0x16a   :  { %1369 = vmatpush2.bf16.msra.mxu0 %v7740_v28  ;;  %v7850_v28 = vld [vmem:[#allocation4 + $0x664] ss:$16 sps:$4 sm:$0xff]  }
 0x16b   :  { %1412 = vmatpush2.bf16.msra.mxu1 %v7743_v29  ;;  %1370 = vmatprep.subr.bf16.mxu0 %v7748_v30  ;;  %v7820_v29 = vld [vmem:[#allocation4 + $0x524] ss:$16 sps:$4 sm:$0xff]   ;;  %v7818_v30 = vld [vmem:[#allocation4 + $0x520] ss:$16 sps:$4 sm:$0xff]  }
 0x16c   :  { %1413 = vmatprep.subr.bf16.mxu1 %v7751_v31  ;;  %v7854_v31 = vld [vmem:[#allocation4 + $0x640] ss:$16 sps:$4 sm:$0xff]  }
 0x16e   :  { %1371 = vmatpush2.bf16.msra.mxu0 %v7746_v33  ;;  %v7856_v33 = vld [vmem:[#allocation4 + $0x644] ss:$16 sps:$4 sm:$0xff]  }
 0x16f   :  { %1414 = vmatpush2.bf16.msra.mxu1 %v7749_v34  ;;  %1372 = vmatprep.subr.bf16.mxu0 %v7754_v39  ;;  %v7823_v34 = vld [vmem:[#allocation4 + $0x504] ss:$16 sps:$4 sm:$0xff]   ;;  %v7821_v39 = vld [vmem:[#allocation4 + $0x500] ss:$16 sps:$4 sm:$0xff]  }
 0x170   :  { %1415 = vmatprep.subr.bf16.mxu1 %v7757_v40  ;;  %v7860_v40 = vld [vmem:[#allocation4 + $0x620] ss:$16 sps:$4 sm:$0xff]  }
 0x172   :  { %1373 = vmatpush2.bf16.msra.mxu0 %v7752_v41  ;;  %v7862_v41 = vld [vmem:[#allocation4 + $0x624] ss:$16 sps:$4 sm:$0xff]  }
 0x173   :  { %1416 = vmatpush2.bf16.msra.mxu1 %v7755_v42  ;;  %1374 = vmatprep.subr.bf16.mxu0 %v7760_v43  ;;  %v7829_v42 = vld [vmem:[#allocation4 + $0x4ec] ss:$16 sps:$4 sm:$0xff]   ;;  %v7866_v43 = vld [vmem:[#allocation4 + $0x600] ss:$16 sps:$4 sm:$0xff]  }
 0x174   :  { %1417 = vmatprep.subr.bf16.mxu1 %v7763_v44  ;;  %v7868_v44 = vld [vmem:[#allocation4 + $0x604] ss:$16 sps:$4 sm:$0xff]  }
 0x176   :  { %1375 = vmatpush2.bf16.msra.mxu0 %v7758_v47  ;;  %v7874_v47 = vld [vmem:[#allocation4 + $0x7e4] ss:$16 sps:$4 sm:$0xff]  }
 0x177   :  { %1418 = vmatpush2.bf16.msra.mxu1 %v7761_v48  ;;  %1376 = vmatprep.subr.bf16.mxu0 %v7766_v49  ;;  %v7872_v48 = vld [vmem:[#allocation4 + $0x7e0] ss:$16 sps:$4 sm:$0xff]   ;;  %v7880_v49 = vld [vmem:[#allocation4 + $0x7c4] ss:$16 sps:$4 sm:$0xff]  }
 0x178   :  { %1419 = vmatprep.subr.bf16.mxu1 %v7769_v52  ;;  %v7878_v52 = vld [vmem:[#allocation4 + $0x7c0] ss:$16 sps:$4 sm:$0xff]  }
 0x17a   :  { %1377 = vmatpush2.bf16.msra.mxu0 %v7764_v53  ;;  %v7886_v53 = vld [vmem:[#allocation4 + $0x7a4] ss:$16 sps:$4 sm:$0xff]  }
 0x17b   :  { %1420 = vmatpush2.bf16.msra.mxu1 %v7767_v54  ;;  %1378 = vmatprep.subr.bf16.mxu0 %v7772_v55  ;;  %v7884_v54 = vld [vmem:[#allocation4 + $0x7a0] ss:$16 sps:$4 sm:$0xff]   ;;  %v7892_v55 = vld [vmem:[#allocation4 + $0x784] ss:$16 sps:$4 sm:$0xff]  }
 0x17c   :  { %1421 = vmatprep.subr.bf16.mxu1 %v7775_v57  ;;  %v7890_v57 = vld [vmem:[#allocation4 + $0x780] ss:$16 sps:$4 sm:$0xff]  }
 0x17e   :  { %1379 = vmatpush2.bf16.msra.mxu0 %v7770_v58  ;;  %v7898_v58 = vld [vmem:[#allocation4 + $0x764] ss:$16 sps:$4 sm:$0xff]  }
 0x17f   :  { %1422 = vmatpush2.bf16.msra.mxu1 %v7773_v50  ;;  %2270 = vmatprep.subr.bf16.mxu0 %v7778_v60  ;;  %v7896_v50 = vld [vmem:[#allocation4 + $0x760] ss:$16 sps:$4 sm:$0xff]   ;;  %v7904_v60 = vld [vmem:[#allocation4 + $0x744] ss:$16 sps:$4 sm:$0xff]  }
 0x180   :  { %2313 = vmatprep.subr.bf16.mxu1 %v7826_v11 }
 0x181   :  { %1381 = vmatmul.mubr.bf16.vlgmr.msra.gmra.mxu0 %v9125_v56  ;;  %v7796_v56 = vld [vmem:[#allocation4 + $0x424] ss:$16 sps:$4 sm:$0xff]  }
 0x182   :  { %1424 = vmatmul.mubr.bf16.vlgmr.msra.gmra.mxu1 %v9127_v59  ;;  %2271 = vmatpush1.bf16.msra.mxu0 %v7776_v45  ;;  %v7794_v59 = vld [vmem:[#allocation4 + $0x420] ss:$16 sps:$4 sm:$0xff]  }
 0x183   :  { %2272 = vmatprep.subr.bf16.mxu0 %v7781_v51  ;;  %2314 = vmatpush1.bf16.msra.mxu1 %v7824_v10  ;;  %v7902_v45 = vld [vmem:[#allocation4 + $0x740] ss:$16 sps:$4 sm:$0xff]   ;;  %v7910_v51 = vld [vmem:[#allocation4 + $0x724] ss:$16 sps:$4 sm:$0xff]  }
 0x184   :  { %2315 = vmatprep.subr.bf16.mxu1 %v7832_v16 }
 0x186   :  { %2273 = vmatpush1.bf16.msra.mxu0 %v7779_v46  ;;  %v7908_v46 = vld [vmem:[#allocation4 + $0x720] ss:$16 sps:$4 sm:$0xff]  }
 0x187   :  { %2274 = vmatprep.subr.bf16.mxu0 %v7784_v61  ;;  %2316 = vmatpush1.bf16.msra.mxu1 %v7830_v15  ;;  %v7916_v61 = vld [vmem:[#allocation4 + $0x704] ss:$16 sps:$4 sm:$0xff]  }
 0x188   :  { %2317 = vmatprep.subr.bf16.mxu1 %v7838_v20 }
 0x18a   :  { %2275 = vmatpush1.bf16.msra.mxu0 %v7782_v62  ;;  %v7914_v62 = vld [vmem:[#allocation4 + $0x700] ss:$16 sps:$4 sm:$0xff]  }
 0x18b   :  { %2276 = vmatprep.subr.bf16.mxu0 %v7787_v63  ;;  %2318 = vmatpush1.bf16.msra.mxu1 %v7836_v19  ;;  %v7922_v63 = vld [vmem:[#allocation4 + $0x6ec] ss:$16 sps:$4 sm:$0xff]  }
 0x18c   :  { %2319 = vmatprep.subr.bf16.mxu1 %v7844_v24 }
 0x18e   :  { %2277 = vmatpush1.bf16.msra.mxu0 %v7785_v0  ;;  %v9133_v0 = vld [vmem:[#allocation6] ss:$8 sm:$0xf] }
 0x18f   :  { %2278 = vmatprep.subr.bf16.mxu0 %v7790_v1  ;;  %2320 = vmatpush1.bf16.msra.mxu1 %v7842_v23  ;;  %v605_v1 = vrot.slane %v9133_v0, %v9105_v35 }
 0x190   :  { %2321 = vmatprep.subr.bf16.mxu1 %v7850_v28 }
 0x192   :  { %2279 = vmatpush1.bf16.msra.mxu0 %v7788_v2  ;;  %v609_v2 = vrot.slane %v9133_v0, %v9109_v37 }
 0x193   :  { %2280 = vmatprep.subr.bf16.mxu0 %v7793_v3  ;;  %2322 = vmatpush1.bf16.msra.mxu1 %v7848_v27 }
 0x194   :  { %2323 = vmatprep.subr.bf16.mxu1 %v7856_v33 }
 0x196   :  { %2281 = vmatpush1.bf16.msra.mxu0 %v7791_v4 }
 0x197   :  { %2282 = vmatprep.subr.bf16.mxu0 %v7796_v56  ;;  %2324 = vmatpush1.bf16.msra.mxu1 %v7854_v31 }
 0x198   :  { %2325 = vmatprep.subr.bf16.mxu1 %v7862_v41 }
 0x19a   :  { %2283 = vmatpush1.bf16.msra.mxu0 %v7794_v59 }
 0x19b   :  { %2284 = vmatprep.subr.bf16.mxu0 %v7799_v5  ;;  %2326 = vmatpush1.bf16.msra.mxu1 %v7860_v40 }
 0x19c   :  { %2327 = vmatprep.subr.bf16.mxu1 %v7868_v44 }
 0x19e   :  { %2285 = vmatpush1.bf16.msra.mxu0 %v7797_v6 }
 0x19f   :  { %2286 = vmatprep.subr.bf16.mxu0 %v7802_v7  ;;  %2328 = vmatpush1.bf16.msra.mxu1 %v7866_v43  ;;  %v7827_v43 = vld [vmem:[#allocation4 + $0x4e8] ss:$16 sps:$4 sm:$0xff]  }
 0x1a0   :  { %2329 = vmatprep.subr.bf16.mxu1 %v7874_v47  ;;  %v7835_v47 = vld [vmem:[#allocation4 + $0x4cc] ss:$16 sps:$4 sm:$0xff]  }
 0x1a2   :  { %2287 = vmatpush2.bf16.msra.mxu0 %v7800_v8 }
 0x1a3   :  { %2288 = vmatprep.subr.bf16.mxu0 %v7805_v9  ;;  %2330 = vmatpush2.bf16.msra.mxu1 %v7872_v48  ;;  %v7833_v48 = vld [vmem:[#allocation4 + $0x4c8] ss:$16 sps:$4 sm:$0xff]  }
 0x1a4   :  { %2331 = vmatprep.subr.bf16.mxu1 %v7880_v49  ;;  %v7841_v49 = vld [vmem:[#allocation4 + $0x4ac] ss:$16 sps:$4 sm:$0xff]  }
 0x1a6   :  { %2289 = vmatpush2.bf16.msra.mxu0 %v7803_v12 }
 0x1a7   :  { %2290 = vmatprep.subr.bf16.mxu0 %v7808_v13  ;;  %2332 = vmatpush2.bf16.msra.mxu1 %v7878_v52  ;;  %v7839_v52 = vld [vmem:[#allocation4 + $0x4a8] ss:$16 sps:$4 sm:$0xff]  }
 0x1a8   :  { %2333 = vmatprep.subr.bf16.mxu1 %v7886_v53  ;;  %v7847_v53 = vld [vmem:[#allocation4 + $0x48c] ss:$16 sps:$4 sm:$0xff]  }
 0x1aa   :  { %2291 = vmatpush2.bf16.msra.mxu0 %v7806_v14 }
 0x1ab   :  { %2292 = vmatprep.subr.bf16.mxu0 %v7811_v17  ;;  %2334 = vmatpush2.bf16.msra.mxu1 %v7884_v54  ;;  %v7845_v54 = vld [vmem:[#allocation4 + $0x488] ss:$16 sps:$4 sm:$0xff]  }
 0x1ac   :  { %2335 = vmatprep.subr.bf16.mxu1 %v7892_v55  ;;  %v7853_v55 = vld [vmem:[#allocation4 + $0x46c] ss:$16 sps:$4 sm:$0xff]  }
 0x1ae   :  { %2293 = vmatpush2.bf16.msra.mxu0 %v7809_v18 }
 0x1af   :  { %2294 = vmatprep.subr.bf16.mxu0 %v7814_v21  ;;  %2336 = vmatpush2.bf16.msra.mxu1 %v7890_v57  ;;  %v7851_v57 = vld [vmem:[#allocation4 + $0x468] ss:$16 sps:$4 sm:$0xff]  }
 0x1b0   :  { %2337 = vmatprep.subr.bf16.mxu1 %v7898_v58  ;;  %v7859_v58 = vld [vmem:[#allocation4 + $0x44c] ss:$16 sps:$4 sm:$0xff]  }
 0x1b2   :  { %2295 = vmatpush2.bf16.msra.mxu0 %v7812_v22 }
 0x1b3   :  { %2296 = vmatprep.subr.bf16.mxu0 %v7817_v25  ;;  %2338 = vmatpush2.bf16.msra.mxu1 %v7896_v50  ;;  %v7857_v50 = vld [vmem:[#allocation4 + $0x448] ss:$16 sps:$4 sm:$0xff]  }
 0x1b4   :  { %2339 = vmatprep.subr.bf16.mxu1 %v7904_v60  ;;  %v7865_v60 = vld [vmem:[#allocation4 + $0x42c] ss:$16 sps:$4 sm:$0xff]  }
 0x1b6   :  { %2297 = vmatpush2.bf16.msra.mxu0 %v7815_v26 }
 0x1b7   :  { %2298 = vmatprep.subr.bf16.mxu0 %v7820_v29  ;;  %2340 = vmatpush2.bf16.msra.mxu1 %v7902_v45  ;;  %v7863_v45 = vld [vmem:[#allocation4 + $0x428] ss:$16 sps:$4 sm:$0xff]  }
 0x1b8   :  { %2341 = vmatprep.subr.bf16.mxu1 %v7910_v51  ;;  %v7871_v51 = vld [vmem:[#allocation4 + $0x40c] ss:$16 sps:$4 sm:$0xff]  }
 0x1ba   :  { %2299 = vmatpush2.bf16.msra.mxu0 %v7818_v30 }
 0x1bb   :  { %2300 = vmatprep.subr.bf16.mxu0 %v7823_v34  ;;  %2342 = vmatpush2.bf16.msra.mxu1 %v7908_v46  ;;  %v613_v46 = vrot.slane %v9133_v0, %v9107_v36 }
 0x1bc   :  { %2343 = vmatprep.subr.bf16.mxu1 %v7916_v61  ;;  %v7869_v61 = vld [vmem:[#allocation4 + $0x408] ss:$16 sps:$4 sm:$0xff]  }
 0x1be   :  { %2301 = vmatpush2.bf16.msra.mxu0 %v7821_v39 }
 0x1bf   :  { %2356 = vmatprep.subr.bf16.mxu0 %v7829_v42  ;;  %2344 = vmatpush2.bf16.msra.mxu1 %v7914_v62  ;;  %v7877_v62 = vld [vmem:[#allocation4 + $0x5ec] ss:$16 sps:$4 sm:$0xff]  }
 0x1c0   :  { %2399 = vmatprep.subr.bf16.mxu1 %v7922_v63  ;;  %v617_v63 = vrot.slane %v9133_v0, %v9111_v38  ;;  %v7889_v0 = vld [vmem:[#allocation4 + $0x5ac] ss:$16 sps:$4 sm:$0xff]  }
 0x201   :  { %v1296_v3 = vpop.f32.mrf.mxu0 }
 0x202   :  { %v1297_v4 = vadd.f32 %v1296_v3, %v605_v1  ;;  %v1339_v56 = vpop.f32.mrf.mxu1 }
 0x203   :  { %v1298_v59 = vpop.f32.mrf.mxu0 }
 0x204   :  { %v1340_v5 = vadd.f32 %v1339_v56, %v1297_v4  ;;  %v1299_v6 = vadd.f32 %v1298_v59, %v609_v2  ;;  %v1341_v7 = vpop.f32.mrf.mxu1  ;;  %v7875_v4 = vld [vmem:[#allocation4 + $0x5e8] ss:$16 sps:$4 sm:$0xff]   ;;  %v7883_v59 = vld [vmem:[#allocation4 + $0x5cc] ss:$16 sps:$4 sm:$0xff]  }
 0x205   :  { %v1300_v8 = vpop.f32.mrf.mxu0 }
 0x206   :  { %v1434_v9 = vmul.f32 0.5, %v1340_v5  ;;  %v1342_v10 = vadd.f32 %v1341_v7, %v1299_v6  ;;  %v1301_v11 = vadd.f32 %v1300_v8, %v605_v1  ;;  %v1343_v12 = vpop.f32.mrf.mxu1 }
 0x207   :  { %v1302_v13 = vpop.f32.mrf.mxu0 }
 0x208   :  { %v1435_v14 = vmul.f32 0.5, %v1342_v10  ;;  %v1344_v15 = vadd.f32 %v1343_v12, %v1301_v11  ;;  %v1303_v16 = vadd.f32 %v1302_v13, %v609_v2  ;;  %8752 = vtanh.f32 %v1434_v9  ;;  %v1345_v17 = vpop.f32.mrf.mxu1  ;;  %v7881_v13 = vld [vmem:[#allocation4 + $0x5c8] ss:$16 sps:$4 sm:$0xff]  }
 0x20a   :  { %8754 = vtanh.f32 %v1435_v14  ;;  %v1438_v18 = vmul.f32 0.5, %v1344_v15  ;;  %v1346_v19 = vadd.f32 %v1345_v17, %v1303_v16 }
 0x20c   :  { %8756 = vtanh.f32 %v1438_v18  ;;  %v1439_v20 = vmul.f32 0.5, %v1346_v19 }
 0x20e   :  { %8758 = vtanh.f32 %v1439_v20 }
 0x215   :  { %v8753_v21 = vpop.eup %8752 }
 0x216   :  { %v1450_v25 = vmul.f32 0.5, %v8753_v21  ;;  %v7887_v21 = vld [vmem:[#allocation4 + $0x5a8] ss:$16 sps:$4 sm:$0xff]  }
 0x217   :  { %v8755_v22 = vpop.eup %8754 }
 0x218   :  { %v1451_v23 = vmul.f32 0.5, %v8755_v22  ;;  %v1458_v31 = vadd.f32 0.5, %v1450_v25  ;;  %v7895_v22 = vld [vmem:[#allocation4 + $0x58c] ss:$16 sps:$4 sm:$0xff]  }
 0x219   :  { %v8757_v24 = vpop.eup %8756  ;;  %v7901_v25 = vld [vmem:[#allocation4 + $0x56c] ss:$16 sps:$4 sm:$0xff]  }
 0x21a   :  { %v1454_v26 = vmul.f32 0.5, %v8757_v24  ;;  %v1459_v28 = vadd.f32 0.5, %v1451_v23  ;;  %v1466_v41 = vmul.f32 %v1458_v31, %v1340_v5  ;;  %v7893_v24 = vld [vmem:[#allocation4 + $0x588] ss:$16 sps:$4 sm:$0xff]   ;;  %v7913_v31 = vld [vmem:[#allocation4 + $0x52c] ss:$16 sps:$4 sm:$0xff]  }
 0x21b   :  { %v8759_v27 = vpop.eup %8758 }
 0x21c   :  { %v1462_v29 = vadd.f32 0.5, %v1454_v26  ;;  %v1455_v30 = vmul.f32 0.5, %v8759_v27  ;;  %v1467_v39 = vmul.f32 %v1459_v28, %v1342_v10  ;;  %v7899_v26 = vld [vmem:[#allocation4 + $0x568] ss:$16 sps:$4 sm:$0xff]   ;;  %v7907_v27 = vld [vmem:[#allocation4 + $0x54c] ss:$16 sps:$4 sm:$0xff]  }
 0x21e   :  { %v1463_v33 = vadd.f32 0.5, %v1455_v30  ;;  %v1470_v34 = vmul.f32 %v1462_v29, %v1344_v15  ;;  %v7905_v29 = vld [vmem:[#allocation4 + $0x548] ss:$16 sps:$4 sm:$0xff]  }
 0x220   :  { %v1471_v40 = vmul.f32 %v1463_v33, %v1346_v19  ;;  %v9139_v44 = vpack.c.bf16 %v1470_v34, %v1466_v41  ;;  %v7911_v41 = vld [vmem:[#allocation4 + $0x528] ss:$16 sps:$4 sm:$0xff]  }
 0x222   :  { %v1475_v42 = vpack.c.bf16 %v1471_v40, %v1467_v39 }
 0x224   :  { %2302 = vmatprep.mubr.bf16.mxu0 %v1475_v42 }
 0x225   :  { %2303 = vmatmul.mubr.bf16.vlgmr.msra.gmra.mxu0 %v9139_v44 }
 0x226   :  { %2357 = vmatpush1.bf16.msra.mxu0 %v7827_v43  ;;  %2388 = vmatprep.mubr.bf16.mxu0 %v1475_v42  ;;  %v7919_v43 = vld [vmem:[#allocation4 + $0x50c] ss:$16 sps:$4 sm:$0xff]  }
 0x227   :  { %2358 = vmatprep.subr.bf16.mxu0 %v7835_v47 }
 0x22a   :  { %2359 = vmatpush1.bf16.msra.mxu0 %v7833_v48 }
 0x22b   :  { %2360 = vmatprep.subr.bf16.mxu0 %v7841_v49 }
 0x22e   :  { %2361 = vmatpush1.bf16.msra.mxu0 %v7839_v52 }
 0x22f   :  { %2362 = vmatprep.subr.bf16.mxu0 %v7847_v53 }
 0x232   :  { %2363 = vmatpush1.bf16.msra.mxu0 %v7845_v54  ;;  %v7917_v54 = vld [vmem:[#allocation4 + $0x508] ss:$16 sps:$4 sm:$0xff]  }
 0x233   :  { %2364 = vmatprep.subr.bf16.mxu0 %v7853_v55 }
 0x236   :  { %2365 = vmatpush1.bf16.msra.mxu0 %v7851_v57 }
 0x237   :  { %2366 = vmatprep.subr.bf16.mxu0 %v7859_v58 }
 0x23a   :  { %2367 = vmatpush1.bf16.msra.mxu0 %v7857_v50 }
 0x23b   :  { %2368 = vmatprep.subr.bf16.mxu0 %v7865_v60 }
 0x23e   :  { %2369 = vmatpush1.bf16.msra.mxu0 %v7863_v45  ;;  %v7920_v45 = vld [vmem:[#allocation4 + $0x6e8] ss:$16 sps:$4 sm:$0xff]  }
 0x23f   :  { %2370 = vmatprep.subr.bf16.mxu0 %v7871_v51 }
 0x241   :  { %v1382_v1 = vpop.f32.mrf.mxu0 }
 0x242   :  { %v1383_v2 = vadd.f32 %v1382_v1, %v613_v46  ;;  %v1425_v3 = vpop.f32.mrf.mxu1  ;;  %2371 = vmatpush1.bf16.msra.mxu0 %v7869_v61  ;;  %v7923_v61 = vld [vmem:[#allocation4 + $0x6c8] ss:$16 sps:$4 sm:$0xff]   ;;  %v7931_v1 = vld [vmem:[#allocation4 + $0x68c] ss:$16 sps:$4 sm:$0xff]  }
 0x243   :  { %v1384_v56 = vpop.f32.mrf.mxu0  ;;  %2372 = vmatprep.subr.bf16.mxu0 %v7877_v62  ;;  %v7928_v62 = vld [vmem:[#allocation4 + $0x6ac] ss:$16 sps:$4 sm:$0xff]  }
 0x244   :  { %v1426_v5 = vadd.f32 %v1425_v3, %v1383_v2  ;;  %v1385_v6 = vadd.f32 %v1384_v56, %v617_v63  ;;  %v1427_v7 = vpop.f32.mrf.mxu1  ;;  %v7968_v2 = vld [vmem:[#allocation4 + $0x8e0] ss:$16 sps:$4 sm:$0xff]   ;;  %v7970_v3 = vld [vmem:[#allocation4 + $0x8e4] ss:$16 sps:$4 sm:$0xff]   ;;  %v7929_v56 = vld [vmem:[#allocation4 + $0x688] ss:$16 sps:$4 sm:$0xff]  }
 0x245   :  { %v1386_v8 = vpop.f32.mrf.mxu0 }
 0x246   :  { %v1436_v9 = vmul.f32 0.5, %v1426_v5  ;;  %v1428_v10 = vadd.f32 %v1427_v7, %v1385_v6  ;;  %v1387_v11 = vadd.f32 %v1386_v8, %v613_v46  ;;  %v1429_v12 = vpop.f32.mrf.mxu1  ;;  %2373 = vmatpush2.bf16.msra.mxu0 %v7875_v4  ;;  %v7925_v46 = vld [vmem:[#allocation4 + $0x6cc] ss:$16 sps:$4 sm:$0xff]   ;;  %v7973_v4 = vld [vmem:[#allocation4 + $0x8c4] ss:$16 sps:$4 sm:$0xff]  }
 0x247   :  { %v1388_v14 = vpop.f32.mrf.mxu0  ;;  %2374 = vmatprep.subr.bf16.mxu0 %v7883_v59  ;;  %v7934_v59 = vld [vmem:[#allocation4 + $0x66c] ss:$16 sps:$4 sm:$0xff]   ;;  %v7932_v6 = vld [vmem:[#allocation4 + $0x668] ss:$16 sps:$4 sm:$0xff]   ;;  %v7974_v8 = vld [vmem:[#allocation4 + $0x8a0] ss:$16 sps:$4 sm:$0xff]  }
 0x248   :  { %v1437_v15 = vmul.f32 0.5, %v1428_v10  ;;  %v1430_v16 = vadd.f32 %v1429_v12, %v1387_v11  ;;  %v1389_v17 = vadd.f32 %v1388_v14, %v617_v63  ;;  %8760 = vtanh.f32 %v1436_v9  ;;  %v1431_v18 = vpop.f32.mrf.mxu1  ;;  %v7926_v63 = vld [vmem:[#allocation4 + $0x6a8] ss:$16 sps:$4 sm:$0xff]   ;;  %v7937_v7 = vld [vmem:[#allocation4 + $0x64c] ss:$16 sps:$4 sm:$0xff]  }
 0x249   :  { %v7979_v9 = vld [vmem:[#allocation4 + $0x884] ss:$16 sps:$4 sm:$0xff]   ;;  %v7940_v11 = vld [vmem:[#allocation4 + $0x62c] ss:$16 sps:$4 sm:$0xff]   ;;  %v7977_v12 = vld [vmem:[#allocation4 + $0x880] ss:$16 sps:$4 sm:$0xff]  }
 0x24a   :  { %8762 = vtanh.f32 %v1437_v15  ;;  %v1440_v19 = vmul.f32 0.5, %v1430_v16  ;;  %v1432_v20 = vadd.f32 %v1431_v18, %v1389_v17  ;;  %2375 = vmatpush2.bf16.msra.mxu0 %v7881_v13  ;;  %v7982_v13 = vld [vmem:[#allocation4 + $0x864] ss:$16 sps:$4 sm:$0xff]   ;;  %v7938_v14 = vld [vmem:[#allocation4 + $0x628] ss:$16 sps:$4 sm:$0xff]  }
 0x24b   :  { %2376 = vmatprep.subr.bf16.mxu0 %v7889_v0  ;;  %v7943_v0 = vld [vmem:[#allocation4 + $0x60c] ss:$16 sps:$4 sm:$0xff]   ;;  %v7980_v15 = vld [vmem:[#allocation4 + $0x860] ss:$16 sps:$4 sm:$0xff]   ;;  %v7941_v17 = vld [vmem:[#allocation4 + $0x608] ss:$16 sps:$4 sm:$0xff]  }
 0x24c   :  { %8764 = vtanh.f32 %v1440_v19  ;;  %v1441_v23 = vmul.f32 0.5, %v1432_v20  ;;  %v7946_v18 = vld [vmem:[#allocation4 + $0x7ec] ss:$16 sps:$4 sm:$0xff]   ;;  %v7983_v19 = vld [vmem:[#allocation4 + $0x840] ss:$16 sps:$4 sm:$0xff]  }
 0x24e   :  { %8766 = vtanh.f32 %v1441_v23  ;;  %2377 = vmatpush2.bf16.msra.mxu0 %v7887_v21  ;;  %v7944_v21 = vld [vmem:[#allocation4 + $0x7e8] ss:$16 sps:$4 sm:$0xff]   ;;  %v7986_v23 = vld [vmem:[#allocation4 + $0x820] ss:$16 sps:$4 sm:$0xff]  }
 0x24f   :  { %2378 = vmatprep.subr.bf16.mxu0 %v7895_v22  ;;  %v7949_v22 = vld [vmem:[#allocation4 + $0x7cc] ss:$16 sps:$4 sm:$0xff]  }
 0x252   :  { %2379 = vmatpush2.bf16.msra.mxu0 %v7893_v24  ;;  %v7991_v24 = vld [vmem:[#allocation4 + $0x804] ss:$16 sps:$4 sm:$0xff]  }
 0x253   :  { %2380 = vmatprep.subr.bf16.mxu0 %v7901_v25  ;;  %v7947_v25 = vld [vmem:[#allocation4 + $0x7c8] ss:$16 sps:$4 sm:$0xff]  }
 0x255   :  { %v8761_v28 = vpop.eup %8760 }
 0x256   :  { %2381 = vmatpush2.bf16.msra.mxu0 %v7899_v26  ;;  %v1452_v39 = vmul.f32 0.5, %v8761_v28  ;;  %v7952_v26 = vld [vmem:[#allocation4 + $0x7ac] ss:$16 sps:$4 sm:$0xff]   ;;  %v7950_v28 = vld [vmem:[#allocation4 + $0x7a8] ss:$16 sps:$4 sm:$0xff]  }
 0x257   :  { %v8763_v30 = vpop.eup %8762  ;;  %2382 = vmatprep.subr.bf16.mxu0 %v7907_v27  ;;  %v7989_v27 = vld [vmem:[#allocation4 + $0x800] ss:$16 sps:$4 sm:$0xff]  }
 0x258   :  { %v1453_v33 = vmul.f32 0.5, %v8763_v30  ;;  %v1460_v52 = vadd.f32 0.5, %v1452_v39  ;;  %v7953_v30 = vld [vmem:[#allocation4 + $0x788] ss:$16 sps:$4 sm:$0xff]  }
 0x259   :  { %v8765_v34 = vpop.eup %8764  ;;  %v7959_v39 = vld [vmem:[#allocation4 + $0x748] ss:$16 sps:$4 sm:$0xff]  }
 0x25a   :  { %v1456_v40 = vmul.f32 0.5, %v8765_v34  ;;  %2383 = vmatpush2.bf16.msra.mxu0 %v7905_v29  ;;  %v1461_v47 = vadd.f32 0.5, %v1453_v33  ;;  %v1468_v50 = vmul.f32 %v1460_v52, %v1426_v5  ;;  %v7971_v5 = vld [vmem:[#allocation4 + $0x8c0] ss:$16 sps:$4 sm:$0xff]   ;;  %v7955_v29 = vld [vmem:[#allocation4 + $0x78c] ss:$16 sps:$4 sm:$0xff]  }
 0x25b   :  { %v8767_v42 = vpop.eup %8766  ;;  %2384 = vmatprep.subr.bf16.mxu0 %v7913_v31  ;;  %v7958_v31 = vld [vmem:[#allocation4 + $0x76c] ss:$16 sps:$4 sm:$0xff]   ;;  %v7956_v33 = vld [vmem:[#allocation4 + $0x768] ss:$16 sps:$4 sm:$0xff]   ;;  %v7995_v52 = vld [vmem:[#allocation4 + $0x9c0] ss:$16 sps:$4 sm:$0xff]  }
 0x25c   :  { %v1464_v48 = vadd.f32 0.5, %v1456_v40  ;;  %v1457_v49 = vmul.f32 0.5, %v8767_v42  ;;  %v1469_v57 = vmul.f32 %v1461_v47, %v1428_v10  ;;  %v7935_v10 = vld [vmem:[#allocation4 + $0x648] ss:$16 sps:$4 sm:$0xff]   ;;  %v7961_v34 = vld [vmem:[#allocation4 + $0x74c] ss:$16 sps:$4 sm:$0xff]  }
 0x25d   :  { %v7964_v40 = vld [vmem:[#allocation4 + $0x72c] ss:$16 sps:$4 sm:$0xff]   ;;  %v7994_v47 = vld [vmem:[#allocation4 + $0x9e4] ss:$16 sps:$4 sm:$0xff]  }
 0x25e   :  { %v1465_v53 = vadd.f32 0.5, %v1457_v49  ;;  %2385 = vmatpush2.bf16.msra.mxu0 %v7911_v41  ;;  %v1472_v55 = vmul.f32 %v1464_v48, %v1430_v16  ;;  %v7985_v16 = vld [vmem:[#allocation4 + $0x844] ss:$16 sps:$4 sm:$0xff]   ;;  %v7962_v41 = vld [vmem:[#allocation4 + $0x728] ss:$16 sps:$4 sm:$0xff]  }
 0x25f   :  { %2386 = vmatprep.subr.bf16.mxu0 %v7919_v43  ;;  %v7967_v42 = vld [vmem:[#allocation4 + $0x70c] ss:$16 sps:$4 sm:$0xff]   ;;  %v7965_v43 = vld [vmem:[#allocation4 + $0x708] ss:$16 sps:$4 sm:$0xff]   ;;  %v7992_v48 = vld [vmem:[#allocation4 + $0x9e0] ss:$16 sps:$4 sm:$0xff]  }
 0x260   :  { %v1473_v58 = vmul.f32 %v1465_v53, %v1432_v20  ;;  %v9146_v51 = vpack.c.bf16 %v1472_v55, %v1468_v50  ;;  %v7988_v20 = vld [vmem:[#allocation4 + $0x824] ss:$16 sps:$4 sm:$0xff]   ;;  %v8004_v50 = vld [vmem:[#allocation4 + $0x960] ss:$16 sps:$4 sm:$0xff]  }
 0x261   :  { %v7997_v49 = vld [vmem:[#allocation4 + $0x9c4] ss:$16 sps:$4 sm:$0xff]  }
 0x262   :  { %2387 = vmatpush2.bf16.msra.mxu0 %v7917_v54  ;;  %v1477_v60 = vpack.c.bf16 %v1473_v58, %v1469_v57  ;;  %v8000_v53 = vld [vmem:[#allocation4 + $0x9a4] ss:$16 sps:$4 sm:$0xff]   ;;  %v7998_v54 = vld [vmem:[#allocation4 + $0x9a0] ss:$16 sps:$4 sm:$0xff]  }
 0x263   :  { %3278 = vmatprep.subr.bf16.mxu0 %v7970_v3  ;;  %v8003_v55 = vld [vmem:[#allocation4 + $0x984] ss:$16 sps:$4 sm:$0xff]   ;;  %v8001_v57 = vld [vmem:[#allocation4 + $0x980] ss:$16 sps:$4 sm:$0xff]  }
 0x264   :  { %2345 = vmatprep.mubr.bf16.mxu1 %v1477_v60  ;;  %v8006_v58 = vld [vmem:[#allocation4 + $0x964] ss:$16 sps:$4 sm:$0xff]   ;;  %v8022_v3 = vld [vmem:[#allocation4 + $0xac0] ss:$16 sps:$4 sm:$0xff]  }
 0x265   :  { %2346 = vmatmul.mubr.bf16.vlgmr.msra.gmra.mxu1 %v9146_v51  ;;  %2389 = vmatmul.mubr.bf16.vlgmr.msra.gmra.mxu0 %v9139_v44  ;;  %v7976_v44 = vld [vmem:[#allocation4 + $0x8a4] ss:$16 sps:$4 sm:$0xff]  }
 0x266   :  { %2400 = vmatpush1.bf16.msra.mxu1 %v7920_v45  ;;  %2431 = vmatprep.mubr.bf16.mxu1 %v1477_v60  ;;  %v8009_v60 = vld [vmem:[#allocation4 + $0x944] ss:$16 sps:$4 sm:$0xff]   ;;  %v8007_v45 = vld [vmem:[#allocation4 + $0x940] ss:$16 sps:$4 sm:$0xff]  }
 0x267   :  { %2401 = vmatprep.subr.bf16.mxu1 %v7925_v46  ;;  %3279 = vmatpush1.bf16.msra.mxu0 %v7968_v2  ;;  %v8010_v46 = vld [vmem:[#allocation4 + $0x920] ss:$16 sps:$4 sm:$0xff]   ;;  %v8021_v2 = vld [vmem:[#allocation4 + $0x8ec] ss:$16 sps:$4 sm:$0xff]  }
 0x268   :  { %3280 = vmatprep.subr.bf16.mxu0 %v7973_v4  ;;  %v8024_v4 = vld [vmem:[#allocation4 + $0xac4] ss:$16 sps:$4 sm:$0xff]  }
 0x26a   :  { %2402 = vmatpush1.bf16.msra.mxu1 %v7923_v61  ;;  %v8015_v61 = vld [vmem:[#allocation4 + $0x904] ss:$16 sps:$4 sm:$0xff]  }
 0x26b   :  { %2403 = vmatprep.subr.bf16.mxu1 %v7928_v62  ;;  %3281 = vmatpush1.bf16.msra.mxu0 %v7971_v5  ;;  %v8013_v62 = vld [vmem:[#allocation4 + $0x900] ss:$16 sps:$4 sm:$0xff]  }
 0x26c   :  { %3282 = vmatprep.subr.bf16.mxu0 %v7976_v44  ;;  %v8034_v5 = vld [vmem:[#allocation4 + $0xa80] ss:$16 sps:$4 sm:$0xff]   ;;  %v8036_v44 = vld [vmem:[#allocation4 + $0xa84] ss:$16 sps:$4 sm:$0xff]  }
 0x26e   :  { %2404 = vmatpush1.bf16.msra.mxu1 %v7926_v63  ;;  %v8016_v63 = vld [vmem:[#allocation4 + $0xae0] ss:$16 sps:$4 sm:$0xff]  }
 0x26f   :  { %2405 = vmatprep.subr.bf16.mxu1 %v7931_v1  ;;  %3283 = vmatpush1.bf16.msra.mxu0 %v7974_v8  ;;  %v8018_v1 = vld [vmem:[#allocation4 + $0xae4] ss:$16 sps:$4 sm:$0xff]   ;;  %v8046_v8 = vld [vmem:[#allocation4 + $0xa40] ss:$16 sps:$4 sm:$0xff]  }
 0x270   :  { %3284 = vmatprep.subr.bf16.mxu0 %v7979_v9  ;;  %v8048_v9 = vld [vmem:[#allocation4 + $0xa44] ss:$16 sps:$4 sm:$0xff]  }
 0x272   :  { %2406 = vmatpush1.bf16.msra.mxu1 %v7929_v56  ;;  %v8028_v56 = vld [vmem:[#allocation4 + $0xaa0] ss:$16 sps:$4 sm:$0xff]  }
 0x273   :  { %2407 = vmatprep.subr.bf16.mxu1 %v7934_v59  ;;  %3285 = vmatpush1.bf16.msra.mxu0 %v7977_v12  ;;  %v8030_v59 = vld [vmem:[#allocation4 + $0xaa4] ss:$16 sps:$4 sm:$0xff]   ;;  %v8058_v12 = vld [vmem:[#allocation4 + $0xa00] ss:$16 sps:$4 sm:$0xff]  }
 0x274   :  { %3286 = vmatprep.subr.bf16.mxu0 %v7982_v13  ;;  %v8060_v13 = vld [vmem:[#allocation4 + $0xa04] ss:$16 sps:$4 sm:$0xff]  }
 0x276   :  { %2408 = vmatpush1.bf16.msra.mxu1 %v7932_v6  ;;  %v8040_v6 = vld [vmem:[#allocation4 + $0xa60] ss:$16 sps:$4 sm:$0xff]  }
 0x277   :  { %2409 = vmatprep.subr.bf16.mxu1 %v7937_v7  ;;  %3287 = vmatpush1.bf16.msra.mxu0 %v7980_v15  ;;  %v8042_v7 = vld [vmem:[#allocation4 + $0xa64] ss:$16 sps:$4 sm:$0xff]  }
 0x278   :  { %3288 = vmatprep.subr.bf16.mxu0 %v7985_v16  ;;  %v8072_v15 = vld [vmem:[#allocation4 + $0xbc4] ss:$16 sps:$4 sm:$0xff]   ;;  %v8070_v16 = vld [vmem:[#allocation4 + $0xbc0] ss:$16 sps:$4 sm:$0xff]  }
 0x27a   :  { %2410 = vmatpush1.bf16.msra.mxu1 %v7935_v10  ;;  %v8052_v10 = vld [vmem:[#allocation4 + $0xa20] ss:$16 sps:$4 sm:$0xff]  }
 0x27b   :  { %2411 = vmatprep.subr.bf16.mxu1 %v7940_v11  ;;  %3289 = vmatpush1.bf16.msra.mxu0 %v7983_v19  ;;  %v8054_v11 = vld [vmem:[#allocation4 + $0xa24] ss:$16 sps:$4 sm:$0xff]  }
 0x27c   :  { %3290 = vmatprep.subr.bf16.mxu0 %v7988_v20  ;;  %v8084_v19 = vld [vmem:[#allocation4 + $0xb84] ss:$16 sps:$4 sm:$0xff]   ;;  %v8082_v20 = vld [vmem:[#allocation4 + $0xb80] ss:$16 sps:$4 sm:$0xff]  }
 0x27e   :  { %2412 = vmatpush1.bf16.msra.mxu1 %v7938_v14  ;;  %v8066_v14 = vld [vmem:[#allocation4 + $0xbe4] ss:$16 sps:$4 sm:$0xff]  }
 0x27f   :  { %2413 = vmatprep.subr.bf16.mxu1 %v7943_v0  ;;  %3291 = vmatpush1.bf16.msra.mxu0 %v7986_v23  ;;  %v8064_v0 = vld [vmem:[#allocation4 + $0xbe0] ss:$16 sps:$4 sm:$0xff]   ;;  %v8096_v23 = vld [vmem:[#allocation4 + $0xb44] ss:$16 sps:$4 sm:$0xff]  }
 0x280   :  { %3292 = vmatprep.subr.bf16.mxu0 %v7991_v24  ;;  %v8094_v24 = vld [vmem:[#allocation4 + $0xb40] ss:$16 sps:$4 sm:$0xff]  }
 0x282   :  { %2414 = vmatpush1.bf16.msra.mxu1 %v7941_v17  ;;  %v8078_v17 = vld [vmem:[#allocation4 + $0xba4] ss:$16 sps:$4 sm:$0xff]  }
 0x283   :  { %2415 = vmatprep.subr.bf16.mxu1 %v7946_v18  ;;  %3293 = vmatpush1.bf16.msra.mxu0 %v7989_v27  ;;  %v8076_v18 = vld [vmem:[#allocation4 + $0xba0] ss:$16 sps:$4 sm:$0xff]   ;;  %v8108_v27 = vld [vmem:[#allocation4 + $0xb04] ss:$16 sps:$4 sm:$0xff]  }
 0x284   :  { %3294 = vmatprep.subr.bf16.mxu0 %v7994_v47 }
 0x286   :  { %2416 = vmatpush2.bf16.msra.mxu1 %v7944_v21  ;;  %v8090_v21 = vld [vmem:[#allocation4 + $0xb64] ss:$16 sps:$4 sm:$0xff]  }
 0x287   :  { %2417 = vmatprep.subr.bf16.mxu1 %v7949_v22  ;;  %3295 = vmatpush2.bf16.msra.mxu0 %v7992_v48  ;;  %v8088_v22 = vld [vmem:[#allocation4 + $0xb60] ss:$16 sps:$4 sm:$0xff]  }
 0x288   :  { %3296 = vmatprep.subr.bf16.mxu0 %v7997_v49 }
 0x28a   :  { %2418 = vmatpush2.bf16.msra.mxu1 %v7947_v25  ;;  %v8102_v25 = vld [vmem:[#allocation4 + $0xb24] ss:$16 sps:$4 sm:$0xff]  }
 0x28b   :  { %2419 = vmatprep.subr.bf16.mxu1 %v7952_v26  ;;  %3297 = vmatpush2.bf16.msra.mxu0 %v7995_v52  ;;  %v8100_v26 = vld [vmem:[#allocation4 + $0xb20] ss:$16 sps:$4 sm:$0xff]  }
 0x28c   :  { %3298 = vmatprep.subr.bf16.mxu0 %v8000_v53 }
 0x28e   :  { %2420 = vmatpush2.bf16.msra.mxu1 %v7950_v28  ;;  %v8106_v28 = vld [vmem:[#allocation4 + $0xb00] ss:$16 sps:$4 sm:$0xff]  }
 0x28f   :  { %2421 = vmatprep.subr.bf16.mxu1 %v7955_v29  ;;  %3299 = vmatpush2.bf16.msra.mxu0 %v7998_v54  ;;  %v8114_v29 = vld [vmem:[#allocation4 + $0xaec] ss:$16 sps:$4 sm:$0xff]  }
 0x290   :  { %3300 = vmatprep.subr.bf16.mxu0 %v8003_v55 }
 0x292   :  { %2422 = vmatpush2.bf16.msra.mxu1 %v7953_v30 }
 0x293   :  { %2423 = vmatprep.subr.bf16.mxu1 %v7958_v31  ;;  %3301 = vmatpush2.bf16.msra.mxu0 %v8001_v57  ;;  %v9151_v31 = vld [vmem:[#allocation6 + $0x1] ss:$8 sm:$0xf] }
 0x294   :  { %3302 = vmatprep.subr.bf16.mxu0 %v8006_v58 }
 0x296   :  { %2424 = vmatpush2.bf16.msra.mxu1 %v7956_v33 }
 0x297   :  { %2425 = vmatprep.subr.bf16.mxu1 %v7961_v34  ;;  %3303 = vmatpush2.bf16.msra.mxu0 %v8004_v50  ;;  %v1613_v34 = vrot.slane %v9151_v31, %v9105_v35 }
 0x298   :  { %3304 = vmatprep.subr.bf16.mxu0 %v8009_v60 }
 0x29a   :  { %2426 = vmatpush2.bf16.msra.mxu1 %v7959_v39  ;;  %v1617_v39 = vrot.slane %v9151_v31, %v9109_v37 }
 0x29b   :  { %2427 = vmatprep.subr.bf16.mxu1 %v7964_v40  ;;  %3305 = vmatpush2.bf16.msra.mxu0 %v8007_v45 }
 0x29e   :  { %2428 = vmatpush2.bf16.msra.mxu1 %v7962_v41 }
 0x29f   :  { %2429 = vmatprep.subr.bf16.mxu1 %v7967_v42 }
 0x2a2   :  { %2430 = vmatpush2.bf16.msra.mxu1 %v7965_v43 }
 0x2a3   :  { %3321 = vmatprep.subr.bf16.mxu1 %v8018_v1 }
 0x2a5   :  { %2432 = vmatmul.mubr.bf16.vlgmr.msra.gmra.mxu1 %v9146_v51  ;;  %v8012_v51 = vld [vmem:[#allocation4 + $0x924] ss:$16 sps:$4 sm:$0xff]  }
 0x2a6   :  { %3306 = vmatprep.subr.bf16.mxu0 %v8012_v51  ;;  %3322 = vmatpush1.bf16.msra.mxu1 %v8016_v63 }
 0x2a7   :  { %3307 = vmatpush2.bf16.msra.mxu0 %v8010_v46  ;;  %3323 = vmatprep.subr.bf16.mxu1 %v8024_v4 }
 0x2a8   :  { %3308 = vmatprep.subr.bf16.mxu0 %v8015_v61 }
 0x2aa   :  { %3324 = vmatpush1.bf16.msra.mxu1 %v8022_v3 }
 0x2ab   :  { %3309 = vmatpush2.bf16.msra.mxu0 %v8013_v62  ;;  %3325 = vmatprep.subr.bf16.mxu1 %v8030_v59 }
 0x2ac   :  { %3364 = vmatprep.subr.bf16.mxu0 %v8021_v2 }
 0x2ae   :  { %3326 = vmatpush1.bf16.msra.mxu1 %v8028_v56 }
 0x2af   :  { %3327 = vmatprep.subr.bf16.mxu1 %v8036_v44 }
 0x2b2   :  { %3328 = vmatpush1.bf16.msra.mxu1 %v8034_v5 }
 0x2b3   :  { %3329 = vmatprep.subr.bf16.mxu1 %v8042_v7 }
 0x2b6   :  { %3330 = vmatpush1.bf16.msra.mxu1 %v8040_v6 }
 0x2b7   :  { %3331 = vmatprep.subr.bf16.mxu1 %v8048_v9 }
 0x2ba   :  { %3332 = vmatpush1.bf16.msra.mxu1 %v8046_v8 }
 0x2bb   :  { %3333 = vmatprep.subr.bf16.mxu1 %v8054_v11 }
 0x2be   :  { %3334 = vmatpush1.bf16.msra.mxu1 %v8052_v10 }
 0x2bf   :  { %3335 = vmatprep.subr.bf16.mxu1 %v8060_v13 }
 0x2c2   :  { %3336 = vmatpush1.bf16.msra.mxu1 %v8058_v12  ;;  %v8019_v12 = vld [vmem:[#allocation4 + $0x8e8] ss:$16 sps:$4 sm:$0xff]  }
 0x2c3   :  { %3337 = vmatprep.subr.bf16.mxu1 %v8066_v14  ;;  %v8027_v14 = vld [vmem:[#allocation4 + $0x8cc] ss:$16 sps:$4 sm:$0xff]  }
 0x2c6   :  { %3338 = vmatpush2.bf16.msra.mxu1 %v8064_v0  ;;  %v8025_v0 = vld [vmem:[#allocation4 + $0x8c8] ss:$16 sps:$4 sm:$0xff]  }
 0x2c7   :  { %3339 = vmatprep.subr.bf16.mxu1 %v8072_v15  ;;  %v8033_v15 = vld [vmem:[#allocation4 + $0x8ac] ss:$16 sps:$4 sm:$0xff]  }
 0x2ca   :  { %3340 = vmatpush2.bf16.msra.mxu1 %v8070_v16  ;;  %v8031_v16 = vld [vmem:[#allocation4 + $0x8a8] ss:$16 sps:$4 sm:$0xff]  }
 0x2cb   :  { %3341 = vmatprep.subr.bf16.mxu1 %v8078_v17  ;;  %v8039_v17 = vld [vmem:[#allocation4 + $0x88c] ss:$16 sps:$4 sm:$0xff]  }
 0x2ce   :  { %3342 = vmatpush2.bf16.msra.mxu1 %v8076_v18  ;;  %v8037_v18 = vld [vmem:[#allocation4 + $0x888] ss:$16 sps:$4 sm:$0xff]  }
 0x2cf   :  { %3343 = vmatprep.subr.bf16.mxu1 %v8084_v19  ;;  %v8045_v19 = vld [vmem:[#allocation4 + $0x86c] ss:$16 sps:$4 sm:$0xff]  }
 0x2d2   :  { %3344 = vmatpush2.bf16.msra.mxu1 %v8082_v20  ;;  %v8043_v20 = vld [vmem:[#allocation4 + $0x868] ss:$16 sps:$4 sm:$0xff]  }
 0x2d3   :  { %3345 = vmatprep.subr.bf16.mxu1 %v8090_v21  ;;  %v8051_v21 = vld [vmem:[#allocation4 + $0x84c] ss:$16 sps:$4 sm:$0xff]  }
 0x2d6   :  { %3346 = vmatpush2.bf16.msra.mxu1 %v8088_v22  ;;  %v8049_v22 = vld [vmem:[#allocation4 + $0x848] ss:$16 sps:$4 sm:$0xff]  }
 0x2d7   :  { %3347 = vmatprep.subr.bf16.mxu1 %v8096_v23  ;;  %v8057_v23 = vld [vmem:[#allocation4 + $0x82c] ss:$16 sps:$4 sm:$0xff]  }
 0x2da   :  { %3348 = vmatpush2.bf16.msra.mxu1 %v8094_v24 }
 0x2db   :  { %3349 = vmatprep.subr.bf16.mxu1 %v8102_v25  ;;  %v8055_v25 = vld [vmem:[#allocation4 + $0x828] ss:$16 sps:$4 sm:$0xff]  }
 0x2de   :  { %3350 = vmatpush2.bf16.msra.mxu1 %v8100_v26  ;;  %v8063_v26 = vld [vmem:[#allocation4 + $0x80c] ss:$16 sps:$4 sm:$0xff]  }
 0x2df   :  { %3351 = vmatprep.subr.bf16.mxu1 %v8108_v27 }
 0x2e2   :  { %3352 = vmatpush2.bf16.msra.mxu1 %v8106_v28  ;;  %v1621_v28 = vrot.slane %v9151_v31, %v9107_v36 }
 0x2e3   :  { %3407 = vmatprep.subr.bf16.mxu1 %v8114_v29  ;;  %v8061_v29 = vld [vmem:[#allocation4 + $0x808] ss:$16 sps:$4 sm:$0xff]  }
 0x2e5   :  { %v2304_v30 = vpop.f32.mrf.mxu0 }
 0x2e6   :  { %v2305_v41 = vadd.f32 %v2304_v30, %v1613_v34  ;;  %v8069_v30 = vld [vmem:[#allocation4 + $0x9ec] ss:$16 sps:$4 sm:$0xff]  }
 0x2e7   :  { %v2306_v33 = vpop.f32.mrf.mxu0 }
 0x2e8   :  { %v2307_v43 = vadd.f32 %v2306_v33, %v1617_v39  ;;  %v1625_v33 = vrot.slane %v9151_v31, %v9111_v38 }
 0x2e9   :  { %v2308_v40 = vpop.f32.mrf.mxu0 }
 0x2ea   :  { %v2309_v52 = vadd.f32 %v2308_v40, %v1613_v34  ;;  %v8067_v40 = vld [vmem:[#allocation4 + $0x9e8] ss:$16 sps:$4 sm:$0xff]  }
 0x2eb   :  { %v2310_v48 = vpop.f32.mrf.mxu0 }
 0x2ec   :  { %v2311_v57 = vadd.f32 %v2310_v48, %v1617_v39 }
 0x325   :  { %v2347_v42 = vpop.f32.mrf.mxu1  ;;  %v2390_v24 = vpop.f32.mrf.mxu0 }
 0x326   :  { %v2348_v47 = vadd.f32 %v2347_v42, %v2305_v41  ;;  %v2391_v39 = vadd.f32 %v2390_v24, %v1621_v28  ;;  %v8075_v42 = vld [vmem:[#allocation4 + $0x9cc] ss:$16 sps:$4 sm:$0xff]   ;;  %v8112_v24 = vld [vmem:[#allocation4 + $0xae8] ss:$16 sps:$4 sm:$0xff]  }
 0x327   :  { %v2349_v49 = vpop.f32.mrf.mxu1  ;;  %v2392_v27 = vpop.f32.mrf.mxu0 }
 0x328   :  { %v2442_v53 = vmul.f32 0.5, %v2348_v47  ;;  %v2350_v54 = vadd.f32 %v2349_v49, %v2307_v43  ;;  %v2393_v43 = vadd.f32 %v2392_v27, %v1625_v33  ;;  %v8115_v27 = vld [vmem:[#allocation4 + $0xac8] ss:$16 sps:$4 sm:$0xff]  }
 0x329   :  { %v2351_v55 = vpop.f32.mrf.mxu1  ;;  %v2394_v34 = vpop.f32.mrf.mxu0 }
 0x32a   :  { %v2443_v58 = vmul.f32 0.5, %v2350_v54  ;;  %v2352_v50 = vadd.f32 %v2351_v55, %v2309_v52  ;;  %8768 = vtanh.f32 %v2442_v53  ;;  %v2395_v52 = vadd.f32 %v2394_v34, %v1621_v28  ;;  %v8073_v55 = vld [vmem:[#allocation4 + $0x9c8] ss:$16 sps:$4 sm:$0xff]   ;;  %v8120_v28 = vld [vmem:[#allocation4 + $0xaac] ss:$16 sps:$4 sm:$0xff]  }
 0x32b   :  { %v2353_v60 = vpop.f32.mrf.mxu1  ;;  %v2396_v48 = vpop.f32.mrf.mxu0  ;;  %v8162_v34 = vld [vmem:[#allocation4 + $0xce4] ss:$16 sps:$4 sm:$0xff]  }
 0x32c   :  { %8770 = vtanh.f32 %v2443_v58  ;;  %v2446_v45 = vmul.f32 0.5, %v2352_v50  ;;  %v2354_v51 = vadd.f32 %v2353_v60, %v2311_v57  ;;  %v8081_v58 = vld [vmem:[#allocation4 + $0x9ac] ss:$16 sps:$4 sm:$0xff]   ;;  %v2397_v31 = vadd.f32 %v2396_v48, %v1625_v33  ;;  %v8160_v33 = vld [vmem:[#allocation4 + $0xce0] ss:$16 sps:$4 sm:$0xff]  }
 0x32d   :  { %v8166_v48 = vld [vmem:[#allocation4 + $0xca0] ss:$16 sps:$4 sm:$0xff]  }
 0x32e   :  { %8772 = vtanh.f32 %v2446_v45  ;;  %v2447_v46 = vmul.f32 0.5, %v2354_v51 }
 0x330   :  { %8774 = vtanh.f32 %v2447_v46 }
 0x337   :  { %v8769_v61 = vpop.eup %8768 }
 0x338   :  { %v2458_v2 = vmul.f32 0.5, %v8769_v61  ;;  %v8079_v61 = vld [vmem:[#allocation4 + $0x9a8] ss:$16 sps:$4 sm:$0xff]  }
 0x339   :  { %v8771_v62 = vpop.eup %8770 }
 0x33a   :  { %v2459_v63 = vmul.f32 0.5, %v8771_v62  ;;  %v2466_v44 = vadd.f32 0.5, %v2458_v2  ;;  %v8087_v62 = vld [vmem:[#allocation4 + $0x98c] ss:$16 sps:$4 sm:$0xff]  }
 0x33b   :  { %v8773_v1 = vpop.eup %8772  ;;  %v8093_v2 = vld [vmem:[#allocation4 + $0x96c] ss:$16 sps:$4 sm:$0xff]  }
 0x33c   :  { %v2462_v3 = vmul.f32 0.5, %v8773_v1  ;;  %v2467_v56 = vadd.f32 0.5, %v2459_v63  ;;  %v2474_v10 = vmul.f32 %v2466_v44, %v2348_v47  ;;  %v8085_v1 = vld [vmem:[#allocation4 + $0x988] ss:$16 sps:$4 sm:$0xff]   ;;  %v8105_v44 = vld [vmem:[#allocation4 + $0x92c] ss:$16 sps:$4 sm:$0xff]  }
 0x33d   :  { %v8775_v4 = vpop.eup %8774 }
 0x33e   :  { %v2470_v59 = vadd.f32 0.5, %v2462_v3  ;;  %v2463_v5 = vmul.f32 0.5, %v8775_v4  ;;  %v2475_v8 = vmul.f32 %v2467_v56, %v2350_v54  ;;  %v8091_v3 = vld [vmem:[#allocation4 + $0x968] ss:$16 sps:$4 sm:$0xff]   ;;  %v8099_v4 = vld [vmem:[#allocation4 + $0x94c] ss:$16 sps:$4 sm:$0xff]  }
 0x340   :  { %v2471_v6 = vadd.f32 0.5, %v2463_v5  ;;  %v2478_v7 = vmul.f32 %v2470_v59, %v2352_v50  ;;  %v8097_v59 = vld [vmem:[#allocation4 + $0x948] ss:$16 sps:$4 sm:$0xff]  }
 0x342   :  { %v2479_v9 = vmul.f32 %v2471_v6, %v2354_v51  ;;  %v9157_v13 = vpack.c.bf16 %v2478_v7, %v2474_v10  ;;  %v8103_v10 = vld [vmem:[#allocation4 + $0x928] ss:$16 sps:$4 sm:$0xff]  }
 0x344   :  { %v2483_v11 = vpack.c.bf16 %v2479_v9, %v2475_v8 }
 0x346   :  { %3310 = vmatprep.mubr.bf16.mxu0 %v2483_v11 }
 0x347   :  { %3311 = vmatmul.mubr.bf16.vlgmr.msra.gmra.mxu0 %v9157_v13 }
 0x348   :  { %3365 = vmatpush1.bf16.msra.mxu0 %v8019_v12  ;;  %3396 = vmatprep.mubr.bf16.mxu0 %v2483_v11  ;;  %v8111_v12 = vld [vmem:[#allocation4 + $0x90c] ss:$16 sps:$4 sm:$0xff]  }
 0x349   :  { %3366 = vmatprep.subr.bf16.mxu0 %v8027_v14 }
 0x34c   :  { %3367 = vmatpush1.bf16.msra.mxu0 %v8025_v0 }
 0x34d   :  { %3368 = vmatprep.subr.bf16.mxu0 %v8033_v15 }
 0x350   :  { %3369 = vmatpush1.bf16.msra.mxu0 %v8031_v16 }
 0x351   :  { %3370 = vmatprep.subr.bf16.mxu0 %v8039_v17 }
 0x354   :  { %3371 = vmatpush1.bf16.msra.mxu0 %v8037_v18  ;;  %v8109_v18 = vld [vmem:[#allocation4 + $0x908] ss:$16 sps:$4 sm:$0xff]  }
 0x355   :  { %3372 = vmatprep.subr.bf16.mxu0 %v8045_v19 }
 0x358   :  { %3373 = vmatpush1.bf16.msra.mxu0 %v8043_v20 }
 0x359   :  { %3374 = vmatprep.subr.bf16.mxu0 %v8051_v21 }
 0x35c   :  { %3375 = vmatpush1.bf16.msra.mxu0 %v8049_v22 }
 0x35d   :  { %3376 = vmatprep.subr.bf16.mxu0 %v8057_v23 }
 0x360   :  { %3377 = vmatpush1.bf16.msra.mxu0 %v8055_v25 }
 0x361   :  { %3378 = vmatprep.subr.bf16.mxu0 %v8063_v26  ;;  %v8117_v26 = vld [vmem:[#allocation4 + $0xacc] ss:$16 sps:$4 sm:$0xff]  }
 0x364   :  { %3379 = vmatpush1.bf16.msra.mxu0 %v8061_v29  ;;  %v8118_v29 = vld [vmem:[#allocation4 + $0xaa8] ss:$16 sps:$4 sm:$0xff]  }
 0x365   :  { %v2433_v41 = vpop.f32.mrf.mxu1  ;;  %3380 = vmatprep.subr.bf16.mxu0 %v8069_v30  ;;  %v8123_v30 = vld [vmem:[#allocation4 + $0xa8c] ss:$16 sps:$4 sm:$0xff]  }
 0x366   :  { %v2434_v47 = vadd.f32 %v2433_v41, %v2391_v39  ;;  %v8165_v39 = vld [vmem:[#allocation4 + $0xcc4] ss:$16 sps:$4 sm:$0xff]   ;;  %v8126_v41 = vld [vmem:[#allocation4 + $0xa6c] ss:$16 sps:$4 sm:$0xff]  }
 0x367   :  { %v2435_v49 = vpop.f32.mrf.mxu1 }
 0x368   :  { %v2444_v53 = vmul.f32 0.5, %v2434_v47  ;;  %v2436_v54 = vadd.f32 %v2435_v49, %v2393_v43  ;;  %3381 = vmatpush2.bf16.msra.mxu0 %v8067_v40  ;;  %v8121_v40 = vld [vmem:[#allocation4 + $0xa88] ss:$16 sps:$4 sm:$0xff]   ;;  %v8171_v49 = vld [vmem:[#allocation4 + $0xc84] ss:$16 sps:$4 sm:$0xff]  }
 0x369   :  { %v2437_v57 = vpop.f32.mrf.mxu1  ;;  %3382 = vmatprep.subr.bf16.mxu0 %v8075_v42  ;;  %v8163_v42 = vld [vmem:[#allocation4 + $0xcc0] ss:$16 sps:$4 sm:$0xff]   ;;  %v8124_v43 = vld [vmem:[#allocation4 + $0xa68] ss:$16 sps:$4 sm:$0xff]  }
 0x36a   :  { %v2445_v50 = vmul.f32 0.5, %v2436_v54  ;;  %v2438_v60 = vadd.f32 %v2437_v57, %v2395_v52  ;;  %8776 = vtanh.f32 %v2444_v53  ;;  %v8127_v52 = vld [vmem:[#allocation4 + $0xa48] ss:$16 sps:$4 sm:$0xff]   ;;  %v8132_v53 = vld [vmem:[#allocation4 + $0xa2c] ss:$16 sps:$4 sm:$0xff]  }
 0x36b   :  { %v2439_v45 = vpop.f32.mrf.mxu1  ;;  %v8130_v57 = vld [vmem:[#allocation4 + $0xa28] ss:$16 sps:$4 sm:$0xff]  }
 0x36c   :  { %8778 = vtanh.f32 %v2445_v50  ;;  %v2448_v51 = vmul.f32 0.5, %v2438_v60  ;;  %v2440_v46 = vadd.f32 %v2439_v45, %v2397_v31  ;;  %3383 = vmatpush2.bf16.msra.mxu0 %v8073_v55  ;;  %v8174_v55 = vld [vmem:[#allocation4 + $0xc64] ss:$16 sps:$4 sm:$0xff]   ;;  %v8172_v31 = vld [vmem:[#allocation4 + $0xc60] ss:$16 sps:$4 sm:$0xff]  }
 0x36d   :  { %3384 = vmatprep.subr.bf16.mxu0 %v8081_v58  ;;  %v8135_v58 = vld [vmem:[#allocation4 + $0xa0c] ss:$16 sps:$4 sm:$0xff]   ;;  %v8177_v50 = vld [vmem:[#allocation4 + $0xc44] ss:$16 sps:$4 sm:$0xff]  }
 0x36e   :  { %8780 = vtanh.f32 %v2448_v51  ;;  %v2449_v63 = vmul.f32 0.5, %v2440_v46  ;;  %v8138_v45 = vld [vmem:[#allocation4 + $0xbec] ss:$16 sps:$4 sm:$0xff]   ;;  %v8175_v51 = vld [vmem:[#allocation4 + $0xc40] ss:$16 sps:$4 sm:$0xff]  }
 0x370   :  { %8782 = vtanh.f32 %v2449_v63  ;;  %3385 = vmatpush2.bf16.msra.mxu0 %v8079_v61  ;;  %v8136_v61 = vld [vmem:[#allocation4 + $0xbe8] ss:$16 sps:$4 sm:$0xff]   ;;  %v8178_v63 = vld [vmem:[#allocation4 + $0xc20] ss:$16 sps:$4 sm:$0xff]  }
 0x371   :  { %3386 = vmatprep.subr.bf16.mxu0 %v8087_v62  ;;  %v8141_v62 = vld [vmem:[#allocation4 + $0xbcc] ss:$16 sps:$4 sm:$0xff]  }
 0x374   :  { %3387 = vmatpush2.bf16.msra.mxu0 %v8085_v1  ;;  %v8183_v1 = vld [vmem:[#allocation4 + $0xc04] ss:$16 sps:$4 sm:$0xff]  }
 0x375   :  { %3388 = vmatprep.subr.bf16.mxu0 %v8093_v2  ;;  %v8139_v2 = vld [vmem:[#allocation4 + $0xbc8] ss:$16 sps:$4 sm:$0xff]  }
 0x377   :  { %v8777_v56 = vpop.eup %8776 }
 0x378   :  { %3389 = vmatpush2.bf16.msra.mxu0 %v8091_v3  ;;  %v2460_v8 = vmul.f32 0.5, %v8777_v56  ;;  %v8144_v3 = vld [vmem:[#allocation4 + $0xbac] ss:$16 sps:$4 sm:$0xff]   ;;  %v8142_v56 = vld [vmem:[#allocation4 + $0xba8] ss:$16 sps:$4 sm:$0xff]  }
 0x379   :  { %v8779_v5 = vpop.eup %8778  ;;  %3390 = vmatprep.subr.bf16.mxu0 %v8099_v4  ;;  %v8181_v4 = vld [vmem:[#allocation4 + $0xc00] ss:$16 sps:$4 sm:$0xff]  }
 0x37a   :  { %v2461_v6 = vmul.f32 0.5, %v8779_v5  ;;  %v2468_v16 = vadd.f32 0.5, %v2460_v8  ;;  %v8145_v5 = vld [vmem:[#allocation4 + $0xb88] ss:$16 sps:$4 sm:$0xff]  }
 0x37b   :  { %v8781_v7 = vpop.eup %8780  ;;  %v8151_v8 = vld [vmem:[#allocation4 + $0xb48] ss:$16 sps:$4 sm:$0xff]  }
 0x37c   :  { %v2464_v9 = vmul.f32 0.5, %v8781_v7  ;;  %3391 = vmatpush2.bf16.msra.mxu0 %v8097_v59  ;;  %v2469_v14 = vadd.f32 0.5, %v2461_v6  ;;  %v2476_v22 = vmul.f32 %v2468_v16, %v2434_v47  ;;  %v8129_v47 = vld [vmem:[#allocation4 + $0xa4c] ss:$16 sps:$4 sm:$0xff]   ;;  %v8148_v6 = vld [vmem:[#allocation4 + $0xb68] ss:$16 sps:$4 sm:$0xff]  }
 0x37d   :  { %v8783_v11 = vpop.eup %8782  ;;  %3392 = vmatprep.subr.bf16.mxu0 %v8105_v44  ;;  %v8147_v59 = vld [vmem:[#allocation4 + $0xb8c] ss:$16 sps:$4 sm:$0xff]   ;;  %v8187_v16 = vld [vmem:[#allocation4 + $0xdc0] ss:$16 sps:$4 sm:$0xff]  }
 0x37e   :  { %v2472_v0 = vadd.f32 0.5, %v2464_v9  ;;  %v2465_v15 = vmul.f32 0.5, %v8783_v11  ;;  %v2477_v20 = vmul.f32 %v2469_v14, %v2436_v54  ;;  %v8169_v54 = vld [vmem:[#allocation4 + $0xc80] ss:$16 sps:$4 sm:$0xff]   ;;  %v8150_v44 = vld [vmem:[#allocation4 + $0xb6c] ss:$16 sps:$4 sm:$0xff]  }
 0x37f   :  { %v8153_v7 = vld [vmem:[#allocation4 + $0xb4c] ss:$16 sps:$4 sm:$0xff]   ;;  %v8186_v14 = vld [vmem:[#allocation4 + $0xde4] ss:$16 sps:$4 sm:$0xff]  }
 0x380   :  { %v2473_v17 = vadd.f32 0.5, %v2465_v15  ;;  %3393 = vmatpush2.bf16.msra.mxu0 %v8103_v10  ;;  %v2480_v19 = vmul.f32 %v2472_v0, %v2438_v60  ;;  %v8133_v60 = vld [vmem:[#allocation4 + $0xa08] ss:$16 sps:$4 sm:$0xff]   ;;  %v8156_v9 = vld [vmem:[#allocation4 + $0xb2c] ss:$16 sps:$4 sm:$0xff]  }
 0x381   :  { %3394 = vmatprep.subr.bf16.mxu0 %v8111_v12  ;;  %v8154_v10 = vld [vmem:[#allocation4 + $0xb28] ss:$16 sps:$4 sm:$0xff]   ;;  %v8159_v11 = vld [vmem:[#allocation4 + $0xb0c] ss:$16 sps:$4 sm:$0xff]   ;;  %v8184_v0 = vld [vmem:[#allocation4 + $0xde0] ss:$16 sps:$4 sm:$0xff]  }
 0x382   :  { %v2481_v21 = vmul.f32 %v2473_v17, %v2440_v46  ;;  %v9164_v25 = vpack.c.bf16 %v2480_v19, %v2476_v22  ;;  %v8180_v46 = vld [vmem:[#allocation4 + $0xc24] ss:$16 sps:$4 sm:$0xff]   ;;  %v8157_v12 = vld [vmem:[#allocation4 + $0xb08] ss:$16 sps:$4 sm:$0xff]   ;;  %v8196_v22 = vld [vmem:[#allocation4 + $0xd60] ss:$16 sps:$4 sm:$0xff]  }
 0x383   :  { %v8189_v15 = vld [vmem:[#allocation4 + $0xdc4] ss:$16 sps:$4 sm:$0xff]  }
 0x384   :  { %3395 = vmatpush2.bf16.msra.mxu0 %v8109_v18  ;;  %v2485_v23 = vpack.c.bf16 %v2481_v21, %v2477_v20  ;;  %v8192_v17 = vld [vmem:[#allocation4 + $0xda4] ss:$16 sps:$4 sm:$0xff]   ;;  %v8190_v18 = vld [vmem:[#allocation4 + $0xda0] ss:$16 sps:$4 sm:$0xff]  }
 0x385   :  { %4286 = vmatprep.subr.bf16.mxu0 %v8162_v34  ;;  %v8195_v19 = vld [vmem:[#allocation4 + $0xd84] ss:$16 sps:$4 sm:$0xff]   ;;  %v8193_v20 = vld [vmem:[#allocation4 + $0xd80] ss:$16 sps:$4 sm:$0xff]  }
 0x386   :  { %3353 = vmatprep.mubr.bf16.mxu1 %v2485_v23  ;;  %v8198_v21 = vld [vmem:[#allocation4 + $0xd64] ss:$16 sps:$4 sm:$0xff]   ;;  %v8214_v34 = vld [vmem:[#allocation4 + $0xec0] ss:$16 sps:$4 sm:$0xff]  }
 0x387   :  { %3354 = vmatmul.mubr.bf16.vlgmr.msra.gmra.mxu1 %v9164_v25  ;;  %3397 = vmatmul.mubr.bf16.vlgmr.msra.gmra.mxu0 %v9157_v13  ;;  %v8168_v13 = vld [vmem:[#allocation4 + $0xca4] ss:$16 sps:$4 sm:$0xff]  }
 0x388   :  { %3408 = vmatpush1.bf16.msra.mxu1 %v8112_v24  ;;  %3439 = vmatprep.mubr.bf16.mxu1 %v2485_v23  ;;  %v8201_v23 = vld [vmem:[#allocation4 + $0xd44] ss:$16 sps:$4 sm:$0xff]   ;;  %v8199_v24 = vld [vmem:[#allocation4 + $0xd40] ss:$16 sps:$4 sm:$0xff]  }
 0x389   :  { %3409 = vmatprep.subr.bf16.mxu1 %v8117_v26  ;;  %4287 = vmatpush1.bf16.msra.mxu0 %v8160_v33  ;;  %v8202_v26 = vld [vmem:[#allocation4 + $0xd20] ss:$16 sps:$4 sm:$0xff]   ;;  %v8213_v33 = vld [vmem:[#allocation4 + $0xcec] ss:$16 sps:$4 sm:$0xff]  }
 0x38a   :  { %4288 = vmatprep.subr.bf16.mxu0 %v8165_v39  ;;  %v8216_v39 = vld [vmem:[#allocation4 + $0xec4] ss:$16 sps:$4 sm:$0xff]  }
 0x38c   :  { %3410 = vmatpush1.bf16.msra.mxu1 %v8115_v27  ;;  %v8207_v27 = vld [vmem:[#allocation4 + $0xd04] ss:$16 sps:$4 sm:$0xff]  }
 0x38d   :  { %3411 = vmatprep.subr.bf16.mxu1 %v8120_v28  ;;  %4289 = vmatpush1.bf16.msra.mxu0 %v8163_v42  ;;  %v8205_v28 = vld [vmem:[#allocation4 + $0xd00] ss:$16 sps:$4 sm:$0xff]  }
 0x38e   :  { %4290 = vmatprep.subr.bf16.mxu0 %v8168_v13  ;;  %v8226_v42 = vld [vmem:[#allocation4 + $0xe80] ss:$16 sps:$4 sm:$0xff]   ;;  %v8228_v13 = vld [vmem:[#allocation4 + $0xe84] ss:$16 sps:$4 sm:$0xff]  }
 0x390   :  { %3412 = vmatpush1.bf16.msra.mxu1 %v8118_v29  ;;  %v8208_v29 = vld [vmem:[#allocation4 + $0xee0] ss:$16 sps:$4 sm:$0xff]  }
 0x391   :  { %3413 = vmatprep.subr.bf16.mxu1 %v8123_v30  ;;  %4291 = vmatpush1.bf16.msra.mxu0 %v8166_v48  ;;  %v8210_v30 = vld [vmem:[#allocation4 + $0xee4] ss:$16 sps:$4 sm:$0xff]   ;;  %v8238_v48 = vld [vmem:[#allocation4 + $0xe40] ss:$16 sps:$4 sm:$0xff]  }
 0x392   :  { %4292 = vmatprep.subr.bf16.mxu0 %v8171_v49  ;;  %v8240_v49 = vld [vmem:[#allocation4 + $0xe44] ss:$16 sps:$4 sm:$0xff]  }
 0x394   :  { %3414 = vmatpush1.bf16.msra.mxu1 %v8121_v40  ;;  %v8220_v40 = vld [vmem:[#allocation4 + $0xea0] ss:$16 sps:$4 sm:$0xff]  }
 0x395   :  { %3415 = vmatprep.subr.bf16.mxu1 %v8126_v41  ;;  %4293 = vmatpush1.bf16.msra.mxu0 %v8169_v54  ;;  %v8222_v41 = vld [vmem:[#allocation4 + $0xea4] ss:$16 sps:$4 sm:$0xff]   ;;  %v8250_v54 = vld [vmem:[#allocation4 + $0xe00] ss:$16 sps:$4 sm:$0xff]  }
 0x396   :  { %4294 = vmatprep.subr.bf16.mxu0 %v8174_v55  ;;  %v8252_v55 = vld [vmem:[#allocation4 + $0xe04] ss:$16 sps:$4 sm:$0xff]  }
 0x398   :  { %3416 = vmatpush1.bf16.msra.mxu1 %v8124_v43  ;;  %v8232_v43 = vld [vmem:[#allocation4 + $0xe60] ss:$16 sps:$4 sm:$0xff]  }
 0x399   :  { %3417 = vmatprep.subr.bf16.mxu1 %v8129_v47  ;;  %4295 = vmatpush1.bf16.msra.mxu0 %v8172_v31  ;;  %v8234_v47 = vld [vmem:[#allocation4 + $0xe64] ss:$16 sps:$4 sm:$0xff]  }
 0x39a   :  { %4296 = vmatprep.subr.bf16.mxu0 %v8177_v50  ;;  %v8264_v31 = vld [vmem:[#allocation4 + $0xfc4] ss:$16 sps:$4 sm:$0xff]   ;;  %v8262_v50 = vld [vmem:[#allocation4 + $0xfc0] ss:$16 sps:$4 sm:$0xff]  }
 0x39c   :  { %3418 = vmatpush1.bf16.msra.mxu1 %v8127_v52  ;;  %v8244_v52 = vld [vmem:[#allocation4 + $0xe20] ss:$16 sps:$4 sm:$0xff]  }
 0x39d   :  { %3419 = vmatprep.subr.bf16.mxu1 %v8132_v53  ;;  %4297 = vmatpush1.bf16.msra.mxu0 %v8175_v51  ;;  %v8246_v53 = vld [vmem:[#allocation4 + $0xe24] ss:$16 sps:$4 sm:$0xff]  }
 0x39e   :  { %4298 = vmatprep.subr.bf16.mxu0 %v8180_v46  ;;  %v8276_v51 = vld [vmem:[#allocation4 + $0xf84] ss:$16 sps:$4 sm:$0xff]   ;;  %v8274_v46 = vld [vmem:[#allocation4 + $0xf80] ss:$16 sps:$4 sm:$0xff]  }
 0x3a0   :  { %3420 = vmatpush1.bf16.msra.mxu1 %v8130_v57  ;;  %v8258_v57 = vld [vmem:[#allocation4 + $0xfe4] ss:$16 sps:$4 sm:$0xff]  }
 0x3a1   :  { %3421 = vmatprep.subr.bf16.mxu1 %v8135_v58  ;;  %4299 = vmatpush1.bf16.msra.mxu0 %v8178_v63  ;;  %v8256_v58 = vld [vmem:[#allocation4 + $0xfe0] ss:$16 sps:$4 sm:$0xff]   ;;  %v8288_v63 = vld [vmem:[#allocation4 + $0xf44] ss:$16 sps:$4 sm:$0xff]  }
 0x3a2   :  { %4300 = vmatprep.subr.bf16.mxu0 %v8183_v1  ;;  %v8286_v1 = vld [vmem:[#allocation4 + $0xf40] ss:$16 sps:$4 sm:$0xff]  }
 0x3a4   :  { %3422 = vmatpush1.bf16.msra.mxu1 %v8133_v60  ;;  %v8270_v60 = vld [vmem:[#allocation4 + $0xfa4] ss:$16 sps:$4 sm:$0xff]  }
 0x3a5   :  { %3423 = vmatprep.subr.bf16.mxu1 %v8138_v45  ;;  %4301 = vmatpush1.bf16.msra.mxu0 %v8181_v4  ;;  %v8268_v45 = vld [vmem:[#allocation4 + $0xfa0] ss:$16 sps:$4 sm:$0xff]   ;;  %v8300_v4 = vld [vmem:[#allocation4 + $0xf04] ss:$16 sps:$4 sm:$0xff]  }
 0x3a6   :  { %4302 = vmatprep.subr.bf16.mxu0 %v8186_v14 }
 0x3a8   :  { %3424 = vmatpush2.bf16.msra.mxu1 %v8136_v61  ;;  %v8282_v61 = vld [vmem:[#allocation4 + $0xf64] ss:$16 sps:$4 sm:$0xff]  }
 0x3a9   :  { %3425 = vmatprep.subr.bf16.mxu1 %v8141_v62  ;;  %4303 = vmatpush2.bf16.msra.mxu0 %v8184_v0  ;;  %v8280_v62 = vld [vmem:[#allocation4 + $0xf60] ss:$16 sps:$4 sm:$0xff]  }
 0x3aa   :  { %4304 = vmatprep.subr.bf16.mxu0 %v8189_v15 }
 0x3ac   :  { %3426 = vmatpush2.bf16.msra.mxu1 %v8139_v2  ;;  %v8294_v2 = vld [vmem:[#allocation4 + $0xf24] ss:$16 sps:$4 sm:$0xff]  }
 0x3ad   :  { %3427 = vmatprep.subr.bf16.mxu1 %v8144_v3  ;;  %4305 = vmatpush2.bf16.msra.mxu0 %v8187_v16  ;;  %v8292_v3 = vld [vmem:[#allocation4 + $0xf20] ss:$16 sps:$4 sm:$0xff]  }
 0x3ae   :  { %4306 = vmatprep.subr.bf16.mxu0 %v8192_v17 }
 0x3b0   :  { %3428 = vmatpush2.bf16.msra.mxu1 %v8142_v56  ;;  %v8298_v56 = vld [vmem:[#allocation4 + $0xf00] ss:$16 sps:$4 sm:$0xff]  }
 0x3b1   :  { %3429 = vmatprep.subr.bf16.mxu1 %v8147_v59  ;;  %4307 = vmatpush2.bf16.msra.mxu0 %v8190_v18  ;;  %v8306_v59 = vld [vmem:[#allocation4 + $0xeec] ss:$16 sps:$4 sm:$0xff]  }
 0x3b2   :  { %4308 = vmatprep.subr.bf16.mxu0 %v8195_v19 }
 0x3b4   :  { %3430 = vmatpush2.bf16.msra.mxu1 %v8145_v5 }
 0x3b5   :  { %3431 = vmatprep.subr.bf16.mxu1 %v8150_v44  ;;  %4309 = vmatpush2.bf16.msra.mxu0 %v8193_v20  ;;  %v9169_v44 = vld [vmem:[#allocation6 + $0x2] ss:$8 sm:$0xf] }
 0x3b6   :  { %4310 = vmatprep.subr.bf16.mxu0 %v8198_v21 }
 0x3b8   :  { %3432 = vmatpush2.bf16.msra.mxu1 %v8148_v6 }
 0x3b9   :  { %3433 = vmatprep.subr.bf16.mxu1 %v8153_v7  ;;  %4311 = vmatpush2.bf16.msra.mxu0 %v8196_v22  ;;  %v2621_v7 = vrot.slane %v9169_v44, %v9105_v35 }
 0x3ba   :  { %4312 = vmatprep.subr.bf16.mxu0 %v8201_v23 }
 0x3bc   :  { %3434 = vmatpush2.bf16.msra.mxu1 %v8151_v8  ;;  %v2625_v8 = vrot.slane %v9169_v44, %v9109_v37 }
 0x3bd   :  { %3435 = vmatprep.subr.bf16.mxu1 %v8156_v9  ;;  %4313 = vmatpush2.bf16.msra.mxu0 %v8199_v24 }
 0x3c0   :  { %3436 = vmatpush2.bf16.msra.mxu1 %v8154_v10 }
 0x3c1   :  { %3437 = vmatprep.subr.bf16.mxu1 %v8159_v11 }
 0x3c4   :  { %3438 = vmatpush2.bf16.msra.mxu1 %v8157_v12 }
 0x3c5   :  { %4329 = vmatprep.subr.bf16.mxu1 %v8210_v30 }
 0x3c7   :  { %3440 = vmatmul.mubr.bf16.vlgmr.msra.gmra.mxu1 %v9164_v25  ;;  %v8204_v25 = vld [vmem:[#allocation4 + $0xd24] ss:$16 sps:$4 sm:$0xff]  }
 0x3c8   :  { %4314 = vmatprep.subr.bf16.mxu0 %v8204_v25  ;;  %4330 = vmatpush1.bf16.msra.mxu1 %v8208_v29 }
 0x3c9   :  { %4315 = vmatpush2.bf16.msra.mxu0 %v8202_v26  ;;  %4331 = vmatprep.subr.bf16.mxu1 %v8216_v39 }
 0x3ca   :  { %4316 = vmatprep.subr.bf16.mxu0 %v8207_v27 }
 0x3cc   :  { %4332 = vmatpush1.bf16.msra.mxu1 %v8214_v34 }
 0x3cd   :  { %4317 = vmatpush2.bf16.msra.mxu0 %v8205_v28  ;;  %4333 = vmatprep.subr.bf16.mxu1 %v8222_v41 }
 0x3ce   :  { %4372 = vmatprep.subr.bf16.mxu0 %v8213_v33 }
 0x3d0   :  { %4334 = vmatpush1.bf16.msra.mxu1 %v8220_v40 }
 0x3d1   :  { %4335 = vmatprep.subr.bf16.mxu1 %v8228_v13 }
 0x3d4   :  { %4336 = vmatpush1.bf16.msra.mxu1 %v8226_v42 }
 0x3d5   :  { %4337 = vmatprep.subr.bf16.mxu1 %v8234_v47 }
 0x3d8   :  { %4338 = vmatpush1.bf16.msra.mxu1 %v8232_v43 }
 0x3d9   :  { %4339 = vmatprep.subr.bf16.mxu1 %v8240_v49 }
 0x3dc   :  { %4340 = vmatpush1.bf16.msra.mxu1 %v8238_v48 }
 0x3dd   :  { %4341 = vmatprep.subr.bf16.mxu1 %v8246_v53 }
 0x3e0   :  { %4342 = vmatpush1.bf16.msra.mxu1 %v8244_v52 }
 0x3e1   :  { %4343 = vmatprep.subr.bf16.mxu1 %v8252_v55 }
 0x3e4   :  { %4344 = vmatpush1.bf16.msra.mxu1 %v8250_v54  ;;  %v8211_v54 = vld [vmem:[#allocation4 + $0xce8] ss:$16 sps:$4 sm:$0xff]  }
 0x3e5   :  { %4345 = vmatprep.subr.bf16.mxu1 %v8258_v57  ;;  %v8219_v57 = vld [vmem:[#allocation4 + $0xccc] ss:$16 sps:$4 sm:$0xff]  }
 0x3e8   :  { %4346 = vmatpush2.bf16.msra.mxu1 %v8256_v58  ;;  %v8217_v58 = vld [vmem:[#allocation4 + $0xcc8] ss:$16 sps:$4 sm:$0xff]  }
 0x3e9   :  { %4347 = vmatprep.subr.bf16.mxu1 %v8264_v31  ;;  %v8225_v31 = vld [vmem:[#allocation4 + $0xcac] ss:$16 sps:$4 sm:$0xff]  }
 0x3ec   :  { %4348 = vmatpush2.bf16.msra.mxu1 %v8262_v50  ;;  %v8223_v50 = vld [vmem:[#allocation4 + $0xca8] ss:$16 sps:$4 sm:$0xff]  }
 0x3ed   :  { %4349 = vmatprep.subr.bf16.mxu1 %v8270_v60  ;;  %v8231_v60 = vld [vmem:[#allocation4 + $0xc8c] ss:$16 sps:$4 sm:$0xff]  }
 0x3f0   :  { %4350 = vmatpush2.bf16.msra.mxu1 %v8268_v45  ;;  %v8229_v45 = vld [vmem:[#allocation4 + $0xc88] ss:$16 sps:$4 sm:$0xff]  }
 0x3f1   :  { %4351 = vmatprep.subr.bf16.mxu1 %v8276_v51  ;;  %v8237_v51 = vld [vmem:[#allocation4 + $0xc6c] ss:$16 sps:$4 sm:$0xff]  }
 0x3f4   :  { %4352 = vmatpush2.bf16.msra.mxu1 %v8274_v46  ;;  %v8235_v46 = vld [vmem:[#allocation4 + $0xc68] ss:$16 sps:$4 sm:$0xff]  }
 0x3f5   :  { %4353 = vmatprep.subr.bf16.mxu1 %v8282_v61  ;;  %v8243_v61 = vld [vmem:[#allocation4 + $0xc4c] ss:$16 sps:$4 sm:$0xff]  }
 0x3f8   :  { %4354 = vmatpush2.bf16.msra.mxu1 %v8280_v62  ;;  %v8241_v62 = vld [vmem:[#allocation4 + $0xc48] ss:$16 sps:$4 sm:$0xff]  }
 0x3f9   :  { %4355 = vmatprep.subr.bf16.mxu1 %v8288_v63  ;;  %v8249_v63 = vld [vmem:[#allocation4 + $0xc2c] ss:$16 sps:$4 sm:$0xff]  }
 0x3fc   :  { %4356 = vmatpush2.bf16.msra.mxu1 %v8286_v1 }
 0x3fd   :  { %4357 = vmatprep.subr.bf16.mxu1 %v8294_v2  ;;  %v8247_v2 = vld [vmem:[#allocation4 + $0xc28] ss:$16 sps:$4 sm:$0xff]  }
 0x400   :  { %4358 = vmatpush2.bf16.msra.mxu1 %v8292_v3  ;;  %v8255_v3 = vld [vmem:[#allocation4 + $0xc0c] ss:$16 sps:$4 sm:$0xff]  }
 0x401   :  { %4359 = vmatprep.subr.bf16.mxu1 %v8300_v4 }
 0x404   :  { %4360 = vmatpush2.bf16.msra.mxu1 %v8298_v56  ;;  %v2629_v56 = vrot.slane %v9169_v44, %v9107_v36 }
 0x405   :  { %4415 = vmatprep.subr.bf16.mxu1 %v8306_v59  ;;  %v8253_v59 = vld [vmem:[#allocation4 + $0xc08] ss:$16 sps:$4 sm:$0xff]  }
 0x407   :  { %v3312_v5 = vpop.f32.mrf.mxu0 }
 0x408   :  { %v3313_v10 = vadd.f32 %v3312_v5, %v2621_v7  ;;  %v8261_v5 = vld [vmem:[#allocation4 + $0xdec] ss:$16 sps:$4 sm:$0xff]  }
 0x409   :  { %v3314_v6 = vpop.f32.mrf.mxu0 }
 0x40a   :  { %v3315_v12 = vadd.f32 %v3314_v6, %v2625_v8  ;;  %v2633_v6 = vrot.slane %v9169_v44, %v9111_v38 }
 0x40b   :  { %v3316_v9 = vpop.f32.mrf.mxu0 }
 0x40c   :  { %v3317_v16 = vadd.f32 %v3316_v9, %v2621_v7  ;;  %v8259_v9 = vld [vmem:[#allocation4 + $0xde8] ss:$16 sps:$4 sm:$0xff]  }
 0x40d   :  { %v3318_v0 = vpop.f32.mrf.mxu0 }
 0x40e   :  { %v3319_v20 = vadd.f32 %v3318_v0, %v2625_v8 }
 0x447   :  { %v3355_v11 = vpop.f32.mrf.mxu1  ;;  %v3398_v1 = vpop.f32.mrf.mxu0 }
 0x448   :  { %v3356_v14 = vadd.f32 %v3355_v11, %v3313_v10  ;;  %v3399_v8 = vadd.f32 %v3398_v1, %v2629_v56  ;;  %v8267_v11 = vld [vmem:[#allocation4 + $0xdcc] ss:$16 sps:$4 sm:$0xff]   ;;  %v8304_v1 = vld [vmem:[#allocation4 + $0xee8] ss:$16 sps:$4 sm:$0xff]  }
 0x449   :  { %v3357_v15 = vpop.f32.mrf.mxu1  ;;  %v3400_v4 = vpop.f32.mrf.mxu0 }
 0x44a   :  { %v3450_v17 = vmul.f32 0.5, %v3356_v14  ;;  %v3358_v18 = vadd.f32 %v3357_v15, %v3315_v12  ;;  %v3401_v12 = vadd.f32 %v3400_v4, %v2633_v6  ;;  %v8307_v4 = vld [vmem:[#allocation4 + $0xec8] ss:$16 sps:$4 sm:$0xff]  }
 0x44b   :  { %v3359_v19 = vpop.f32.mrf.mxu1  ;;  %v3402_v7 = vpop.f32.mrf.mxu0 }
 0x44c   :  { %v3451_v21 = vmul.f32 0.5, %v3358_v18  ;;  %v3360_v22 = vadd.f32 %v3359_v19, %v3317_v16  ;;  %8784 = vtanh.f32 %v3450_v17  ;;  %v3403_v16 = vadd.f32 %v3402_v7, %v2629_v56  ;;  %v8265_v19 = vld [vmem:[#allocation4 + $0xdc8] ss:$16 sps:$4 sm:$0xff]   ;;  %v8312_v56 = vld [vmem:[#allocation4 + $0xeac] ss:$16 sps:$4 sm:$0xff]  }
 0x44d   :  { %v3361_v23 = vpop.f32.mrf.mxu1  ;;  %v3404_v0 = vpop.f32.mrf.mxu0  ;;  %v8354_v7 = vld [vmem:[#allocation4 + $0x10e4] ss:$16 sps:$4 sm:$0xff]  }
 0x44e   :  { %8786 = vtanh.f32 %v3451_v21  ;;  %v3454_v24 = vmul.f32 0.5, %v3360_v22  ;;  %v3362_v25 = vadd.f32 %v3361_v23, %v3319_v20  ;;  %v8273_v21 = vld [vmem:[#allocation4 + $0xdac] ss:$16 sps:$4 sm:$0xff]   ;;  %v3405_v44 = vadd.f32 %v3404_v0, %v2633_v6  ;;  %v8352_v6 = vld [vmem:[#allocation4 + $0x10e0] ss:$16 sps:$4 sm:$0xff]  }
 0x44f   :  { %v8358_v0 = vld [vmem:[#allocation4 + $0x10a0] ss:$16 sps:$4 sm:$0xff]  }
 0x450   :  { %8788 = vtanh.f32 %v3454_v24  ;;  %v3455_v26 = vmul.f32 0.5, %v3362_v25 }
 0x452   :  { %8790 = vtanh.f32 %v3455_v26 }
 0x459   :  { %v8785_v27 = vpop.eup %8784 }
 0x45a   :  { %v3466_v33 = vmul.f32 0.5, %v8785_v27  ;;  %v8271_v27 = vld [vmem:[#allocation4 + $0xda8] ss:$16 sps:$4 sm:$0xff]  }
 0x45b   :  { %v8787_v28 = vpop.eup %8786 }
 0x45c   :  { %v3467_v29 = vmul.f32 0.5, %v8787_v28  ;;  %v3474_v13 = vadd.f32 0.5, %v3466_v33  ;;  %v8279_v28 = vld [vmem:[#allocation4 + $0xd8c] ss:$16 sps:$4 sm:$0xff]  }
 0x45d   :  { %v8789_v30 = vpop.eup %8788  ;;  %v8285_v33 = vld [vmem:[#allocation4 + $0xd6c] ss:$16 sps:$4 sm:$0xff]  }
 0x45e   :  { %v3470_v34 = vmul.f32 0.5, %v8789_v30  ;;  %v3475_v40 = vadd.f32 0.5, %v3467_v29  ;;  %v3482_v52 = vmul.f32 %v3474_v13, %v3356_v14  ;;  %v8277_v30 = vld [vmem:[#allocation4 + $0xd88] ss:$16 sps:$4 sm:$0xff]   ;;  %v8297_v13 = vld [vmem:[#allocation4 + $0xd2c] ss:$16 sps:$4 sm:$0xff]  }
 0x45f   :  { %v8791_v39 = vpop.eup %8790 }
 0x460   :  { %v3478_v41 = vadd.f32 0.5, %v3470_v34  ;;  %v3471_v42 = vmul.f32 0.5, %v8791_v39  ;;  %v3483_v48 = vmul.f32 %v3475_v40, %v3358_v18  ;;  %v8283_v34 = vld [vmem:[#allocation4 + $0xd68] ss:$16 sps:$4 sm:$0xff]   ;;  %v8291_v39 = vld [vmem:[#allocation4 + $0xd4c] ss:$16 sps:$4 sm:$0xff]  }
 0x462   :  { %v3479_v43 = vadd.f32 0.5, %v3471_v42  ;;  %v3486_v47 = vmul.f32 %v3478_v41, %v3360_v22  ;;  %v8289_v41 = vld [vmem:[#allocation4 + $0xd48] ss:$16 sps:$4 sm:$0xff]  }
 0x464   :  { %v3487_v49 = vmul.f32 %v3479_v43, %v3362_v25  ;;  %v9175_v55 = vpack.c.bf16 %v3486_v47, %v3482_v52  ;;  %v8295_v52 = vld [vmem:[#allocation4 + $0xd28] ss:$16 sps:$4 sm:$0xff]  }
 0x466   :  { %v3491_v53 = vpack.c.bf16 %v3487_v49, %v3483_v48 }
 0x468   :  { %4318 = vmatprep.mubr.bf16.mxu0 %v3491_v53 }
 0x469   :  { %4319 = vmatmul.mubr.bf16.vlgmr.msra.gmra.mxu0 %v9175_v55 }
 0x46a   :  { %4373 = vmatpush1.bf16.msra.mxu0 %v8211_v54  ;;  %4404 = vmatprep.mubr.bf16.mxu0 %v3491_v53  ;;  %v8303_v54 = vld [vmem:[#allocation4 + $0xd0c] ss:$16 sps:$4 sm:$0xff]  }
 0x46b   :  { %4374 = vmatprep.subr.bf16.mxu0 %v8219_v57 }
 0x46e   :  { %4375 = vmatpush1.bf16.msra.mxu0 %v8217_v58 }
 0x46f   :  { %4376 = vmatprep.subr.bf16.mxu0 %v8225_v31 }
 0x472   :  { %4377 = vmatpush1.bf16.msra.mxu0 %v8223_v50 }
 0x473   :  { %4378 = vmatprep.subr.bf16.mxu0 %v8231_v60 }
 0x476   :  { %4379 = vmatpush1.bf16.msra.mxu0 %v8229_v45  ;;  %v8301_v45 = vld [vmem:[#allocation4 + $0xd08] ss:$16 sps:$4 sm:$0xff]  }
 0x477   :  { %4380 = vmatprep.subr.bf16.mxu0 %v8237_v51 }
 0x47a   :  { %4381 = vmatpush1.bf16.msra.mxu0 %v8235_v46 }
 0x47b   :  { %4382 = vmatprep.subr.bf16.mxu0 %v8243_v61 }
 0x47e   :  { %4383 = vmatpush1.bf16.msra.mxu0 %v8241_v62 }
 0x47f   :  { %4384 = vmatprep.subr.bf16.mxu0 %v8249_v63 }
 0x482   :  { %4385 = vmatpush1.bf16.msra.mxu0 %v8247_v2 }
 0x483   :  { %4386 = vmatprep.subr.bf16.mxu0 %v8255_v3  ;;  %v8309_v3 = vld [vmem:[#allocation4 + $0xecc] ss:$16 sps:$4 sm:$0xff]  }
 0x486   :  { %4387 = vmatpush1.bf16.msra.mxu0 %v8253_v59  ;;  %v8310_v59 = vld [vmem:[#allocation4 + $0xea8] ss:$16 sps:$4 sm:$0xff]  }
 0x487   :  { %v3441_v10 = vpop.f32.mrf.mxu1  ;;  %4388 = vmatprep.subr.bf16.mxu0 %v8261_v5  ;;  %v8315_v5 = vld [vmem:[#allocation4 + $0xe8c] ss:$16 sps:$4 sm:$0xff]  }
 0x488   :  { %v3442_v14 = vadd.f32 %v3441_v10, %v3399_v8  ;;  %v8357_v8 = vld [vmem:[#allocation4 + $0x10c4] ss:$16 sps:$4 sm:$0xff]   ;;  %v8318_v10 = vld [vmem:[#allocation4 + $0xe6c] ss:$16 sps:$4 sm:$0xff]  }
 0x489   :  { %v3443_v15 = vpop.f32.mrf.mxu1 }
 0x48a   :  { %v3452_v17 = vmul.f32 0.5, %v3442_v14  ;;  %v3444_v18 = vadd.f32 %v3443_v15, %v3401_v12  ;;  %4389 = vmatpush2.bf16.msra.mxu0 %v8259_v9  ;;  %v8313_v9 = vld [vmem:[#allocation4 + $0xe88] ss:$16 sps:$4 sm:$0xff]   ;;  %v8363_v15 = vld [vmem:[#allocation4 + $0x1084] ss:$16 sps:$4 sm:$0xff]  }
 0x48b   :  { %v3445_v20 = vpop.f32.mrf.mxu1  ;;  %4390 = vmatprep.subr.bf16.mxu0 %v8267_v11  ;;  %v8355_v11 = vld [vmem:[#allocation4 + $0x10c0] ss:$16 sps:$4 sm:$0xff]   ;;  %v8316_v12 = vld [vmem:[#allocation4 + $0xe68] ss:$16 sps:$4 sm:$0xff]  }
 0x48c   :  { %v3453_v22 = vmul.f32 0.5, %v3444_v18  ;;  %v3446_v23 = vadd.f32 %v3445_v20, %v3403_v16  ;;  %8792 = vtanh.f32 %v3452_v17  ;;  %v8319_v16 = vld [vmem:[#allocation4 + $0xe48] ss:$16 sps:$4 sm:$0xff]   ;;  %v8324_v17 = vld [vmem:[#allocation4 + $0xe2c] ss:$16 sps:$4 sm:$0xff]  }
 0x48d   :  { %v3447_v24 = vpop.f32.mrf.mxu1  ;;  %v8322_v20 = vld [vmem:[#allocation4 + $0xe28] ss:$16 sps:$4 sm:$0xff]  }
 0x48e   :  { %8794 = vtanh.f32 %v3453_v22  ;;  %v3456_v25 = vmul.f32 0.5, %v3446_v23  ;;  %v3448_v26 = vadd.f32 %v3447_v24, %v3405_v44  ;;  %4391 = vmatpush2.bf16.msra.mxu0 %v8265_v19  ;;  %v8366_v19 = vld [vmem:[#allocation4 + $0x1064] ss:$16 sps:$4 sm:$0xff]   ;;  %v8364_v44 = vld [vmem:[#allocation4 + $0x1060] ss:$16 sps:$4 sm:$0xff]  }
 0x48f   :  { %4392 = vmatprep.subr.bf16.mxu0 %v8273_v21  ;;  %v8327_v21 = vld [vmem:[#allocation4 + $0xe0c] ss:$16 sps:$4 sm:$0xff]   ;;  %v8369_v22 = vld [vmem:[#allocation4 + $0x1044] ss:$16 sps:$4 sm:$0xff]  }
 0x490   :  { %8796 = vtanh.f32 %v3456_v25  ;;  %v3457_v29 = vmul.f32 0.5, %v3448_v26  ;;  %v8330_v24 = vld [vmem:[#allocation4 + $0xfec] ss:$16 sps:$4 sm:$0xff]   ;;  %v8367_v25 = vld [vmem:[#allocation4 + $0x1040] ss:$16 sps:$4 sm:$0xff]  }
 0x492   :  { %8798 = vtanh.f32 %v3457_v29  ;;  %4393 = vmatpush2.bf16.msra.mxu0 %v8271_v27  ;;  %v8328_v27 = vld [vmem:[#allocation4 + $0xfe8] ss:$16 sps:$4 sm:$0xff]   ;;  %v8370_v29 = vld [vmem:[#allocation4 + $0x1020] ss:$16 sps:$4 sm:$0xff]  }
 0x493   :  { %4394 = vmatprep.subr.bf16.mxu0 %v8279_v28  ;;  %v8333_v28 = vld [vmem:[#allocation4 + $0xfcc] ss:$16 sps:$4 sm:$0xff]  }
 0x496   :  { %4395 = vmatpush2.bf16.msra.mxu0 %v8277_v30  ;;  %v8375_v30 = vld [vmem:[#allocation4 + $0x1004] ss:$16 sps:$4 sm:$0xff]  }
 0x497   :  { %4396 = vmatprep.subr.bf16.mxu0 %v8285_v33  ;;  %v8331_v33 = vld [vmem:[#allocation4 + $0xfc8] ss:$16 sps:$4 sm:$0xff]  }
 0x499   :  { %v8793_v40 = vpop.eup %8792 }
 0x49a   :  { %4397 = vmatpush2.bf16.msra.mxu0 %v8283_v34  ;;  %v3468_v48 = vmul.f32 0.5, %v8793_v40  ;;  %v8336_v34 = vld [vmem:[#allocation4 + $0xfac] ss:$16 sps:$4 sm:$0xff]   ;;  %v8334_v40 = vld [vmem:[#allocation4 + $0xfa8] ss:$16 sps:$4 sm:$0xff]  }
 0x49b   :  { %v8795_v42 = vpop.eup %8794  ;;  %4398 = vmatprep.subr.bf16.mxu0 %v8291_v39  ;;  %v8373_v39 = vld [vmem:[#allocation4 + $0x1000] ss:$16 sps:$4 sm:$0xff]  }
 0x49c   :  { %v3469_v43 = vmul.f32 0.5, %v8795_v42  ;;  %v3476_v50 = vadd.f32 0.5, %v3468_v48  ;;  %v8337_v42 = vld [vmem:[#allocation4 + $0xf88] ss:$16 sps:$4 sm:$0xff]  }
 0x49d   :  { %v8797_v47 = vpop.eup %8796  ;;  %v8343_v48 = vld [vmem:[#allocation4 + $0xf48] ss:$16 sps:$4 sm:$0xff]  }
 0x49e   :  { %v3472_v49 = vmul.f32 0.5, %v8797_v47  ;;  %4399 = vmatpush2.bf16.msra.mxu0 %v8289_v41  ;;  %v3477_v57 = vadd.f32 0.5, %v3469_v43  ;;  %v3484_v62 = vmul.f32 %v3476_v50, %v3442_v14  ;;  %v8321_v14 = vld [vmem:[#allocation4 + $0xe4c] ss:$16 sps:$4 sm:$0xff]   ;;  %v8340_v43 = vld [vmem:[#allocation4 + $0xf68] ss:$16 sps:$4 sm:$0xff]  }
 0x49f   :  { %v8799_v53 = vpop.eup %8798  ;;  %4400 = vmatprep.subr.bf16.mxu0 %v8297_v13  ;;  %v8339_v41 = vld [vmem:[#allocation4 + $0xf8c] ss:$16 sps:$4 sm:$0xff]   ;;  %v8379_v50 = vld [vmem:[#allocation4 + $0x11c0] ss:$16 sps:$4 sm:$0xff]  }
 0x4a0   :  { %v3480_v58 = vadd.f32 0.5, %v3472_v49  ;;  %v3473_v31 = vmul.f32 0.5, %v8799_v53  ;;  %v3485_v46 = vmul.f32 %v3477_v57, %v3444_v18  ;;  %v8361_v18 = vld [vmem:[#allocation4 + $0x1080] ss:$16 sps:$4 sm:$0xff]   ;;  %v8342_v13 = vld [vmem:[#allocation4 + $0xf6c] ss:$16 sps:$4 sm:$0xff]  }
 0x4a1   :  { %v8345_v47 = vld [vmem:[#allocation4 + $0xf4c] ss:$16 sps:$4 sm:$0xff]   ;;  %v8378_v57 = vld [vmem:[#allocation4 + $0x11e4] ss:$16 sps:$4 sm:$0xff]  }
 0x4a2   :  { %v3481_v60 = vadd.f32 0.5, %v3473_v31  ;;  %4401 = vmatpush2.bf16.msra.mxu0 %v8295_v52  ;;  %v3488_v51 = vmul.f32 %v3480_v58, %v3446_v23  ;;  %v8325_v23 = vld [vmem:[#allocation4 + $0xe08] ss:$16 sps:$4 sm:$0xff]   ;;  %v8348_v49 = vld [vmem:[#allocation4 + $0xf2c] ss:$16 sps:$4 sm:$0xff]  }
 0x4a3   :  { %4402 = vmatprep.subr.bf16.mxu0 %v8303_v54  ;;  %v8346_v52 = vld [vmem:[#allocation4 + $0xf28] ss:$16 sps:$4 sm:$0xff]   ;;  %v8351_v53 = vld [vmem:[#allocation4 + $0xf0c] ss:$16 sps:$4 sm:$0xff]   ;;  %v8376_v58 = vld [vmem:[#allocation4 + $0x11e0] ss:$16 sps:$4 sm:$0xff]  }
 0x4a4   :  { %v3489_v61 = vmul.f32 %v3481_v60, %v3448_v26  ;;  %v9182_v2 = vpack.c.bf16 %v3488_v51, %v3484_v62  ;;  %v8372_v26 = vld [vmem:[#allocation4 + $0x1024] ss:$16 sps:$4 sm:$0xff]   ;;  %v8349_v54 = vld [vmem:[#allocation4 + $0xf08] ss:$16 sps:$4 sm:$0xff]   ;;  %v8388_v62 = vld [vmem:[#allocation4 + $0x1160] ss:$16 sps:$4 sm:$0xff]  }
 0x4a5   :  { %v8381_v31 = vld [vmem:[#allocation4 + $0x11c4] ss:$16 sps:$4 sm:$0xff]  }
 0x4a6   :  { %4403 = vmatpush2.bf16.msra.mxu0 %v8301_v45  ;;  %v3493_v63 = vpack.c.bf16 %v3489_v61, %v3485_v46  ;;  %v8384_v60 = vld [vmem:[#allocation4 + $0x11a4] ss:$16 sps:$4 sm:$0xff]   ;;  %v8382_v45 = vld [vmem:[#allocation4 + $0x11a0] ss:$16 sps:$4 sm:$0xff]  }
 0x4a7   :  { %5294 = vmatprep.subr.bf16.mxu0 %v8354_v7  ;;  %v8387_v51 = vld [vmem:[#allocation4 + $0x1184] ss:$16 sps:$4 sm:$0xff]   ;;  %v8385_v46 = vld [vmem:[#allocation4 + $0x1180] ss:$16 sps:$4 sm:$0xff]  }
 0x4a8   :  { %4361 = vmatprep.mubr.bf16.mxu1 %v3493_v63  ;;  %v8390_v61 = vld [vmem:[#allocation4 + $0x1164] ss:$16 sps:$4 sm:$0xff]   ;;  %v8406_v7 = vld [vmem:[#allocation4 + $0x12c0] ss:$16 sps:$4 sm:$0xff]  }
 0x4a9   :  { %4362 = vmatmul.mubr.bf16.vlgmr.msra.gmra.mxu1 %v9182_v2  ;;  %4405 = vmatmul.mubr.bf16.vlgmr.msra.gmra.mxu0 %v9175_v55  ;;  %v8360_v55 = vld [vmem:[#allocation4 + $0x10a4] ss:$16 sps:$4 sm:$0xff]  }
 0x4aa   :  { %4416 = vmatpush1.bf16.msra.mxu1 %v8304_v1  ;;  %4447 = vmatprep.mubr.bf16.mxu1 %v3493_v63  ;;  %v8393_v63 = vld [vmem:[#allocation4 + $0x1144] ss:$16 sps:$4 sm:$0xff]   ;;  %v8391_v1 = vld [vmem:[#allocation4 + $0x1140] ss:$16 sps:$4 sm:$0xff]  }
 0x4ab   :  { %4417 = vmatprep.subr.bf16.mxu1 %v8309_v3  ;;  %5295 = vmatpush1.bf16.msra.mxu0 %v8352_v6  ;;  %v8394_v3 = vld [vmem:[#allocation4 + $0x1120] ss:$16 sps:$4 sm:$0xff]   ;;  %v8405_v6 = vld [vmem:[#allocation4 + $0x10ec] ss:$16 sps:$4 sm:$0xff]  }
 0x4ac   :  { %5296 = vmatprep.subr.bf16.mxu0 %v8357_v8  ;;  %v8408_v8 = vld [vmem:[#allocation4 + $0x12c4] ss:$16 sps:$4 sm:$0xff]  }
 0x4ae   :  { %4418 = vmatpush1.bf16.msra.mxu1 %v8307_v4  ;;  %v8399_v4 = vld [vmem:[#allocation4 + $0x1104] ss:$16 sps:$4 sm:$0xff]  }
 0x4af   :  { %4419 = vmatprep.subr.bf16.mxu1 %v8312_v56  ;;  %5297 = vmatpush1.bf16.msra.mxu0 %v8355_v11  ;;  %v8397_v56 = vld [vmem:[#allocation4 + $0x1100] ss:$16 sps:$4 sm:$0xff]  }
 0x4b0   :  { %5298 = vmatprep.subr.bf16.mxu0 %v8360_v55  ;;  %v8418_v11 = vld [vmem:[#allocation4 + $0x1280] ss:$16 sps:$4 sm:$0xff]   ;;  %v8420_v55 = vld [vmem:[#allocation4 + $0x1284] ss:$16 sps:$4 sm:$0xff]  }
 0x4b2   :  { %4420 = vmatpush1.bf16.msra.mxu1 %v8310_v59  ;;  %v8400_v59 = vld [vmem:[#allocation4 + $0x12e0] ss:$16 sps:$4 sm:$0xff]  }
 0x4b3   :  { %4421 = vmatprep.subr.bf16.mxu1 %v8315_v5  ;;  %5299 = vmatpush1.bf16.msra.mxu0 %v8358_v0  ;;  %v8402_v5 = vld [vmem:[#allocation4 + $0x12e4] ss:$16 sps:$4 sm:$0xff]   ;;  %v8430_v0 = vld [vmem:[#allocation4 + $0x1240] ss:$16 sps:$4 sm:$0xff]  }
 0x4b4   :  { %5300 = vmatprep.subr.bf16.mxu0 %v8363_v15  ;;  %v8432_v15 = vld [vmem:[#allocation4 + $0x1244] ss:$16 sps:$4 sm:$0xff]  }
 0x4b6   :  { %4422 = vmatpush1.bf16.msra.mxu1 %v8313_v9  ;;  %v8412_v9 = vld [vmem:[#allocation4 + $0x12a0] ss:$16 sps:$4 sm:$0xff]  }
 0x4b7   :  { %4423 = vmatprep.subr.bf16.mxu1 %v8318_v10  ;;  %5301 = vmatpush1.bf16.msra.mxu0 %v8361_v18  ;;  %v8414_v10 = vld [vmem:[#allocation4 + $0x12a4] ss:$16 sps:$4 sm:$0xff]   ;;  %v8442_v18 = vld [vmem:[#allocation4 + $0x1200] ss:$16 sps:$4 sm:$0xff]  }
 0x4b8   :  { %5302 = vmatprep.subr.bf16.mxu0 %v8366_v19  ;;  %v8444_v19 = vld [vmem:[#allocation4 + $0x1204] ss:$16 sps:$4 sm:$0xff]  }
 0x4ba   :  { %4424 = vmatpush1.bf16.msra.mxu1 %v8316_v12  ;;  %v8424_v12 = vld [vmem:[#allocation4 + $0x1260] ss:$16 sps:$4 sm:$0xff]  }
 0x4bb   :  { %4425 = vmatprep.subr.bf16.mxu1 %v8321_v14  ;;  %5303 = vmatpush1.bf16.msra.mxu0 %v8364_v44  ;;  %v8426_v14 = vld [vmem:[#allocation4 + $0x1264] ss:$16 sps:$4 sm:$0xff]  }
 0x4bc   :  { %5304 = vmatprep.subr.bf16.mxu0 %v8369_v22  ;;  %v8456_v44 = vld [vmem:[#allocation4 + $0x13c4] ss:$16 sps:$4 sm:$0xff]   ;;  %v8454_v22 = vld [vmem:[#allocation4 + $0x13c0] ss:$16 sps:$4 sm:$0xff]  }
 0x4be   :  { %4426 = vmatpush1.bf16.msra.mxu1 %v8319_v16  ;;  %v8436_v16 = vld [vmem:[#allocation4 + $0x1220] ss:$16 sps:$4 sm:$0xff]  }
 0x4bf   :  { %4427 = vmatprep.subr.bf16.mxu1 %v8324_v17  ;;  %5305 = vmatpush1.bf16.msra.mxu0 %v8367_v25  ;;  %v8438_v17 = vld [vmem:[#allocation4 + $0x1224] ss:$16 sps:$4 sm:$0xff]  }
 0x4c0   :  { %5306 = vmatprep.subr.bf16.mxu0 %v8372_v26  ;;  %v8468_v25 = vld [vmem:[#allocation4 + $0x1384] ss:$16 sps:$4 sm:$0xff]   ;;  %v8466_v26 = vld [vmem:[#allocation4 + $0x1380] ss:$16 sps:$4 sm:$0xff]  }
 0x4c2   :  { %4428 = vmatpush1.bf16.msra.mxu1 %v8322_v20  ;;  %v8450_v20 = vld [vmem:[#allocation4 + $0x13e4] ss:$16 sps:$4 sm:$0xff]  }
 0x4c3   :  { %4429 = vmatprep.subr.bf16.mxu1 %v8327_v21  ;;  %5307 = vmatpush1.bf16.msra.mxu0 %v8370_v29  ;;  %v8448_v21 = vld [vmem:[#allocation4 + $0x13e0] ss:$16 sps:$4 sm:$0xff]   ;;  %v8480_v29 = vld [vmem:[#allocation4 + $0x1344] ss:$16 sps:$4 sm:$0xff]  }
 0x4c4   :  { %5308 = vmatprep.subr.bf16.mxu0 %v8375_v30  ;;  %v8478_v30 = vld [vmem:[#allocation4 + $0x1340] ss:$16 sps:$4 sm:$0xff]  }
 0x4c6   :  { %4430 = vmatpush1.bf16.msra.mxu1 %v8325_v23  ;;  %v8462_v23 = vld [vmem:[#allocation4 + $0x13a4] ss:$16 sps:$4 sm:$0xff]  }
 0x4c7   :  { %4431 = vmatprep.subr.bf16.mxu1 %v8330_v24  ;;  %5309 = vmatpush1.bf16.msra.mxu0 %v8373_v39  ;;  %v8460_v24 = vld [vmem:[#allocation4 + $0x13a0] ss:$16 sps:$4 sm:$0xff]   ;;  %v8492_v39 = vld [vmem:[#allocation4 + $0x1304] ss:$16 sps:$4 sm:$0xff]  }
 0x4c8   :  { %5310 = vmatprep.subr.bf16.mxu0 %v8378_v57 }
 0x4ca   :  { %4432 = vmatpush2.bf16.msra.mxu1 %v8328_v27  ;;  %v8474_v27 = vld [vmem:[#allocation4 + $0x1364] ss:$16 sps:$4 sm:$0xff]  }
 0x4cb   :  { %4433 = vmatprep.subr.bf16.mxu1 %v8333_v28  ;;  %5311 = vmatpush2.bf16.msra.mxu0 %v8376_v58  ;;  %v8472_v28 = vld [vmem:[#allocation4 + $0x1360] ss:$16 sps:$4 sm:$0xff]  }
 0x4cc   :  { %5312 = vmatprep.subr.bf16.mxu0 %v8381_v31 }
 0x4ce   :  { %4434 = vmatpush2.bf16.msra.mxu1 %v8331_v33  ;;  %v8486_v33 = vld [vmem:[#allocation4 + $0x1324] ss:$16 sps:$4 sm:$0xff]  }
 0x4cf   :  { %4435 = vmatprep.subr.bf16.mxu1 %v8336_v34  ;;  %5313 = vmatpush2.bf16.msra.mxu0 %v8379_v50  ;;  %v8484_v34 = vld [vmem:[#allocation4 + $0x1320] ss:$16 sps:$4 sm:$0xff]  }
 0x4d0   :  { %5314 = vmatprep.subr.bf16.mxu0 %v8384_v60 }
 0x4d2   :  { %4436 = vmatpush2.bf16.msra.mxu1 %v8334_v40  ;;  %v8490_v40 = vld [vmem:[#allocation4 + $0x1300] ss:$16 sps:$4 sm:$0xff]  }
 0x4d3   :  { %4437 = vmatprep.subr.bf16.mxu1 %v8339_v41  ;;  %5315 = vmatpush2.bf16.msra.mxu0 %v8382_v45  ;;  %v8498_v41 = vld [vmem:[#allocation4 + $0x12ec] ss:$16 sps:$4 sm:$0xff]  }
 0x4d4   :  { %5316 = vmatprep.subr.bf16.mxu0 %v8387_v51 }
 0x4d6   :  { %4438 = vmatpush2.bf16.msra.mxu1 %v8337_v42 }
 0x4d7   :  { %4439 = vmatprep.subr.bf16.mxu1 %v8342_v13  ;;  %5317 = vmatpush2.bf16.msra.mxu0 %v8385_v46  ;;  %v9187_v13 = vld [vmem:[#allocation6 + $0x3] ss:$8 sm:$0xf] }
 0x4d8   :  { %5318 = vmatprep.subr.bf16.mxu0 %v8390_v61 }
 0x4da   :  { %4440 = vmatpush2.bf16.msra.mxu1 %v8340_v43 }
 0x4db   :  { %4441 = vmatprep.subr.bf16.mxu1 %v8345_v47  ;;  %5319 = vmatpush2.bf16.msra.mxu0 %v8388_v62  ;;  %v3629_v47 = vrot.slane %v9187_v13, %v9105_v35 }
 0x4dc   :  { %5320 = vmatprep.subr.bf16.mxu0 %v8393_v63 }
 0x4de   :  { %4442 = vmatpush2.bf16.msra.mxu1 %v8343_v48  ;;  %v3633_v48 = vrot.slane %v9187_v13, %v9109_v37 }
 0x4df   :  { %4443 = vmatprep.subr.bf16.mxu1 %v8348_v49  ;;  %5321 = vmatpush2.bf16.msra.mxu0 %v8391_v1 }
 0x4e2   :  { %4444 = vmatpush2.bf16.msra.mxu1 %v8346_v52 }
 0x4e3   :  { %4445 = vmatprep.subr.bf16.mxu1 %v8351_v53 }
 0x4e6   :  { %4446 = vmatpush2.bf16.msra.mxu1 %v8349_v54 }
 0x4e7   :  { %5337 = vmatprep.subr.bf16.mxu1 %v8402_v5 }
 0x4e9   :  { %4448 = vmatmul.mubr.bf16.vlgmr.msra.gmra.mxu1 %v9182_v2  ;;  %v8396_v2 = vld [vmem:[#allocation4 + $0x1124] ss:$16 sps:$4 sm:$0xff]  }
 0x4ea   :  { %5322 = vmatprep.subr.bf16.mxu0 %v8396_v2  ;;  %5338 = vmatpush1.bf16.msra.mxu1 %v8400_v59 }
 0x4eb   :  { %5323 = vmatpush2.bf16.msra.mxu0 %v8394_v3  ;;  %5339 = vmatprep.subr.bf16.mxu1 %v8408_v8 }
 0x4ec   :  { %5324 = vmatprep.subr.bf16.mxu0 %v8399_v4 }
 0x4ee   :  { %5340 = vmatpush1.bf16.msra.mxu1 %v8406_v7 }
 0x4ef   :  { %5325 = vmatpush2.bf16.msra.mxu0 %v8397_v56  ;;  %5341 = vmatprep.subr.bf16.mxu1 %v8414_v10 }
 0x4f0   :  { %5380 = vmatprep.subr.bf16.mxu0 %v8405_v6 }
 0x4f2   :  { %5342 = vmatpush1.bf16.msra.mxu1 %v8412_v9 }
 0x4f3   :  { %5343 = vmatprep.subr.bf16.mxu1 %v8420_v55 }
 0x4f6   :  { %5344 = vmatpush1.bf16.msra.mxu1 %v8418_v11 }
 0x4f7   :  { %5345 = vmatprep.subr.bf16.mxu1 %v8426_v14 }
 0x4fa   :  { %5346 = vmatpush1.bf16.msra.mxu1 %v8424_v12 }
 0x4fb   :  { %5347 = vmatprep.subr.bf16.mxu1 %v8432_v15 }
 0x4fe   :  { %5348 = vmatpush1.bf16.msra.mxu1 %v8430_v0 }
 0x4ff   :  { %5349 = vmatprep.subr.bf16.mxu1 %v8438_v17 }
 0x502   :  { %5350 = vmatpush1.bf16.msra.mxu1 %v8436_v16 }
 0x503   :  { %5351 = vmatprep.subr.bf16.mxu1 %v8444_v19 }
 0x506   :  { %5352 = vmatpush1.bf16.msra.mxu1 %v8442_v18  ;;  %v8403_v18 = vld [vmem:[#allocation4 + $0x10e8] ss:$16 sps:$4 sm:$0xff]  }
 0x507   :  { %5353 = vmatprep.subr.bf16.mxu1 %v8450_v20  ;;  %v8411_v20 = vld [vmem:[#allocation4 + $0x10cc] ss:$16 sps:$4 sm:$0xff]  }
 0x50a   :  { %5354 = vmatpush2.bf16.msra.mxu1 %v8448_v21  ;;  %v8409_v21 = vld [vmem:[#allocation4 + $0x10c8] ss:$16 sps:$4 sm:$0xff]  }
 0x50b   :  { %5355 = vmatprep.subr.bf16.mxu1 %v8456_v44  ;;  %v8417_v44 = vld [vmem:[#allocation4 + $0x10ac] ss:$16 sps:$4 sm:$0xff]  }
 0x50e   :  { %5356 = vmatpush2.bf16.msra.mxu1 %v8454_v22  ;;  %v8415_v22 = vld [vmem:[#allocation4 + $0x10a8] ss:$16 sps:$4 sm:$0xff]  }
 0x50f   :  { %5357 = vmatprep.subr.bf16.mxu1 %v8462_v23  ;;  %v8423_v23 = vld [vmem:[#allocation4 + $0x108c] ss:$16 sps:$4 sm:$0xff]  }
 0x512   :  { %5358 = vmatpush2.bf16.msra.mxu1 %v8460_v24  ;;  %v8421_v24 = vld [vmem:[#allocation4 + $0x1088] ss:$16 sps:$4 sm:$0xff]  }
 0x513   :  { %5359 = vmatprep.subr.bf16.mxu1 %v8468_v25  ;;  %v8429_v25 = vld [vmem:[#allocation4 + $0x106c] ss:$16 sps:$4 sm:$0xff]  }
 0x516   :  { %5360 = vmatpush2.bf16.msra.mxu1 %v8466_v26  ;;  %v8427_v26 = vld [vmem:[#allocation4 + $0x1068] ss:$16 sps:$4 sm:$0xff]  }
 0x517   :  { %5361 = vmatprep.subr.bf16.mxu1 %v8474_v27  ;;  %v8435_v27 = vld [vmem:[#allocation4 + $0x104c] ss:$16 sps:$4 sm:$0xff]  }
 0x51a   :  { %5362 = vmatpush2.bf16.msra.mxu1 %v8472_v28  ;;  %v8433_v28 = vld [vmem:[#allocation4 + $0x1048] ss:$16 sps:$4 sm:$0xff]  }
 0x51b   :  { %5363 = vmatprep.subr.bf16.mxu1 %v8480_v29  ;;  %v8441_v29 = vld [vmem:[#allocation4 + $0x102c] ss:$16 sps:$4 sm:$0xff]  }
 0x51e   :  { %5364 = vmatpush2.bf16.msra.mxu1 %v8478_v30 }
 0x51f   :  { %5365 = vmatprep.subr.bf16.mxu1 %v8486_v33  ;;  %v8439_v33 = vld [vmem:[#allocation4 + $0x1028] ss:$16 sps:$4 sm:$0xff]  }
 0x522   :  { %5366 = vmatpush2.bf16.msra.mxu1 %v8484_v34  ;;  %v8447_v34 = vld [vmem:[#allocation4 + $0x100c] ss:$16 sps:$4 sm:$0xff]  }
 0x523   :  { %5367 = vmatprep.subr.bf16.mxu1 %v8492_v39 }
 0x526   :  { %5368 = vmatpush2.bf16.msra.mxu1 %v8490_v40  ;;  %v3637_v40 = vrot.slane %v9187_v13, %v9107_v36 }
 0x527   :  { %5423 = vmatprep.subr.bf16.mxu1 %v8498_v41  ;;  %v8445_v41 = vld [vmem:[#allocation4 + $0x1008] ss:$16 sps:$4 sm:$0xff]  }
 0x529   :  { %v4320_v42 = vpop.f32.mrf.mxu0 }
 0x52a   :  { %v4321_v52 = vadd.f32 %v4320_v42, %v3629_v47  ;;  %v8453_v42 = vld [vmem:[#allocation4 + $0x11ec] ss:$16 sps:$4 sm:$0xff]  }
 0x52b   :  { %v4322_v43 = vpop.f32.mrf.mxu0 }
 0x52c   :  { %v4323_v54 = vadd.f32 %v4322_v43, %v3633_v48  ;;  %v3641_v43 = vrot.slane %v9187_v13, %v9111_v38 }
 0x52d   :  { %v4324_v49 = vpop.f32.mrf.mxu0 }
 0x52e   :  { %v4325_v50 = vadd.f32 %v4324_v49, %v3629_v47  ;;  %v8451_v49 = vld [vmem:[#allocation4 + $0x11e8] ss:$16 sps:$4 sm:$0xff]  }
 0x52f   :  { %v4326_v58 = vpop.f32.mrf.mxu0 }
 0x530   :  { %v4327_v46 = vadd.f32 %v4326_v58, %v3633_v48 }
 0x569   :  { %v4363_v53 = vpop.f32.mrf.mxu1  ;;  %v4406_v30 = vpop.f32.mrf.mxu0 }
 0x56a   :  { %v4364_v57 = vadd.f32 %v4363_v53, %v4321_v52  ;;  %v4407_v48 = vadd.f32 %v4406_v30, %v3637_v40  ;;  %v8459_v53 = vld [vmem:[#allocation4 + $0x11cc] ss:$16 sps:$4 sm:$0xff]   ;;  %v8496_v30 = vld [vmem:[#allocation4 + $0x12e8] ss:$16 sps:$4 sm:$0xff]  }
 0x56b   :  { %v4365_v31 = vpop.f32.mrf.mxu1  ;;  %v4408_v39 = vpop.f32.mrf.mxu0 }
 0x56c   :  { %v4458_v60 = vmul.f32 0.5, %v4364_v57  ;;  %v4366_v45 = vadd.f32 %v4365_v31, %v4323_v54  ;;  %v4409_v54 = vadd.f32 %v4408_v39, %v3641_v43  ;;  %v8499_v39 = vld [vmem:[#allocation4 + $0x12c8] ss:$16 sps:$4 sm:$0xff]  }
 0x56d   :  { %v4367_v51 = vpop.f32.mrf.mxu1  ;;  %v4410_v47 = vpop.f32.mrf.mxu0 }
 0x56e   :  { %v4459_v61 = vmul.f32 0.5, %v4366_v45  ;;  %v4368_v62 = vadd.f32 %v4367_v51, %v4325_v50  ;;  %8800 = vtanh.f32 %v4458_v60  ;;  %v4411_v50 = vadd.f32 %v4410_v47, %v3637_v40  ;;  %v8457_v51 = vld [vmem:[#allocation4 + $0x11c8] ss:$16 sps:$4 sm:$0xff]   ;;  %v8504_v40 = vld [vmem:[#allocation4 + $0x12ac] ss:$16 sps:$4 sm:$0xff]  }
 0x56f   :  { %v4369_v63 = vpop.f32.mrf.mxu1  ;;  %v4412_v58 = vpop.f32.mrf.mxu0  ;;  %v8546_v47 = vld [vmem:[#allocation7 + $0x74] ss:$8 sps:$4 sm:$0xff]  }
 0x570   :  { %8802 = vtanh.f32 %v4459_v61  ;;  %v4462_v1 = vmul.f32 0.5, %v4368_v62  ;;  %v4370_v2 = vadd.f32 %v4369_v63, %v4327_v46  ;;  %v8465_v61 = vld [vmem:[#allocation4 + $0x11ac] ss:$16 sps:$4 sm:$0xff]   ;;  %v4413_v13 = vadd.f32 %v4412_v58, %v3641_v43  ;;  %v8544_v43 = vld [vmem:[#allocation7 + $0x70] ss:$8 sps:$4 sm:$0xff]  }
 0x571   :  { %v8550_v58 = vld [vmem:[#allocation7 + $0x50] ss:$8 sps:$4 sm:$0xff]  }
 0x572   :  { %8804 = vtanh.f32 %v4462_v1  ;;  %v4463_v3 = vmul.f32 0.5, %v4370_v2 }
 0x574   :  { %8806 = vtanh.f32 %v4463_v3 }
 0x57b   :  { %v8801_v4 = vpop.eup %8800 }
 0x57c   :  { %v4474_v6 = vmul.f32 0.5, %v8801_v4  ;;  %v8463_v4 = vld [vmem:[#allocation4 + $0x11a8] ss:$16 sps:$4 sm:$0xff]  }
 0x57d   :  { %v8803_v56 = vpop.eup %8802 }
 0x57e   :  { %v4475_v59 = vmul.f32 0.5, %v8803_v56  ;;  %v4482_v55 = vadd.f32 0.5, %v4474_v6  ;;  %v8471_v56 = vld [vmem:[#allocation4 + $0x118c] ss:$16 sps:$4 sm:$0xff]  }
 0x57f   :  { %v8805_v5 = vpop.eup %8804  ;;  %v8477_v6 = vld [vmem:[#allocation4 + $0x116c] ss:$16 sps:$4 sm:$0xff]  }
 0x580   :  { %v4478_v7 = vmul.f32 0.5, %v8805_v5  ;;  %v4483_v9 = vadd.f32 0.5, %v4475_v59  ;;  %v4490_v16 = vmul.f32 %v4482_v55, %v4364_v57  ;;  %v8469_v5 = vld [vmem:[#allocation4 + $0x1188] ss:$16 sps:$4 sm:$0xff]   ;;  %v8489_v55 = vld [vmem:[#allocation4 + $0x112c] ss:$16 sps:$4 sm:$0xff]  }
 0x581   :  { %v8807_v8 = vpop.eup %8806 }
 0x582   :  { %v4486_v10 = vadd.f32 0.5, %v4478_v7  ;;  %v4479_v11 = vmul.f32 0.5, %v8807_v8  ;;  %v4491_v0 = vmul.f32 %v4483_v9, %v4366_v45  ;;  %v8475_v7 = vld [vmem:[#allocation4 + $0x1168] ss:$16 sps:$4 sm:$0xff]   ;;  %v8483_v8 = vld [vmem:[#allocation4 + $0x114c] ss:$16 sps:$4 sm:$0xff]  }
 0x584   :  { %v4487_v12 = vadd.f32 0.5, %v4479_v11  ;;  %v4494_v14 = vmul.f32 %v4486_v10, %v4368_v62  ;;  %v8481_v10 = vld [vmem:[#allocation4 + $0x1148] ss:$16 sps:$4 sm:$0xff]  }
 0x586   :  { %v4495_v15 = vmul.f32 %v4487_v12, %v4370_v2  ;;  %v9193_v19 = vpack.c.bf16 %v4494_v14, %v4490_v16  ;;  %v8487_v16 = vld [vmem:[#allocation4 + $0x1128] ss:$16 sps:$4 sm:$0xff]  }
 0x588   :  { %v4499_v17 = vpack.c.bf16 %v4495_v15, %v4491_v0 }
 0x58a   :  { %5326 = vmatprep.mubr.bf16.mxu0 %v4499_v17 }
 0x58b   :  { %5327 = vmatmul.mubr.bf16.vlgmr.msra.gmra.mxu0 %v9193_v19 }
 0x58c   :  { %5381 = vmatpush1.bf16.msra.mxu0 %v8403_v18  ;;  %5412 = vmatprep.mubr.bf16.mxu0 %v4499_v17  ;;  %v8495_v18 = vld [vmem:[#allocation4 + $0x110c] ss:$16 sps:$4 sm:$0xff]  }
 0x58d   :  { %5382 = vmatprep.subr.bf16.mxu0 %v8411_v20 }
 0x590   :  { %5383 = vmatpush1.bf16.msra.mxu0 %v8409_v21 }
 0x591   :  { %5384 = vmatprep.subr.bf16.mxu0 %v8417_v44 }
 0x594   :  { %5385 = vmatpush1.bf16.msra.mxu0 %v8415_v22 }
 0x595   :  { %5386 = vmatprep.subr.bf16.mxu0 %v8423_v23 }
 0x598   :  { %5387 = vmatpush1.bf16.msra.mxu0 %v8421_v24  ;;  %v8493_v24 = vld [vmem:[#allocation4 + $0x1108] ss:$16 sps:$4 sm:$0xff]  }
 0x599   :  { %5388 = vmatprep.subr.bf16.mxu0 %v8429_v25 }
 0x59c   :  { %5389 = vmatpush1.bf16.msra.mxu0 %v8427_v26 }
 0x59d   :  { %5390 = vmatprep.subr.bf16.mxu0 %v8435_v27 }
 0x5a0   :  { %5391 = vmatpush1.bf16.msra.mxu0 %v8433_v28 }
 0x5a1   :  { %5392 = vmatprep.subr.bf16.mxu0 %v8441_v29 }
 0x5a4   :  { %5393 = vmatpush1.bf16.msra.mxu0 %v8439_v33 }
 0x5a5   :  { %5394 = vmatprep.subr.bf16.mxu0 %v8447_v34  ;;  %v8501_v34 = vld [vmem:[#allocation4 + $0x12cc] ss:$16 sps:$4 sm:$0xff]  }
 0x5a8   :  { %5395 = vmatpush1.bf16.msra.mxu0 %v8445_v41  ;;  %v8502_v41 = vld [vmem:[#allocation4 + $0x12a8] ss:$16 sps:$4 sm:$0xff]  }
 0x5a9   :  { %v4449_v52 = vpop.f32.mrf.mxu1  ;;  %5396 = vmatprep.subr.bf16.mxu0 %v8453_v42  ;;  %v8507_v42 = vld [vmem:[#allocation4 + $0x128c] ss:$16 sps:$4 sm:$0xff]  }
 0x5aa   :  { %v4450_v57 = vadd.f32 %v4449_v52, %v4407_v48  ;;  %v8549_v48 = vld [vmem:[#allocation7 + $0x64] ss:$8 sps:$4 sm:$0xff]  }
 0x5ab   :  { %v4451_v31 = vpop.f32.mrf.mxu1  ;;  %v8510_v52 = vld [vmem:[#allocation4 + $0x126c] ss:$16 sps:$4 sm:$0xff]  }
 0x5ac   :  { %v4460_v60 = vmul.f32 0.5, %v4450_v57  ;;  %v4452_v45 = vadd.f32 %v4451_v31, %v4409_v54  ;;  %5397 = vmatpush2.bf16.msra.mxu0 %v8451_v49  ;;  %v8505_v49 = vld [vmem:[#allocation4 + $0x1288] ss:$16 sps:$4 sm:$0xff]   ;;  %v8555_v31 = vld [vmem:[#allocation7 + $0x44] ss:$8 sps:$4 sm:$0xff]  }
 0x5ad   :  { %v4453_v46 = vpop.f32.mrf.mxu1  ;;  %5398 = vmatprep.subr.bf16.mxu0 %v8459_v53  ;;  %v8547_v53 = vld [vmem:[#allocation7 + $0x60] ss:$8 sps:$4 sm:$0xff]  }
 0x5ae   :  { %v4461_v62 = vmul.f32 0.5, %v4452_v45  ;;  %v4454_v63 = vadd.f32 %v4453_v46, %v4411_v50  ;;  %8808 = vtanh.f32 %v4460_v60  ;;  %v8508_v54 = vld [vmem:[#allocation4 + $0x1268] ss:$16 sps:$4 sm:$0xff]   ;;  %v8516_v60 = vld [vmem:[#allocation4 + $0x122c] ss:$16 sps:$4 sm:$0xff]  }
 0x5af   :  { %v4455_v1 = vpop.f32.mrf.mxu1  ;;  %v8511_v50 = vld [vmem:[#allocation4 + $0x1248] ss:$16 sps:$4 sm:$0xff]  }
 0x5b0   :  { %8810 = vtanh.f32 %v4461_v62  ;;  %v4464_v2 = vmul.f32 0.5, %v4454_v63  ;;  %v4456_v3 = vadd.f32 %v4455_v1, %v4413_v13  ;;  %5399 = vmatpush2.bf16.msra.mxu0 %v8457_v51  ;;  %v8558_v51 = vld [vmem:[#allocation7 + $0x34] ss:$8 sps:$4 sm:$0xff]   ;;  %v8514_v46 = vld [vmem:[#allocation4 + $0x1228] ss:$16 sps:$4 sm:$0xff]  }
 0x5b1   :  { %5400 = vmatprep.subr.bf16.mxu0 %v8465_v61  ;;  %v8519_v61 = vld [vmem:[#allocation4 + $0x120c] ss:$16 sps:$4 sm:$0xff]   ;;  %v8556_v13 = vld [vmem:[#allocation7 + $0x30] ss:$8 sps:$4 sm:$0xff]  }
 0x5b2   :  { %8812 = vtanh.f32 %v4464_v2  ;;  %v4465_v59 = vmul.f32 0.5, %v4456_v3  ;;  %v8561_v62 = vld [vmem:[#allocation7 + $0x24] ss:$8 sps:$4 sm:$0xff]   ;;  %v8559_v2 = vld [vmem:[#allocation7 + $0x20] ss:$8 sps:$4 sm:$0xff]  }
 0x5b3   :  { %v8522_v1 = vld [vmem:[#allocation4 + $0x13ec] ss:$16 sps:$4 sm:$0xff]  }
 0x5b4   :  { %8814 = vtanh.f32 %v4465_v59  ;;  %5401 = vmatpush2.bf16.msra.mxu0 %v8463_v4  ;;  %v8520_v4 = vld [vmem:[#allocation4 + $0x13e8] ss:$16 sps:$4 sm:$0xff]  }
 0x5b5   :  { %5402 = vmatprep.subr.bf16.mxu0 %v8471_v56  ;;  %v8525_v56 = vld [vmem:[#allocation4 + $0x13cc] ss:$16 sps:$4 sm:$0xff]   ;;  %v8562_v59 = vld [vmem:[#allocation7 + $0x10] ss:$8 sps:$4 sm:$0xff]  }
 0x5b8   :  { %5403 = vmatpush2.bf16.msra.mxu0 %v8469_v5  ;;  %v8567_v5 = vld [vmem:[#allocation7 + $0x4] ss:$8 sps:$4 sm:$0xff]  }
 0x5b9   :  { %5404 = vmatprep.subr.bf16.mxu0 %v8477_v6  ;;  %v8523_v6 = vld [vmem:[#allocation4 + $0x13c8] ss:$16 sps:$4 sm:$0xff]  }
 0x5bb   :  { %v8809_v9 = vpop.eup %8808 }
 0x5bc   :  { %5405 = vmatpush2.bf16.msra.mxu0 %v8475_v7  ;;  %v4476_v0 = vmul.f32 0.5, %v8809_v9  ;;  %v8528_v7 = vld [vmem:[#allocation4 + $0x13ac] ss:$16 sps:$4 sm:$0xff]  }
 0x5bd   :  { %v8811_v11 = vpop.eup %8810  ;;  %5406 = vmatprep.subr.bf16.mxu0 %v8483_v8  ;;  %v8565_v8 = vld [vmem:[#allocation7] ss:$8 sps:$4 sm:$0xff]   ;;  %v8570_v9 = vld [vmem:[#allocation7 + $0xf4] ss:$8 sps:$4 sm:$0xff]  }
 0x5be   :  { %v4477_v12 = vmul.f32 0.5, %v8811_v11  ;;  %v4484_v22 = vadd.f32 0.5, %v4476_v0  ;;  %v8531_v11 = vld [vmem:[#allocation4 + $0x138c] ss:$16 sps:$4 sm:$0xff]   ;;  %v8532_v0 = vld [vmem:[#allocation4 + $0x1368] ss:$16 sps:$4 sm:$0xff]  }
 0x5bf   :  { %v8813_v14 = vpop.eup %8812 }
 0x5c0   :  { %v4480_v15 = vmul.f32 0.5, %v8813_v14  ;;  %5407 = vmatpush2.bf16.msra.mxu0 %v8481_v10  ;;  %v4485_v20 = vadd.f32 0.5, %v4477_v12  ;;  %v4492_v28 = vmul.f32 %v4484_v22, %v4450_v57  ;;  %v8513_v57 = vld [vmem:[#allocation4 + $0x124c] ss:$16 sps:$4 sm:$0xff]   ;;  %v8526_v10 = vld [vmem:[#allocation4 + $0x13a8] ss:$16 sps:$4 sm:$0xff]  }
 0x5c1   :  { %v8815_v17 = vpop.eup %8814  ;;  %5408 = vmatprep.subr.bf16.mxu0 %v8489_v55  ;;  %v8568_v55 = vld [vmem:[#allocation7 + $0xf0] ss:$8 sps:$4 sm:$0xff]   ;;  %v8534_v14 = vld [vmem:[#allocation4 + $0x136c] ss:$16 sps:$4 sm:$0xff]   ;;  %v8571_v22 = vld [vmem:[#allocation7 + $0xe0] ss:$8 sps:$4 sm:$0xff]  }
 0x5c2   :  { %v4488_v21 = vadd.f32 0.5, %v4480_v15  ;;  %v4481_v44 = vmul.f32 0.5, %v8815_v17  ;;  %v4493_v26 = vmul.f32 %v4485_v20, %v4452_v45  ;;  %v8553_v45 = vld [vmem:[#allocation7 + $0x40] ss:$8 sps:$4 sm:$0xff]   ;;  %v8537_v15 = vld [vmem:[#allocation4 + $0x134c] ss:$16 sps:$4 sm:$0xff]  }
 0x5c3   :  { %v8529_v12 = vld [vmem:[#allocation4 + $0x1388] ss:$16 sps:$4 sm:$0xff]   ;;  %v8540_v17 = vld [vmem:[#allocation4 + $0x132c] ss:$16 sps:$4 sm:$0xff]  }
 0x5c4   :  { %v4489_v23 = vadd.f32 0.5, %v4481_v44  ;;  %5409 = vmatpush2.bf16.msra.mxu0 %v8487_v16  ;;  %v4496_v25 = vmul.f32 %v4488_v21, %v4454_v63  ;;  %v8517_v63 = vld [vmem:[#allocation4 + $0x1208] ss:$16 sps:$4 sm:$0xff]   ;;  %v8543_v20 = vld [vmem:[#allocation4 + $0x130c] ss:$16 sps:$4 sm:$0xff]  }
 0x5c5   :  { %5410 = vmatprep.subr.bf16.mxu0 %v8495_v18  ;;  %v8535_v16 = vld [vmem:[#allocation4 + $0x1348] ss:$16 sps:$4 sm:$0xff]   ;;  %v8573_v44 = vld [vmem:[#allocation7 + $0xe4] ss:$8 sps:$4 sm:$0xff]  }
 0x5c6   :  { %v4497_v27 = vmul.f32 %v4489_v23, %v4456_v3  ;;  %v9200_v33 = vpack.c.bf16 %v4496_v25, %v4492_v28  ;;  %v8564_v3 = vld [vmem:[#allocation7 + $0x14] ss:$8 sps:$4 sm:$0xff]   ;;  %v8538_v18 = vld [vmem:[#allocation4 + $0x1328] ss:$16 sps:$4 sm:$0xff]   ;;  %v8579_v25 = vld [vmem:[#allocation7 + $0xc4] ss:$8 sps:$4 sm:$0xff]  }
 0x5c7   :  { %v8541_v21 = vld [vmem:[#allocation4 + $0x1308] ss:$16 sps:$4 sm:$0xff]   ;;  %v8576_v23 = vld [vmem:[#allocation7 + $0xd4] ss:$8 sps:$4 sm:$0xff]  }
 0x5c8   :  { %5411 = vmatpush2.bf16.msra.mxu0 %v8493_v24  ;;  %v4501_v29 = vpack.c.bf16 %v4497_v27, %v4493_v26  ;;  %v8574_v24 = vld [vmem:[#allocation7 + $0xd0] ss:$8 sps:$4 sm:$0xff]   ;;  %v8577_v26 = vld [vmem:[#allocation7 + $0xc0] ss:$8 sps:$4 sm:$0xff]   ;;  %v8582_v27 = vld [vmem:[#allocation7 + $0xb4] ss:$8 sps:$4 sm:$0xff]  }
 0x5c9   :  { %5906 = vmatprep.subr.bf16.mxu0 %v8546_v47  ;;  %v8580_v28 = vld [vmem:[#allocation7 + $0xb0] ss:$8 sps:$4 sm:$0xff]   ;;  %v8598_v47 = vld [vmem:[#allocation7 + $0x160] ss:$8 sps:$4 sm:$0xff]  }
 0x5ca   :  { %5369 = vmatprep.mubr.bf16.mxu1 %v4501_v29 }
 0x5cb   :  { %5370 = vmatmul.mubr.bf16.vlgmr.msra.gmra.mxu1 %v9200_v33  ;;  %5413 = vmatmul.mubr.bf16.vlgmr.msra.gmra.mxu0 %v9193_v19  ;;  %v8552_v19 = vld [vmem:[#allocation7 + $0x54] ss:$8 sps:$4 sm:$0xff]  }
 0x5cc   :  { %5424 = vmatpush1.bf16.msra.mxu1 %v8496_v30  ;;  %5455 = vmatprep.mubr.bf16.mxu1 %v4501_v29  ;;  %v8585_v29 = vld [vmem:[#allocation7 + $0xa4] ss:$8 sps:$4 sm:$0xff]   ;;  %v8583_v30 = vld [vmem:[#allocation7 + $0xa0] ss:$8 sps:$4 sm:$0xff]  }
 0x5cd   :  { %5425 = vmatprep.subr.bf16.mxu1 %v8501_v34  ;;  %5907 = vmatpush1.bf16.msra.mxu0 %v8544_v43  ;;  %v8586_v34 = vld [vmem:[#allocation7 + $0x90] ss:$8 sps:$4 sm:$0xff]   ;;  %v8597_v43 = vld [vmem:[#allocation7 + $0x274] ss:$8 sps:$4 sm:$0xff]  }
 0x5ce   :  { %5908 = vmatprep.subr.bf16.mxu0 %v8549_v48  ;;  %v8600_v48 = vld [vmem:[#allocation7 + $0x164] ss:$8 sps:$4 sm:$0xff]  }
 0x5d0   :  { %5426 = vmatpush1.bf16.msra.mxu1 %v8499_v39  ;;  %v8591_v39 = vld [vmem:[#allocation7 + $0x84] ss:$8 sps:$4 sm:$0xff]  }
 0x5d1   :  { %5427 = vmatprep.subr.bf16.mxu1 %v8504_v40  ;;  %5909 = vmatpush1.bf16.msra.mxu0 %v8547_v53  ;;  %v8589_v40 = vld [vmem:[#allocation7 + $0x80] ss:$8 sps:$4 sm:$0xff]  }
 0x5d2   :  { %5910 = vmatprep.subr.bf16.mxu0 %v8552_v19  ;;  %v8610_v53 = vld [vmem:[#allocation7 + $0x140] ss:$8 sps:$4 sm:$0xff]   ;;  %v8612_v19 = vld [vmem:[#allocation7 + $0x144] ss:$8 sps:$4 sm:$0xff]  }
 0x5d4   :  { %5428 = vmatpush1.bf16.msra.mxu1 %v8502_v41  ;;  %v8594_v41 = vld [vmem:[#allocation7 + $0x174] ss:$8 sps:$4 sm:$0xff]  }
 0x5d5   :  { %5429 = vmatprep.subr.bf16.mxu1 %v8507_v42  ;;  %5911 = vmatpush1.bf16.msra.mxu0 %v8550_v58  ;;  %v8592_v42 = vld [vmem:[#allocation7 + $0x170] ss:$8 sps:$4 sm:$0xff]   ;;  %v8622_v58 = vld [vmem:[#allocation7 + $0x120] ss:$8 sps:$4 sm:$0xff]  }
 0x5d6   :  { %5912 = vmatprep.subr.bf16.mxu0 %v8555_v31  ;;  %v8624_v31 = vld [vmem:[#allocation7 + $0x124] ss:$8 sps:$4 sm:$0xff]  }
 0x5d8   :  { %5430 = vmatpush1.bf16.msra.mxu1 %v8505_v49  ;;  %v8604_v49 = vld [vmem:[#allocation7 + $0x150] ss:$8 sps:$4 sm:$0xff]  }
 0x5d9   :  { %5431 = vmatprep.subr.bf16.mxu1 %v8510_v52  ;;  %5913 = vmatpush1.bf16.msra.mxu0 %v8553_v45  ;;  %v8606_v52 = vld [vmem:[#allocation7 + $0x154] ss:$8 sps:$4 sm:$0xff]   ;;  %v8634_v45 = vld [vmem:[#allocation7 + $0x100] ss:$8 sps:$4 sm:$0xff]  }
 0x5da   :  { %5914 = vmatprep.subr.bf16.mxu0 %v8558_v51  ;;  %v8636_v51 = vld [vmem:[#allocation7 + $0x104] ss:$8 sps:$4 sm:$0xff]  }
 0x5dc   :  { %5432 = vmatpush1.bf16.msra.mxu1 %v8508_v54  ;;  %v8616_v54 = vld [vmem:[#allocation7 + $0x130] ss:$8 sps:$4 sm:$0xff]  }
 0x5dd   :  { %5433 = vmatprep.subr.bf16.mxu1 %v8513_v57  ;;  %5915 = vmatpush1.bf16.msra.mxu0 %v8556_v13  ;;  %v8618_v57 = vld [vmem:[#allocation7 + $0x134] ss:$8 sps:$4 sm:$0xff]   ;;  %v8648_v13 = vld [vmem:[#allocation7 + $0x1e4] ss:$8 sps:$4 sm:$0xff]  }
 0x5de   :  { %5916 = vmatprep.subr.bf16.mxu0 %v8561_v62  ;;  %v8646_v62 = vld [vmem:[#allocation7 + $0x1e0] ss:$8 sps:$4 sm:$0xff]  }
 0x5e0   :  { %5434 = vmatpush1.bf16.msra.mxu1 %v8511_v50  ;;  %v8628_v50 = vld [vmem:[#allocation7 + $0x110] ss:$8 sps:$4 sm:$0xff]  }
 0x5e1   :  { %5435 = vmatprep.subr.bf16.mxu1 %v8516_v60  ;;  %5917 = vmatpush1.bf16.msra.mxu0 %v8559_v2  ;;  %v8630_v60 = vld [vmem:[#allocation7 + $0x114] ss:$8 sps:$4 sm:$0xff]   ;;  %v8660_v2 = vld [vmem:[#allocation7 + $0x1c4] ss:$8 sps:$4 sm:$0xff]  }
 0x5e2   :  { %5918 = vmatprep.subr.bf16.mxu0 %v8564_v3  ;;  %v8658_v3 = vld [vmem:[#allocation7 + $0x1c0] ss:$8 sps:$4 sm:$0xff]  }
 0x5e4   :  { %5436 = vmatpush1.bf16.msra.mxu1 %v8514_v46  ;;  %v8640_v46 = vld [vmem:[#allocation7 + $0x1f0] ss:$8 sps:$4 sm:$0xff]  }
 0x5e5   :  { %5437 = vmatprep.subr.bf16.mxu1 %v8519_v61  ;;  %5919 = vmatpush1.bf16.msra.mxu0 %v8562_v59  ;;  %v8642_v61 = vld [vmem:[#allocation7 + $0x1f4] ss:$8 sps:$4 sm:$0xff]   ;;  %v8672_v59 = vld [vmem:[#allocation7 + $0x1a4] ss:$8 sps:$4 sm:$0xff]  }
 0x5e6   :  { %5920 = vmatprep.subr.bf16.mxu0 %v8567_v5  ;;  %v8670_v5 = vld [vmem:[#allocation7 + $0x1a0] ss:$8 sps:$4 sm:$0xff]  }
 0x5e8   :  { %5438 = vmatpush1.bf16.msra.mxu1 %v8517_v63  ;;  %v8654_v63 = vld [vmem:[#allocation7 + $0x1d4] ss:$8 sps:$4 sm:$0xff]  }
 0x5e9   :  { %5439 = vmatprep.subr.bf16.mxu1 %v8522_v1  ;;  %5921 = vmatpush1.bf16.msra.mxu0 %v8565_v8  ;;  %v8652_v1 = vld [vmem:[#allocation7 + $0x1d0] ss:$8 sps:$4 sm:$0xff]   ;;  %v8684_v8 = vld [vmem:[#allocation7 + $0x184] ss:$8 sps:$4 sm:$0xff]  }
 0x5ea   :  { %5922 = vmatprep.subr.bf16.mxu0 %v8570_v9  ;;  %v8682_v9 = vld [vmem:[#allocation7 + $0x180] ss:$8 sps:$4 sm:$0xff]  }
 0x5ec   :  { %5440 = vmatpush2.bf16.msra.mxu1 %v8520_v4  ;;  %v8666_v4 = vld [vmem:[#allocation7 + $0x1b4] ss:$8 sps:$4 sm:$0xff]  }
 0x5ed   :  { %5441 = vmatprep.subr.bf16.mxu1 %v8525_v56  ;;  %5923 = vmatpush2.bf16.msra.mxu0 %v8568_v55  ;;  %v8664_v56 = vld [vmem:[#allocation7 + $0x1b0] ss:$8 sps:$4 sm:$0xff]   ;;  %v9205_v55 = vld [vmem:[#allocation6 + $0x4] ss:$8 sm:$0xf] }
 0x5ee   :  { %5924 = vmatprep.subr.bf16.mxu0 %v8573_v44 }
 0x5f0   :  { %5442 = vmatpush2.bf16.msra.mxu1 %v8523_v6  ;;  %v8678_v6 = vld [vmem:[#allocation7 + $0x194] ss:$8 sps:$4 sm:$0xff]  }
 0x5f1   :  { %5443 = vmatprep.subr.bf16.mxu1 %v8528_v7  ;;  %5925 = vmatpush2.bf16.msra.mxu0 %v8571_v22  ;;  %v8676_v7 = vld [vmem:[#allocation7 + $0x190] ss:$8 sps:$4 sm:$0xff]  }
 0x5f2   :  { %5926 = vmatprep.subr.bf16.mxu0 %v8576_v23 }
 0x5f4   :  { %5444 = vmatpush2.bf16.msra.mxu1 %v8526_v10  ;;  %v8690_v10 = vld [vmem:[#allocation7 + $0x374] ss:$8 sps:$4 sm:$0xff]  }
 0x5f5   :  { %5445 = vmatprep.subr.bf16.mxu1 %v8531_v11  ;;  %5927 = vmatpush2.bf16.msra.mxu0 %v8574_v24 }
 0x5f6   :  { %5928 = vmatprep.subr.bf16.mxu0 %v8579_v25 }
 0x5f8   :  { %5446 = vmatpush2.bf16.msra.mxu1 %v8529_v12 }
 0x5f9   :  { %5447 = vmatprep.subr.bf16.mxu1 %v8534_v14  ;;  %5929 = vmatpush2.bf16.msra.mxu0 %v8577_v26  ;;  %v9209_v14 = vrot.slane %v9205_v55, %v9105_v35 }
 0x5fa   :  { %5930 = vmatprep.subr.bf16.mxu0 %v8582_v27 }
 0x5fc   :  { %5448 = vmatpush2.bf16.msra.mxu1 %v8532_v0  ;;  %v4641_v0 = vrot.slane %v9205_v55, %v9109_v37 }
 0x5fd   :  { %5449 = vmatprep.subr.bf16.mxu1 %v8537_v15  ;;  %5931 = vmatpush2.bf16.msra.mxu0 %v8580_v28 }
 0x5fe   :  { %5932 = vmatprep.subr.bf16.mxu0 %v8585_v29 }
 0x600   :  { %5450 = vmatpush2.bf16.msra.mxu1 %v8535_v16 }
 0x601   :  { %5451 = vmatprep.subr.bf16.mxu1 %v8540_v17  ;;  %5933 = vmatpush2.bf16.msra.mxu0 %v8583_v30 }
 0x604   :  { %5452 = vmatpush2.bf16.msra.mxu1 %v8538_v18 }
 0x605   :  { %5453 = vmatprep.subr.bf16.mxu1 %v8543_v20 }
 0x608   :  { %5454 = vmatpush2.bf16.msra.mxu1 %v8541_v21 }
 0x609   :  { %5947 = vmatprep.subr.bf16.mxu1 %v8594_v41 }
 0x60b   :  { %5456 = vmatmul.mubr.bf16.vlgmr.msra.gmra.mxu1 %v9200_v33  ;;  %v8588_v33 = vld [vmem:[#allocation7 + $0x94] ss:$8 sps:$4 sm:$0xff]  }
 0x60c   :  { %5934 = vmatprep.subr.bf16.mxu0 %v8588_v33  ;;  %5948 = vmatpush1.bf16.msra.mxu1 %v8592_v42 }
 0x60d   :  { %5935 = vmatpush2.bf16.msra.mxu0 %v8586_v34  ;;  %5949 = vmatprep.subr.bf16.mxu1 %v8600_v48 }
 0x60e   :  { %5936 = vmatprep.subr.bf16.mxu0 %v8591_v39 }
 0x610   :  { %5950 = vmatpush1.bf16.msra.mxu1 %v8598_v47 }
 0x611   :  { %5937 = vmatpush2.bf16.msra.mxu0 %v8589_v40  ;;  %5951 = vmatprep.subr.bf16.mxu1 %v8606_v52 }
 0x612   :  { %6390 = vmatprep.subr.bf16.mxu0 %v8597_v43 }
 0x614   :  { %5952 = vmatpush1.bf16.msra.mxu1 %v8604_v49 }
 0x615   :  { %5953 = vmatprep.subr.bf16.mxu1 %v8612_v19 }
 0x618   :  { %5954 = vmatpush1.bf16.msra.mxu1 %v8610_v53  ;;  %v8595_v53 = vld [vmem:[#allocation7 + $0x270] ss:$8 sps:$4 sm:$0xff]  }
 0x619   :  { %5955 = vmatprep.subr.bf16.mxu1 %v8618_v57 }
 0x61c   :  { %5956 = vmatpush1.bf16.msra.mxu1 %v8616_v54  ;;  %v8603_v54 = vld [vmem:[#allocation7 + $0x264] ss:$8 sps:$4 sm:$0xff]  }
 0x61d   :  { %5957 = vmatprep.subr.bf16.mxu1 %v8624_v31  ;;  %v8601_v31 = vld [vmem:[#allocation7 + $0x260] ss:$8 sps:$4 sm:$0xff]  }
 0x620   :  { %5958 = vmatpush1.bf16.msra.mxu1 %v8622_v58 }
 0x621   :  { %5959 = vmatprep.subr.bf16.mxu1 %v8630_v60  ;;  %v8607_v60 = vld [vmem:[#allocation7 + $0x250] ss:$8 sps:$4 sm:$0xff]  }
 0x624   :  { %5960 = vmatpush1.bf16.msra.mxu1 %v8628_v50  ;;  %v8609_v50 = vld [vmem:[#allocation7 + $0x254] ss:$8 sps:$4 sm:$0xff]  }
 0x625   :  { %5961 = vmatprep.subr.bf16.mxu1 %v8636_v51  ;;  %v8613_v51 = vld [vmem:[#allocation7 + $0x240] ss:$8 sps:$4 sm:$0xff]  }
 0x628   :  { %5962 = vmatpush1.bf16.msra.mxu1 %v8634_v45  ;;  %v8615_v45 = vld [vmem:[#allocation7 + $0x244] ss:$8 sps:$4 sm:$0xff]  }
 0x629   :  { %5963 = vmatprep.subr.bf16.mxu1 %v8642_v61  ;;  %v8619_v61 = vld [vmem:[#allocation7 + $0x230] ss:$8 sps:$4 sm:$0xff]  }
 0x62c   :  { %5964 = vmatpush2.bf16.msra.mxu1 %v8640_v46  ;;  %v8621_v46 = vld [vmem:[#allocation7 + $0x234] ss:$8 sps:$4 sm:$0xff]  }
 0x62d   :  { %5965 = vmatprep.subr.bf16.mxu1 %v8648_v13  ;;  %v8627_v13 = vld [vmem:[#allocation7 + $0x224] ss:$8 sps:$4 sm:$0xff]  }
 0x630   :  { %5966 = vmatpush2.bf16.msra.mxu1 %v8646_v62  ;;  %v8625_v62 = vld [vmem:[#allocation7 + $0x220] ss:$8 sps:$4 sm:$0xff]  }
 0x631   :  { %5967 = vmatprep.subr.bf16.mxu1 %v8654_v63  ;;  %v8633_v63 = vld [vmem:[#allocation7 + $0x214] ss:$8 sps:$4 sm:$0xff]  }
 0x634   :  { %5968 = vmatpush2.bf16.msra.mxu1 %v8652_v1  ;;  %v8631_v1 = vld [vmem:[#allocation7 + $0x210] ss:$8 sps:$4 sm:$0xff]  }
 0x635   :  { %5969 = vmatprep.subr.bf16.mxu1 %v8660_v2  ;;  %v8639_v2 = vld [vmem:[#allocation7 + $0x204] ss:$8 sps:$4 sm:$0xff]  }
 0x638   :  { %5970 = vmatpush2.bf16.msra.mxu1 %v8658_v3 }
 0x639   :  { %5971 = vmatprep.subr.bf16.mxu1 %v8666_v4 }
 0x63c   :  { %5972 = vmatpush2.bf16.msra.mxu1 %v8664_v56  ;;  %v8637_v56 = vld [vmem:[#allocation7 + $0x200] ss:$8 sps:$4 sm:$0xff]  }
 0x63d   :  { %5973 = vmatprep.subr.bf16.mxu1 %v8672_v59 }
 0x640   :  { %5974 = vmatpush2.bf16.msra.mxu1 %v8670_v5  ;;  %v8645_v5 = vld [vmem:[#allocation7 + $0x2f4] ss:$8 sps:$4 sm:$0xff]  }
 0x641   :  { %5975 = vmatprep.subr.bf16.mxu1 %v8678_v6 }
 0x644   :  { %5976 = vmatpush2.bf16.msra.mxu1 %v8676_v7  ;;  %v9219_v7 = vrot.slane %v9205_v55, %v9107_v36  ;;  %v8657_v36 = vld [vmem:[#allocation7 + $0x2d4] ss:$8 sps:$4 sm:$0xff]  }
 0x645   :  { %5977 = vmatprep.subr.bf16.mxu1 %v8684_v8  ;;  %v8643_v8 = vld [vmem:[#allocation7 + $0x2f0] ss:$8 sps:$4 sm:$0xff]  }
 0x648   :  { %5978 = vmatpush2.bf16.msra.mxu1 %v8682_v9 }
 0x649   :  { %6431 = vmatprep.subr.bf16.mxu1 %v8690_v10  ;;  %v8651_v10 = vld [vmem:[#allocation7 + $0x2e4] ss:$8 sps:$4 sm:$0xff]  }
 0x64b   :  { %v5328_v11 = vpop.f32.mrf.mxu0 }
 0x64c   :  { %v5329_v16 = vadd.f32 %v5328_v11, %v9209_v14  ;;  %v4649_v11 = vrot.slane %v9205_v55, %v9111_v38  ;;  %v8663_v38 = vld [vmem:[#allocation7 + $0x2c4] ss:$8 sps:$4 sm:$0xff]  }
 0x64d   :  { %v5330_v12 = vpop.f32.mrf.mxu0 }
 0x64e   :  { %v5331_v18 = vadd.f32 %v5330_v12, %v4641_v0 }
 0x64f   :  { %v5332_v15 = vpop.f32.mrf.mxu0 }
 0x650   :  { %v5333_v3 = vadd.f32 %v5332_v15, %v9209_v14 }
 0x651   :  { %v5334_v21 = vpop.f32.mrf.mxu0 }
 0x652   :  { %v5335_v25 = vadd.f32 %v5334_v21, %v4641_v0  ;;  %v8649_v0 = vld [vmem:[#allocation7 + $0x2e0] ss:$8 sps:$4 sm:$0xff]  }
 0x68b   :  { %v5371_v17 = vpop.f32.mrf.mxu1  ;;  %v5414_v4 = vpop.f32.mrf.mxu0 }
 0x68c   :  { %v5372_v20 = vadd.f32 %v5371_v17, %v5329_v16  ;;  %v5415_v14 = vadd.f32 %v5414_v4, %v9219_v7  ;;  %v6482_v4 = vld [vmem:[%s9306_s8 + $0x10] sm:$0xff] }
 0x68d   :  { %v5373_v44 = vpop.f32.mrf.mxu1  ;;  %v5416_v6 = vpop.f32.mrf.mxu0 }
 0x68e   :  { %v5466_v22 = vmul.f32 0.5, %v5372_v20  ;;  %v5374_v23 = vadd.f32 %v5373_v44, %v5331_v18  ;;  %v5417_v16 = vadd.f32 %v5416_v6, %v4649_v11  ;;  %v8696_v6 = vld [vmem:[#allocation7 + $0x354] ss:$8 sps:$4 sm:$0xff]  }
 0x68f   :  { %v5375_v24 = vpop.f32.mrf.mxu1  ;;  %v9224_v12 = vpop.f32.mrf.mxu0 }
 0x690   :  { %8816 = vtanh.f32 %v5466_v22  ;;  %v5467_v26 = vmul.f32 0.5, %v5374_v23  ;;  %v9215_v59 = vadd.f32 %v5375_v24, %v5333_v3  ;;  %v8655_v22 = vld [vmem:[#allocation7 + $0x2d0] ss:$8 sps:$4 sm:$0xff]  }
 0x691   :  { %v5377_v27 = vpop.f32.mrf.mxu1  ;;  %v5420_v18 = vpop.f32.mrf.mxu0 }
 0x692   :  { %8818 = vtanh.f32 %v5467_v26  ;;  %v5378_v28 = vadd.f32 %v5377_v27, %v5335_v25  ;;  %v5470_v9 = vmul.f32 0.5, %v9215_v59  ;;  %v5421_v55 = vadd.f32 %v5420_v18, %v4649_v11  ;;  %v8661_v27 = vld [vmem:[#allocation7 + $0x2c0] ss:$8 sps:$4 sm:$0xff]  }
 0x693   :  { %v8703_v18 = vld [vmem:[#allocation7 + $0x320] ss:$8 sps:$4 sm:$0xff]  }
 0x694   :  { %v5471_v29 = vmul.f32 0.5, %v5378_v28 }
 0x696   :  { %8820 = vtanh.f32 %v5471_v29 }
 0x697   :  { %8822 = vtanh.f32 %v5470_v9  ;;  %v6480_v9 = vld [vmem:[%s9306_s8] sm:$0xff] }
 0x69d   :  { %v8817_v30 = vpop.eup %8816 }
 0x69e   :  { %v5482_v33 = vmul.f32 0.5, %v8817_v30  ;;  %v8667_v30 = vld [vmem:[#allocation7 + $0x2b0] ss:$8 sps:$4 sm:$0xff]  }
 0x69f   :  { %v8819_v34 = vpop.eup %8818 }
 0x6a0   :  { %v5490_v39 = vadd.f32 0.5, %v5482_v33  ;;  %v5483_v40 = vmul.f32 0.5, %v8819_v34  ;;  %v8675_v33 = vld [vmem:[#allocation7 + $0x2a4] ss:$8 sps:$4 sm:$0xff]  }
 0x6a2   :  { %v5491_v41 = vadd.f32 0.5, %v5483_v40  ;;  %v5498_v43 = vmul.f32 %v5490_v39, %v5372_v20  ;;  %v8673_v39 = vld [vmem:[#allocation7 + $0x2a0] ss:$8 sps:$4 sm:$0xff]  }
 0x6a3   :  { %v8821_v42 = vpop.eup %8820 }
 0x6a4   :  { %v5499_v47 = vmul.f32 %v5491_v41, %v5374_v23  ;;  %v5487_v48 = vmul.f32 0.5, %v8821_v42  ;;  %v5506_v19 = vpack.c.bf16 %v5498_v43, %v5498_v43  ;;  %v8823_v34 = vpop.eup %8822  ;;  %v8681_v41 = vld [vmem:[#allocation7 + $0x294] ss:$8 sps:$4 sm:$0xff]  }
 0x6a5   :  { %v5486_v40 = vmul.f32 0.5, %v8823_v34  ;;  %v8729_v34 = vld [vmem:[#allocation7 + $0x3a4] ss:$8 sps:$4 sm:$0xff]  }
 0x6a6   :  { %v5507_v49 = vpack.c.bf16 %v5499_v47, %v5499_v47  ;;  %v5495_v52 = vadd.f32 0.5, %v5487_v48  ;;  %v8679_v47 = vld [vmem:[#allocation7 + $0x290] ss:$8 sps:$4 sm:$0xff]  }
 0x6a8   :  { %v5503_v57 = vmul.f32 %v5495_v52, %v5378_v28  ;;  %5938 = vmatprep.mubr.bf16.mxu0 %v5507_v49  ;;  %v8669_v28 = vld [vmem:[#allocation7 + $0x2b4] ss:$8 sps:$4 sm:$0xff]   ;;  %v5494_v49 = vadd.f32 0.5, %v5486_v40  ;;  %v8687_v52 = vld [vmem:[#allocation7 + $0x284] ss:$8 sps:$4 sm:$0xff]  }
 0x6a9   :  { %5939 = vmatmul.mubr.bf16.vlgmr.msra.gmra.mxu0 %v5506_v19  ;;  %v8727_v40 = vld [vmem:[#allocation7 + $0x3a0] ss:$8 sps:$4 sm:$0xff]  }
 0x6aa   :  { %v5989_v58 = vpack.c.bf16 %v5503_v57, %v5503_v57  ;;  %6391 = vmatpush1.bf16.msra.mxu0 %v8595_v53  ;;  %v8685_v57 = vld [vmem:[#allocation7 + $0x280] ss:$8 sps:$4 sm:$0xff]  }
 0x6ab   :  { %6392 = vmatprep.subr.bf16.mxu0 %v8603_v54 }
 0x6ac   :  { %6422 = vmatprep.mubr.bf16.mxu0 %v5989_v58 }
 0x6ae   :  { %6393 = vmatpush1.bf16.msra.mxu0 %v8601_v31  ;;  %v5502_v31 = vmul.f32 %v5494_v49, %v9215_v59  ;;  %v8691_v59 = vld [vmem:[#allocation7 + $0x360] ss:$8 sps:$4 sm:$0xff]  }
 0x6af   :  { %6394 = vmatprep.subr.bf16.mxu0 %v8609_v50  ;;  %v8733_v49 = vld [vmem:[#allocation7 + $0x380] ss:$8 sps:$4 sm:$0xff]  }
 0x6b2   :  { %6395 = vmatpush1.bf16.msra.mxu0 %v8607_v60 }
 0x6b3   :  { %6396 = vmatprep.subr.bf16.mxu0 %v8615_v45 }
 0x6b6   :  { %6397 = vmatpush1.bf16.msra.mxu0 %v8613_v51 }
 0x6b7   :  { %6398 = vmatprep.subr.bf16.mxu0 %v8621_v46 }
 0x6ba   :  { %6399 = vmatpush1.bf16.msra.mxu0 %v8619_v61  ;;  %v8688_v61 = vld [vmem:[#allocation7 + $0x370] ss:$8 sps:$4 sm:$0xff]  }
 0x6bb   :  { %6400 = vmatprep.subr.bf16.mxu0 %v8627_v13  ;;  %v5988_v13 = vpack.c.bf16 %v5502_v31, %v5502_v31  ;;  %v7504_v31 = vld [vmem:[%s9306_s8 + $0x20] sm:$0xff] }
 0x6be   :  { %6401 = vmatpush1.bf16.msra.mxu0 %v8625_v62 }
 0x6bf   :  { %6402 = vmatprep.subr.bf16.mxu0 %v8633_v63  ;;  %v8693_v63 = vld [vmem:[#allocation7 + $0x364] ss:$8 sps:$4 sm:$0xff]  }
 0x6c2   :  { %6403 = vmatpush1.bf16.msra.mxu0 %v8631_v1  ;;  %v8976_v1 = vmov 0.0  }
 0x6c3   :  { %6404 = vmatprep.subr.bf16.mxu0 %v8639_v2  ;;  %v6483_v2 = vld [vmem:[%s9306_s8 + $0x18] sm:$0x1] }
 0x6c6   :  { %6405 = vmatpush1.bf16.msra.mxu0 %v8637_v56 }
 0x6c7   :  { %6406 = vmatprep.subr.bf16.mxu0 %v8645_v5  ;;  %v7500_v5 = vld [vmem:[#allocation10] ss:$0 sm:$0xff] }
 0x6ca   :  { %6407 = vmatpush2.bf16.msra.mxu0 %v8643_v8  ;;  %v6481_v8 = vld [vmem:[%s9306_s8 + $0x8] sm:$0xff] }
 0x6cb   :  { %v5457_v15 = vpop.f32.mrf.mxu1  ;;  %6408 = vmatprep.subr.bf16.mxu0 %v8651_v10  ;;  %v9251_v10 = vld [vmem:[%s9298_s0] sm:$0xff] }
 0x6cc   :  { %v5458_v17 = vadd.f32 %v5457_v15, %v5415_v14  ;;  %v9254_v11 = vsub.f32 %v9251_v10, %v7500_v5  ;;  %v8694_v14 = vld [vmem:[#allocation7 + $0x350] ss:$8 sps:$4 sm:$0xff]   ;;  %v8697_v15 = vld [vmem:[#allocation7 + $0x340] ss:$8 sps:$4 sm:$0xff]  }
 0x6cd   :  { %v5459_v20 = vpop.f32.mrf.mxu1 }
 0x6ce   :  { %v5468_v21 = vmul.f32 0.5, %v5458_v17  ;;  %v5460_v44 = vadd.f32 %v5459_v20, %v5417_v16  ;;  %6409 = vmatpush2.bf16.msra.mxu0 %v8649_v0  ;;  %v8699_v0 = vld [vmem:[#allocation7 + $0x344] ss:$8 sps:$4 sm:$0xff]   ;;  %v8700_v16 = vld [vmem:[#allocation7 + $0x330] ss:$8 sps:$4 sm:$0xff]  }
 0x6cf   :  { %v9227_v23 = vpop.f32.mrf.mxu1  ;;  %6410 = vmatprep.subr.bf16.mxu0 %v8657_v36  ;;  %v8702_v36 = vld [vmem:[#allocation7 + $0x334] ss:$8 sps:$4 sm:$0xff]  }
 0x6d0   :  { %8824 = vtanh.f32 %v5468_v21  ;;  %v5469_v24 = vmul.f32 0.5, %v5460_v44  ;;  %v8708_v20 = vld [vmem:[#allocation7 + $0x314] ss:$8 sps:$4 sm:$0xff]   ;;  %v8706_v21 = vld [vmem:[#allocation7 + $0x310] ss:$8 sps:$4 sm:$0xff]  }
 0x6d1   :  { %v5463_v25 = vpop.f32.mrf.mxu1 }
 0x6d2   :  { %8826 = vtanh.f32 %v5469_v24  ;;  %v5464_v26 = vadd.f32 %v5463_v25, %v5421_v55  ;;  %6411 = vmatpush2.bf16.msra.mxu0 %v8655_v22  ;;  %v5419_v22 = vadd.f32 %v9224_v12, %v9219_v7  ;;  %v8714_v24 = vld [vmem:[#allocation7 + $0x3f4] ss:$8 sps:$4 sm:$0xff]   ;;  %v8712_v25 = vld [vmem:[#allocation7 + $0x3f0] ss:$8 sps:$4 sm:$0xff]   ;;  %v8723_v7 = vld [vmem:[#allocation7 + $0x3c4] ss:$8 sps:$4 sm:$0xff]  }
 0x6d3   :  { %6412 = vmatprep.subr.bf16.mxu0 %v8663_v38  ;;  %v8709_v38 = vld [vmem:[#allocation7 + $0x300] ss:$8 sps:$4 sm:$0xff]  }
 0x6d4   :  { %v5473_v29 = vmul.f32 0.5, %v5464_v26  ;;  %v5462_v55 = vadd.f32 %v9227_v23, %v5419_v22  ;;  %v8721_v12 = vld [vmem:[#allocation7 + $0x3c0] ss:$8 sps:$4 sm:$0xff]   ;;  %v8726_v23 = vld [vmem:[#allocation7 + $0x3b4] ss:$8 sps:$4 sm:$0xff]  }
 0x6d6   :  { %8828 = vtanh.f32 %v5473_v29  ;;  %6413 = vmatpush2.bf16.msra.mxu0 %v8661_v27  ;;  %v8717_v27 = vld [vmem:[#allocation7 + $0x3e4] ss:$8 sps:$4 sm:$0xff]   ;;  %v8720_v29 = vld [vmem:[#allocation7 + $0x3d4] ss:$8 sps:$4 sm:$0xff]  }
 0x6d7   :  { %6414 = vmatprep.subr.bf16.mxu0 %v8669_v28  ;;  %v8715_v28 = vld [vmem:[#allocation7 + $0x3e0] ss:$8 sps:$4 sm:$0xff]  }
 0x6da   :  { %6415 = vmatpush2.bf16.msra.mxu0 %v8667_v30  ;;  %v8718_v30 = vld [vmem:[#allocation7 + $0x3d0] ss:$8 sps:$4 sm:$0xff]  }
 0x6db   :  { %6416 = vmatprep.subr.bf16.mxu0 %v8675_v33  ;;  %v8724_v33 = vld [vmem:[#allocation7 + $0x3b0] ss:$8 sps:$4 sm:$0xff]  }
 0x6dd   :  { %v8825_v42 = vpop.eup %8824 }
 0x6de   :  { %v5484_v43 = vmul.f32 0.5, %v8825_v42  ;;  %6417 = vmatpush2.bf16.msra.mxu0 %v8673_v39  ;;  %v8732_v42 = vld [vmem:[#allocation7 + $0x394] ss:$8 sps:$4 sm:$0xff]  }
 0x6df   :  { %v8827_v48 = vpop.eup %8826  ;;  %6418 = vmatprep.subr.bf16.mxu0 %v8681_v41 }
 0x6e0   :  { %v5492_v53 = vadd.f32 0.5, %v5484_v43  ;;  %v5485_v19 = vmul.f32 0.5, %v8827_v48  ;;  %v8730_v43 = vld [vmem:[#allocation7 + $0x390] ss:$8 sps:$4 sm:$0xff]   ;;  %v8735_v48 = vld [vmem:[#allocation7 + $0x384] ss:$8 sps:$4 sm:$0xff]  }
 0x6e2   :  { %v5493_v54 = vadd.f32 0.5, %v5485_v19  ;;  %6419 = vmatpush2.bf16.msra.mxu0 %v8679_v47  ;;  %v5500_v50 = vmul.f32 %v5492_v53, %v5458_v17  ;;  %v8705_v17 = vld [vmem:[#allocation7 + $0x324] ss:$8 sps:$4 sm:$0xff]   ;;  %v7507_v19 = vld [vmem:[%s9306_s8 + $0x38] sm:$0x1] }
 0x6e3   :  { %v8829_v58 = vpop.eup %8828  ;;  %6420 = vmatprep.subr.bf16.mxu0 %v8687_v52 }
 0x6e4   :  { %v5501_v60 = vmul.f32 %v5493_v54, %v5460_v44  ;;  %v5489_v45 = vmul.f32 0.5, %v8829_v58  ;;  %v5508_v62 = vpack.c.bf16 %v5500_v50, %v5500_v50  ;;  %v8711_v44 = vld [vmem:[#allocation7 + $0x304] ss:$8 sps:$4 sm:$0xff]  }
 0x6e5   :  { %v7506_v54 = vld [vmem:[%s9306_s8 + $0x30] sm:$0xff]  ;;  %v7505_v58 = vld [vmem:[%s9306_s8 + $0x28] sm:$0xff] }
 0x6e6   :  { %v5509_v51 = vpack.c.bf16 %v5501_v60, %v5501_v60  ;;  %v5497_v46 = vadd.f32 0.5, %v5489_v45  ;;  %6421 = vmatpush2.bf16.msra.mxu0 %v8685_v57  ;;  %v7503_v57 = vld [vmem:[#allocation10 + $0x1] ss:$0 sm:$0xff] }
 0x6e7   :  { %7521 = vmatprep.subr.mxu0 %v8976_v1  ;;  %v6573_v50 = vsub.f32 %v9251_v10, %v7503_v57 }
 0x6e8   :  { %v5505_v3 = vmul.f32 %v5497_v46, %v5464_v26  ;;  %5979 = vmatprep.mubr.bf16.mxu1 %v5509_v51  ;;  %v5472_v26 = vmul.f32 0.5, %v5462_v55 }
 0x6e9   :  { %5980 = vmatmul.mubr.bf16.vlgmr.msra.gmra.mxu1 %v5508_v62  ;;  %6423 = vmatmul.mubr.bf16.vlgmr.msra.gmra.mxu0 %v5988_v13 }
 0x6ea   :  { %v5991_v56 = vpack.c.bf16 %v5505_v3, %v5505_v3  ;;  %6432 = vmatpush1.bf16.msra.mxu1 %v8688_v61  ;;  %7522 = vmatpush3.msk.msra.mxu0 %vm6487_vm3, %v6483_v2  ;;  %8830 = vtanh.f32 %v5472_v26  ;;  %v5574_v61 = vld [vmem:[#allocation9] sm:$0x3] }
 0x6eb   :  { %6433 = vmatprep.subr.bf16.mxu1 %v8693_v63  ;;  %7523 = vmatprep.subr.mxu0 %v8976_v1  ;;  %v5579_v13 = vrot.slane %v5574_v61, %v9105_v35  ;;  %v5583_v62 = vrot.slane %v5574_v61, %v9109_v37 }
 0x6ec   :  { %6463 = vmatprep.mubr.bf16.mxu1 %v5991_v56  ;;  %7524 = vmatpush3.msra.mxu0 %v6482_v4 }
 0x6ed   :  { %7525 = vmatprep.subr.mxu0 %v8976_v1  ;;  %7529 = vmatprep.mubr.msk.f32.mxu0 %vm8977_vm4, %v8976_v1 }
 0x6ee   :  { %6434 = vmatpush1.bf16.msra.mxu1 %v8691_v59  ;;  %7526 = vmatpush3.msra.mxu0 %v6481_v8 }
 0x6ef   :  { %6435 = vmatprep.subr.bf16.mxu1 %v8696_v6  ;;  %7527 = vmatprep.subr.mxu0 %v8976_v1 }
 0x6f0   :  { %7528 = vmatpush3.msra.mxu0 %v6480_v9 }
 0x6f1   :  { %7530 = vmatmul.mubr.msk.f32.vlgmr.msra.gmra.mxu0 %vm157_vm2, %v9254_v11 }
 0x6f2   :  { %6436 = vmatpush1.bf16.msra.mxu1 %v8694_v14 }
 0x6f3   :  { %6437 = vmatprep.subr.bf16.mxu1 %v8699_v0 }
 0x6f6   :  { %6438 = vmatpush1.bf16.msra.mxu1 %v8697_v15 }
 0x6f7   :  { %6439 = vmatprep.subr.bf16.mxu1 %v8702_v36  ;;  %v8831_v39 = vpop.eup %8830 }
 0x6f8   :  { %v5488_v41 = vmul.f32 0.5, %v8831_v39 }
 0x6fa   :  { %6440 = vmatpush1.bf16.msra.mxu1 %v8700_v16  ;;  %v5496_v47 = vadd.f32 0.5, %v5488_v41 }
 0x6fb   :  { %6441 = vmatprep.subr.bf16.mxu1 %v8705_v17  ;;  %v6058_v17 = vld [vmem:[#allocation9 + $0x2] sm:$0x3] }
 0x6fc   :  { %v5504_v52 = vmul.f32 %v5496_v47, %v5462_v55 }
 0x6fe   :  { %6442 = vmatpush1.bf16.msra.mxu1 %v8703_v18  ;;  %v5990_v53 = vpack.c.bf16 %v5504_v52, %v5504_v52  ;;  %v6063_v18 = vrot.slane %v6058_v17, %v9105_v35  ;;  %v6661_v35 = vand.u32 127, %v400_v32 }
 0x6ff   :  { %6443 = vmatprep.subr.bf16.mxu1 %v8708_v20  ;;  %v6067_v20 = vrot.slane %v6058_v17, %v9109_v37 }
 0x700   :  { %vm6663_vm5 = vcmp.eq.s32.totalorder %v6661_v35, 0  ;;  %vm6678_vm6 = vcmp.eq.s32.totalorder %v6661_v35, 4  ;;  %vm6680_vm7 = vcmp.eq.s32.totalorder %v6661_v35, 5 }
 0x701   :  { %vm6682_vm8 = vmor %vm6678_vm6, %vm6680_vm7 }
 0x702   :  { %6444 = vmatpush1.bf16.msra.mxu1 %v8706_v21 }
 0x703   :  { %6445 = vmatprep.subr.bf16.mxu1 %v8711_v44 }
 0x706   :  { %6446 = vmatpush1.bf16.msra.mxu1 %v8709_v38 }
 0x707   :  { %6447 = vmatprep.subr.bf16.mxu1 %v8714_v24 }
 0x70a   :  { %6448 = vmatpush2.bf16.msra.mxu1 %v8712_v25 }
 0x70b   :  { %6449 = vmatprep.subr.bf16.mxu1 %v8717_v27 }
 0x70e   :  { %6450 = vmatpush2.bf16.msra.mxu1 %v8715_v28 }
 0x70f   :  { %6451 = vmatprep.subr.bf16.mxu1 %v8720_v29 }
 0x712   :  { %6452 = vmatpush2.bf16.msra.mxu1 %v8718_v30 }
 0x713   :  { %6453 = vmatprep.subr.bf16.mxu1 %v8723_v7 }
 0x716   :  { %6454 = vmatpush2.bf16.msra.mxu1 %v8721_v12 }
 0x717   :  { %6455 = vmatprep.subr.bf16.mxu1 %v8726_v23 }
 0x71a   :  { %6456 = vmatpush2.bf16.msra.mxu1 %v8724_v33  ;;  %v7510_v33 = vsel %vm6663_vm5, 1.0, %v8976_v1 }
 0x71b   :  { %6457 = vmatprep.subr.bf16.mxu1 %v8729_v34 }
 0x71e   :  { %6458 = vmatpush2.bf16.msra.mxu1 %v8727_v40 }
 0x71f   :  { %6459 = vmatprep.subr.bf16.mxu1 %v8732_v42 }
 0x722   :  { %6460 = vmatpush2.bf16.msra.mxu1 %v8730_v43 }
 0x723   :  { %6461 = vmatprep.subr.bf16.mxu1 %v8735_v48 }
 0x726   :  { %6462 = vmatpush2.bf16.msra.mxu1 %v8733_v49 }
 0x727   :  { %7532 = vmatprep.subr.mxu1 %v8976_v1 }
 0x729   :  { %6464 = vmatmul.mubr.bf16.vlgmr.msra.gmra.mxu1 %v5990_v53 }
 0x72a   :  { %7533 = vmatpush3.msk.msra.mxu1 %vm6487_vm3, %v7507_v19  ;;  %7540 = vmatprep.mubr.msk.f32.mxu1 %vm8977_vm4, %v8976_v1 }
 0x72b   :  { %7534 = vmatprep.subr.mxu1 %v8976_v1 }
 0x72c   :  { %7535 = vmatpush3.msra.mxu1 %v7506_v54 }
 0x72d   :  { %7536 = vmatprep.subr.mxu1 %v8976_v1 }
 0x72e   :  { %7537 = vmatpush3.msra.mxu1 %v7505_v58 }
 0x72f   :  { %7538 = vmatprep.subr.mxu1 %v8976_v1 }
 0x730   :  { %7539 = vmatpush3.msra.mxu1 %v7504_v31 }
 0x731   :  { %7541 = vmatmul.mubr.msk.f32.vlgmr.msra.gmra.mxu1 %vm157_vm2, %v6573_v50 }
 0x769   :  { %v5940_v60 = vpop.f32.mrf.mxu0 }
 0x76a   :  { %v5941_v63 = vadd.f32 %v5940_v60, %v5579_v13 }
 0x76b   :  { %v5942_v45 = vpop.f32.mrf.mxu0 }
 0x76c   :  { %v5943_v4 = vadd.f32 %v5942_v45, %v5583_v62 }
 0x76d   :  { %v5944_v51 = vpop.f32.mrf.mxu0 }
 0x76f   :  { %v5945_v46 = vpop.f32.mrf.mxu0 }
 0x7a9   :  { %v5981_v2 = vpop.f32.mrf.mxu1  ;;  %v6424_v3 = vpop.f32.mrf.mxu0 }
 0x7aa   :  { %v5982_v56 = vadd.f32 %v5981_v2, %v5941_v63  ;;  %v6425_v21 = vadd.f32 %v6424_v3, %v6063_v18 }
 0x7ab   :  { %v5983_v59 = vpop.f32.mrf.mxu1  ;;  %v6426_v5 = vpop.f32.mrf.mxu0 }
 0x7ac   :  { %v5984_v6 = vadd.f32 %v5983_v59, %v5943_v4  ;;  %v6427_v22 = vadd.f32 %v6426_v5, %v6067_v20 }
 0x7ad   :  { %v5985_v8 = vpop.f32.mrf.mxu1  ;;  %v6428_v9 = vpop.f32.mrf.mxu0 }
 0x7af   :  { %v5986_v10 = vpop.f32.mrf.mxu1  ;;  %v6429_v14 = vpop.f32.mrf.mxu0 }
 0x7b1   :  { %v6557_v0 = vpop.f32.mrf.mxu0 }
 0x7b2   :  { %v6561_v15 = vmul.f32 %v6557_v0, %v9254_v11 }
 0x7b3   :  { %v7531_v36 = vpop.f32.mrf.mxu0 }
 0x7b4   :  { %v6562_v16 = vsel %vm157_vm2, %v6561_v15, 0.0 }
 0x7b5   :  { %6563 = vadd.xlane.f32.xlu0 %v6562_v16 }
 0x7e9   :  { %v6465_v44 = vpop.f32.mrf.mxu1 }
 0x7ea   :  { %v6466_v38 = vadd.f32 %v6465_v44, %v6425_v21 }
 0x7eb   :  { %v6467_v55 = vpop.f32.mrf.mxu1 }
 0x7ec   :  { %v6669_v24 = vadd.f32 %v6466_v38, %v5982_v56  ;;  %v6468_v25 = vadd.f32 %v6467_v55, %v6427_v22 }
 0x7ed   :  { %v6469_v26 = vpop.f32.mrf.mxu1 }
 0x7ee   :  { %v6670_v27 = vadd.f32 %v6468_v25, %v5984_v6  ;;  %v6671_v39 = vmul.f32 0.5, %v6669_v24 }
 0x7ef   :  { %v6470_v28 = vpop.f32.mrf.mxu1 }
 0x7f0   :  { %v6672_v40 = vmul.f32 0.5, %v6670_v27 }
 0x7f1   :  { %v6651_v11 = vpop.f32.mrf.mxu1 }
 0x7f2   :  { %v6655_v29 = vmul.f32 %v6651_v11, %v6573_v50 }
 0x7f3   :  { %v7542_v30 = vpop.f32.mrf.mxu1 }
 0x7f4   :  { %v6656_v7 = vsel %vm157_vm2, %v6655_v29, 0.0 }
 0x7f5   :  { %6657 = vadd.xlane.f32.xlu0 %v6656_v7 }
 0x83e   :  { %v6564_v12 = vpop.xlane.xlu0 %6563 }
 0x87e   :  { %v6658_v37 = vpop.xlane.xlu0 %6657 }
 0x87f   :  { %v6659_v23 = vadd.f32 %v6658_v37, %v6564_v12 }
 0x881   :  { %v6673_v34 = vmul.f32 0.01, %v6659_v23 }
 0x883   :  { %v6674_v41 = vmul.f32 %v7510_v33, %v6673_v34  ;;  %v6675_v42 = vmul.f32 0.0, %v6673_v34 }
 0x885   :  { %v6676_v43 = vsub.f32 %v6671_v39, %v6674_v41  ;;  %v6677_v47 = vsub.f32 %v6672_v40, %v6675_v42 }
 0x887   :  { %v6684_v48 = vmax.f32 %v6676_v43, 0.0  ;;  %6695 = vst [vmem:[%s9307_s9 + $0x8] sm:$0xff] %v6677_v47 }
 0x889   :  { %v6686_v32 = vmin.f32 %v6684_v48, 1.0 }
 0x88b   :  { %v6692_v49 = vsel %vm6682_vm8, %v6686_v32, %v6676_v43 }
 0x88c   :  { %6694 = vst [vmem:[%s9307_s9] sm:$0xff] %v6692_v49 }
 0x88d   :  { %6700 = vsyncpa [#allocation3], 1 }
 0x88e   :  { %6701 = vsyncpa [#allocation5], 1 }
 0x88f   :  { %6702 = vsyncpa [#allocation8], 1 }
 0x890   :  { %6703 = vsyncpa [#allocation11], 1 }

</bundles_post_ra>
